<compile_context>
chip_gen: v7x
topology: tpu7x:2x2x1
jax: 0.10.0
libtpu: 0.0.40
codegen_flags: <defaults>
</compile_context>

<pallas_src>
import jax
import jax.numpy as jnp
from jax.experimental import pallas as pl
from jax.experimental.pallas import tpu as pltpu  # noqa: F401  (imported for TPU backend)

# ---------------- model sizes (small, consistent with the module) ----------------
VOCAB   = 50
EMB     = 32          # word_vec_size
HID     = 32          # rnn_size
SRC_LEN = 8
TGT_LEN = 6           # decode steps (len of `input`)
BATCH   = 2

BP      = 8           # batch padded to one sublane tile
VP      = 64          # vocab padded (50 -> 64)
GP      = 128         # gate width padded (3H = 96 -> 128), cols [r | z | n | pad]


# ============================ Pallas kernel ============================

def decoder_kernel(ids_ref, ctx_ref, h0_ref, feed0_ref,
                   embp_ref, bhn_ref, wxf_ref, wh_ref, wat_ref, woc_ref, woh_ref,
                   out_ref, attn_ref, hT_ref, feedT_ref):
    """Fused input-feed GRU decoder with Luong 'general' global attention.

    ids_ref  : (Td*Bp, 1) int32 target token ids (flattened time-major, batch padded)
    ctx_ref  : (Bp, Ts, H) batch-major encoder memory bank (batch padded with zeros)
    h0_ref   : (Bp, H)     initial GRU hidden
    feed0_ref: (Bp, H)     initial input feed
    embp_ref : (VP, GP)    precombined  emb_table @ Wxe  with bih + bhh[r,z] folded in
    bhn_ref  : (1, H)      hidden-to-hidden bias of the n gate (kept inside r*(...))
    wxf_ref  : (H, GP)     feed -> gate pre-activations   (cols [r|z|n|pad])
    wh_ref   : (H, GP)     hidden -> gate pre-activations (cols [r|z|n|pad])
    wat_ref  : (H, H)      Wa^T (attention 'general' projection, folded into ctx once)
    woc_ref  : (H, H)      output projection, context half (linear_out, bias=False)
    woh_ref  : (H, H)      output projection, hidden half
    out_ref  : (Td, Bp, H) attn_h per step (== dropout(attn_h) at inference)
    attn_ref : (Td, Bp, Ts) attention weights per step
    hT/feedT : (Bp, H)     final hidden / final input feed
    """
    Td, Bp, H = out_ref.shape
    Ts = ctx_ref.shape[1]
    Vp = embp_ref.shape[0]
    TdB = ids_ref.shape[0]

    # ---- hoisted, time-independent work (done once, before the recurrence) ----
    # fused embedding gather + input projection + folded biases:
    #   gpre = onehot(ids) @ (E @ Wxe + b_ih + [b_hh_rz, 0])
    ids = ids_ref[...]                                               # (Td*Bp, 1)
    iota = jax.lax.broadcasted_iota(jnp.int32, (TdB, Vp), 1)
    onehot = (ids == iota).astype(jnp.float32)                       # (Td*Bp, Vp)
    gpre = jnp.dot(onehot, embp_ref[...],
                   preferred_element_type=jnp.float32)               # (Td*Bp, GP)

    # fold Wa into the context once:  score(h, s) = h . (ctx_s @ Wa^T)
    ctx_b = ctx_ref[...]                                             # (Bp, Ts, H)
    ctx_proj = jnp.dot(ctx_b.reshape(Bp * Ts, H), wat_ref[...],
                       preferred_element_type=jnp.float32).reshape(Bp, Ts, H)

    wxf = wxf_ref[...]
    wh = wh_ref[...]
    woc = woc_ref[...]
    woh = woh_ref[...]
    b_hn = jnp.broadcast_to(bhn_ref[...], (Bp, H))                   # hoisted broadcast

    h = h0_ref[...]
    feed = feed0_ref[...]

    # Td is tiny and static -> full unroll (static, tile-aligned slices; LLO visibility).
    for t in range(Td):
        g_in = gpre[t * Bp:(t + 1) * Bp, :]                          # (Bp, GP), full tiles

        # --- GRU cell: two small dots (no per-step lane concat), fused r/z sigmoid ---
        rec_f = jnp.dot(feed, wxf, preferred_element_type=jnp.float32)   # (Bp, GP)
        rec_h = jnp.dot(h, wh, preferred_element_type=jnp.float32)       # (Bp, GP)
        a = g_in + rec_f                                             # one full-vreg add
        rz = jax.nn.sigmoid(a[:, :2 * H] + rec_h[:, :2 * H])         # single EUP call
        r = rz[:, :H]
        z = rz[:, H:2 * H]
        n = jnp.tanh(a[:, 2 * H:3 * H] + r * (rec_h[:, 2 * H:3 * H] + b_hn))
        h = (1.0 - z) * n + z * h                                    # (Bp, H)

        # h-side output projection issued now -> MXU overlaps the attention chain
        h_proj = jnp.dot(h, woh, preferred_element_type=jnp.float32)     # (Bp, H)

        # --- global attention ('general'), VPU broadcast-mul + XLU reductions ---
        scores = jnp.sum(h[:, None, :] * ctx_proj, axis=-1)          # (Bp, Ts)
        scores = scores - jnp.max(scores, axis=-1, keepdims=True)
        e = jnp.exp(scores)
        alpha = e / jnp.sum(e, axis=-1, keepdims=True)               # exact softmax
        cvec = jnp.sum(alpha[:, :, None] * ctx_b, axis=1)            # (Bp, H)

        # attn_h = tanh(W_out [cvec ; h])  == tanh(cvec @ Woc + h @ Woh)
        attn_h = jnp.tanh(jnp.dot(cvec, woc, preferred_element_type=jnp.float32)
                          + h_proj)

        out_ref[t] = attn_h          # dropout == identity at inference
        attn_ref[t] = alpha
        feed = attn_h                # input feed for the next step

    hT_ref[...] = h
    feedT_ref[...] = feed


# ============================ pallas_call wrapper ============================

def run_decoder(inp, ctx_b, h0, feed0, p):
    """inp: (Td, B) int32; ctx_b: (B, Ts, H); h0/feed0: (B, H)."""
    Td, B = inp.shape
    _, Ts, H = ctx_b.shape
    Bp = BP

    # pad batch to one sublane tile (8) -> all per-step loads/stores are full-tile
    ids = jnp.zeros((Td, Bp), jnp.int32).at[:, :B].set(inp.astype(jnp.int32))
    ids2d = ids.reshape(Td * Bp, 1)
    ctx_p = jnp.zeros((Bp, Ts, H), jnp.float32).at[:B].set(ctx_b)
    h0_p = jnp.zeros((Bp, H), jnp.float32).at[:B].set(h0)
    feed0_p = jnp.zeros((Bp, H), jnp.float32).at[:B].set(feed0)

    out, attn, hT, feedT = pl.pallas_call(
        decoder_kernel,
        out_shape=(jax.ShapeDtypeStruct((Td, Bp, H), jnp.float32),
                   jax.ShapeDtypeStruct((Td, Bp, Ts), jnp.float32),
                   jax.ShapeDtypeStruct((Bp, H), jnp.float32),
                   jax.ShapeDtypeStruct((Bp, H), jnp.float32)),
    )(ids2d, ctx_p, h0_p, feed0_p,
      p['emb_wxe'], p['b_hn'], p['wxf'], p['wh'], p['wa_t'], p['woc'], p['woh'])

    # strip the batch padding outside the kernel
    return out[:, :B], attn[:, :B], hT[:B], feedT[:B]


# ============================ parameter prep & forward ============================

def prepare_params(P):
    """One-time weight restructuring (pure parameter prep, outside the hot path)."""
    H = HID
    # fold bih (all gates) + bhh[:, :2H] into the embedding-side table
    # (one-hot rows sum to 1, so adding the bias to every row is exact);
    # keep only b_hn separate because it sits inside r*(...).
    bias3h = jnp.concatenate(
        [P['bih'][:, :2 * H] + P['bhh'][:, :2 * H], P['bih'][:, 2 * H:]], axis=1)  # (1, 3H)
    emb_wxe = jnp.dot(P['tgt_emb'], P['wxe']) + bias3h                 # (V, 3H)

    # zero-pad the hoisted matmul operands: V 50->64, 3H 96->128 (lane-dense pops)
    emb_wxe_p = jnp.zeros((VP, GP), jnp.float32).at[:VOCAB, :3 * H].set(emb_wxe)
    wxf_p = jnp.zeros((H, GP), jnp.float32).at[:, :3 * H].set(P['wxf'])
    wh_p = jnp.zeros((H, GP), jnp.float32).at[:, :3 * H].set(P['wh'])

    return dict(
        emb_wxe=emb_wxe_p,                 # (VP, GP)
        b_hn=P['bhh'][:, 2 * H:],          # (1, H)
        wxf=wxf_p,                         # (H, GP)
        wh=wh_p,                           # (H, GP)
        wa_t=P['wa'].T,                    # (H, H)
        woc=P['woc'], woh=P['woh'],        # (H, H) each
    )


def decoder_forward(inp, src, context, state, prepped):
    """Decoder.forward.

    inp     : (Td, B) int32 target tokens
    src     : (Ts, B, 1) int32 (shape-checked only in the RNN branch)
    context : (Ts, B, H) encoder memory bank
    state   : (hidden (1, B, H), input_feed (1, B, H))   [RNNDecoderState]
    returns : outputs (Td, B, H), new_state, attns {'std': (Td, B, Ts)}
    """
    del src  # only used for aeq(...) shape assertions in the reference RNN branch
    hidden, input_feed = state
    ctx_b = jnp.transpose(context, (1, 0, 2))                        # (B, Ts, H)
    out, attn, hT, feedT = run_decoder(inp, ctx_b, hidden[0], input_feed[0], prepped)
    new_state = ((hT[None],), feedT[None])                           # (hidden,), input_feed
    return out, new_state, {'std': attn}


# ============================ parameters & demo ============================

def init_params(key):
    ks = jax.random.split(key, 8)
    s = 0.1

    def mat(k, shape):
        return jax.random.normal(k, shape, jnp.float32) * s

    return dict(
        tgt_emb=mat(ks[0], (VOCAB, EMB)),
        wxe=mat(ks[1], (EMB, 3 * HID)),       # input(emb)-to-hidden, gates [r|z|n]
        wxf=mat(ks[2], (HID, 3 * HID)),       # input(feed)-to-hidden
        wh=mat(ks[3], (HID, 3 * HID)),        # hidden-to-hidden
        bih=jnp.zeros((1, 3 * HID), jnp.float32),
        bhh=jnp.zeros((1, 3 * HID), jnp.float32),
        wa=mat(ks[4], (HID, HID)),            # GlobalAttention linear_in (general)
        woc=mat(ks[5], (HID, HID)),           # linear_out, context half (bias=False)
        woh=mat(ks[6], (HID, HID)),           # linear_out, hidden half
    )


if __name__ == "__main__":
    key = jax.random.PRNGKey(0)
    k_p, k_tgt, k_src, k_ctx, k_h = jax.random.split(key, 5)
    P = init_params(k_p)
    prepped = prepare_params(P)

    inp = jax.random.randint(k_tgt, (TGT_LEN, BATCH), 0, VOCAB, dtype=jnp.int32)
    src = jax.random.randint(k_src, (SRC_LEN, BATCH, 1), 0, VOCAB, dtype=jnp.int32)
    context = jax.random.normal(k_ctx, (SRC_LEN, BATCH, HID), jnp.float32)
    hidden = jax.random.normal(k_h, (1, BATCH, HID), jnp.float32) * 0.1
    input_feed = jnp.zeros((1, BATCH, HID), jnp.float32)   # RNNDecoderState.init_input_feed

    out, state, attns = decoder_forward(inp, src, context, (hidden, input_feed), prepped)
    jax.block_until_ready((out, attns['std'], state))

    assert out.shape == (TGT_LEN, BATCH, HID)
    assert attns['std'].shape == (TGT_LEN, BATCH, SRC_LEN)
    assert state[0][0].shape == (1, BATCH, HID)
    assert state[1].shape == (1, BATCH, HID)
    print("KERNEL_OK")
</pallas_src>

<mosaic_0001>
module attributes {stable_mosaic.version = 11 : i64} {
  func.func @decoder_kernel(%arg0: memref<48x1xi32, #tpu.memory_space<vmem>>, %arg1: memref<8x8x32xf32, #tpu.memory_space<vmem>>, %arg2: memref<8x32xf32, #tpu.memory_space<vmem>>, %arg3: memref<8x32xf32, #tpu.memory_space<vmem>>, %arg4: memref<64x128xf32, #tpu.memory_space<vmem>>, %arg5: memref<1x32xf32, #tpu.memory_space<vmem>>, %arg6: memref<32x128xf32, #tpu.memory_space<vmem>>, %arg7: memref<32x128xf32, #tpu.memory_space<vmem>>, %arg8: memref<32x32xf32, #tpu.memory_space<vmem>>, %arg9: memref<32x32xf32, #tpu.memory_space<vmem>>, %arg10: memref<32x32xf32, #tpu.memory_space<vmem>>, %arg11: memref<6x8x32xf32, #tpu.memory_space<vmem>>, %arg12: memref<6x8x8xf32, #tpu.memory_space<vmem>>, %arg13: memref<8x32xf32, #tpu.memory_space<vmem>>, %arg14: memref<8x32xf32, #tpu.memory_space<vmem>>) attributes {dimension_semantics = [], scalar_prefetch = 0 : i64, scratch_operands = 0 : i64, tpu.core_type = #tpu.core_type<tc>} {
    %c0 = arith.constant 0 : index
    %c0_0 = arith.constant 0 : index
    %0 = vector.load %arg0[%c0, %c0_0] : memref<48x1xi32, #tpu.memory_space<vmem>>, vector<48x1xi32>
    %1 = tpu.iota {dimensions = array<i32: 1>} : vector<48x64xi32>
    %2 = vector.broadcast %0 : vector<48x1xi32> to vector<48x64xi32>
    %3 = arith.cmpi eq, %2, %1 : vector<48x64xi32>
    %4 = arith.extui %3 : vector<48x64xi1> to vector<48x64xi32>
    %5 = arith.sitofp %4 : vector<48x64xi32> to vector<48x64xf32>
    %c0_1 = arith.constant 0 : index
    %c0_2 = arith.constant 0 : index
    %6 = vector.load %arg4[%c0_1, %c0_2] : memref<64x128xf32, #tpu.memory_space<vmem>>, vector<64x128xf32>
    %cst = arith.constant dense<0.000000e+00> : vector<48x128xf32>
    %7 = tpu.matmul %5, %6, %cst {dimension_numbers = #tpu.dot_dimension_numbers<[1], [0], [0], [1], [0, 0, 1, 1], [], []>} : vector<48x64xf32>, vector<64x128xf32>, vector<48x128xf32> -> vector<48x128xf32>
    %c0_3 = arith.constant 0 : index
    %c0_4 = arith.constant 0 : index
    %c0_5 = arith.constant 0 : index
    %8 = vector.load %arg1[%c0_3, %c0_4, %c0_5] : memref<8x8x32xf32, #tpu.memory_space<vmem>>, vector<8x8x32xf32>
    %9 = vector.shape_cast %8 : vector<8x8x32xf32> to vector<64x32xf32>
    %c0_6 = arith.constant 0 : index
    %c0_7 = arith.constant 0 : index
    %10 = vector.load %arg8[%c0_6, %c0_7] : memref<32x32xf32, #tpu.memory_space<vmem>>, vector<32x32xf32>
    %cst_8 = arith.constant dense<0.000000e+00> : vector<64x32xf32>
    %11 = tpu.matmul %9, %10, %cst_8 {dimension_numbers = #tpu.dot_dimension_numbers<[1], [0], [0], [1], [0, 0, 1, 1], [], []>} : vector<64x32xf32>, vector<32x32xf32>, vector<64x32xf32> -> vector<64x32xf32>
    %12 = vector.shape_cast %11 : vector<64x32xf32> to vector<8x8x32xf32>
    %c0_9 = arith.constant 0 : index
    %c0_10 = arith.constant 0 : index
    %13 = vector.load %arg6[%c0_9, %c0_10] : memref<32x128xf32, #tpu.memory_space<vmem>>, vector<32x128xf32>
    %c0_11 = arith.constant 0 : index
    %c0_12 = arith.constant 0 : index
    %14 = vector.load %arg7[%c0_11, %c0_12] : memref<32x128xf32, #tpu.memory_space<vmem>>, vector<32x128xf32>
    %c0_13 = arith.constant 0 : index
    %c0_14 = arith.constant 0 : index
    %15 = vector.load %arg9[%c0_13, %c0_14] : memref<32x32xf32, #tpu.memory_space<vmem>>, vector<32x32xf32>
    %c0_15 = arith.constant 0 : index
    %c0_16 = arith.constant 0 : index
    %16 = vector.load %arg10[%c0_15, %c0_16] : memref<32x32xf32, #tpu.memory_space<vmem>>, vector<32x32xf32>
    %c0_17 = arith.constant 0 : index
    %c0_18 = arith.constant 0 : index
    %17 = vector.load %arg5[%c0_17, %c0_18] : memref<1x32xf32, #tpu.memory_space<vmem>>, vector<1x32xf32>
    %18 = vector.shape_cast %17 : vector<1x32xf32> to vector<1x32xf32>
    %19 = vector.broadcast %18 : vector<1x32xf32> to vector<8x32xf32>
    %c0_19 = arith.constant 0 : index
    %c0_20 = arith.constant 0 : index
    %20 = vector.load %arg2[%c0_19, %c0_20] : memref<8x32xf32, #tpu.memory_space<vmem>>, vector<8x32xf32>
    %c0_21 = arith.constant 0 : index
    %c0_22 = arith.constant 0 : index
    %21 = vector.load %arg3[%c0_21, %c0_22] : memref<8x32xf32, #tpu.memory_space<vmem>>, vector<8x32xf32>
    %22 = vector.extract_strided_slice %7 {offsets = [0, 0], sizes = [8, 128], strides = [1, 1]} : vector<48x128xf32> to vector<8x128xf32>
    %cst_23 = arith.constant dense<0.000000e+00> : vector<8x128xf32>
    %23 = tpu.matmul %21, %13, %cst_23 {dimension_numbers = #tpu.dot_dimension_numbers<[1], [0], [0], [1], [0, 0, 1, 1], [], []>} : vector<8x32xf32>, vector<32x128xf32>, vector<8x128xf32> -> vector<8x128xf32>
    %cst_24 = arith.constant dense<0.000000e+00> : vector<8x128xf32>
    %24 = tpu.matmul %20, %14, %cst_24 {dimension_numbers = #tpu.dot_dimension_numbers<[1], [0], [0], [1], [0, 0, 1, 1], [], []>} : vector<8x32xf32>, vector<32x128xf32>, vector<8x128xf32> -> vector<8x128xf32>
    %25 = arith.addf %22, %23 : vector<8x128xf32>
    %26 = vector.extract_strided_slice %25 {offsets = [0, 0], sizes = [8, 64], strides = [1, 1]} : vector<8x128xf32> to vector<8x64xf32>
    %27 = vector.extract_strided_slice %24 {offsets = [0, 0], sizes = [8, 64], strides = [1, 1]} : vector<8x128xf32> to vector<8x64xf32>
    %28 = arith.addf %26, %27 : vector<8x64xf32>
    %29 = arith.negf %28 : vector<8x64xf32>
    %30 = math.exp %29 : vector<8x64xf32>
    %cst_25 = arith.constant 1.000000e+00 : f32
    %31 = vector.broadcast %cst_25 : f32 to vector<8x64xf32>
    %32 = arith.addf %31, %30 : vector<8x64xf32>
    %33 = arith.divf %31, %32 : vector<8x64xf32>
    %34 = vector.extract_strided_slice %33 {offsets = [0, 0], sizes = [8, 32], strides = [1, 1]} : vector<8x64xf32> to vector<8x32xf32>
    %35 = vector.extract_strided_slice %33 {offsets = [0, 32], sizes = [8, 32], strides = [1, 1]} : vector<8x64xf32> to vector<8x32xf32>
    %36 = vector.extract_strided_slice %25 {offsets = [0, 64], sizes = [8, 32], strides = [1, 1]} : vector<8x128xf32> to vector<8x32xf32>
    %37 = vector.extract_strided_slice %24 {offsets = [0, 64], sizes = [8, 32], strides = [1, 1]} : vector<8x128xf32> to vector<8x32xf32>
    %38 = arith.addf %37, %19 : vector<8x32xf32>
    %39 = arith.mulf %34, %38 : vector<8x32xf32>
    %40 = arith.addf %36, %39 : vector<8x32xf32>
    %41 = math.tanh %40 : vector<8x32xf32>
    %cst_26 = arith.constant 1.000000e+00 : f32
    %42 = vector.broadcast %cst_26 : f32 to vector<8x32xf32>
    %43 = arith.subf %42, %35 : vector<8x32xf32>
    %44 = arith.mulf %43, %41 : vector<8x32xf32>
    %45 = arith.mulf %35, %20 : vector<8x32xf32>
    %46 = arith.addf %44, %45 : vector<8x32xf32>
    %cst_27 = arith.constant dense<0.000000e+00> : vector<8x32xf32>
    %47 = tpu.matmul %46, %16, %cst_27 {dimension_numbers = #tpu.dot_dimension_numbers<[1], [0], [0], [1], [0, 0, 1, 1], [], []>} : vector<8x32xf32>, vector<32x32xf32>, vector<8x32xf32> -> vector<8x32xf32>
    %48 = vector.shape_cast %46 : vector<8x32xf32> to vector<8x1x32xf32>
    %49 = vector.broadcast %48 : vector<8x1x32xf32> to vector<8x8x32xf32>
    %50 = arith.mulf %49, %12 : vector<8x8x32xf32>
    %cst_28 = arith.constant dense<0.000000e+00> : vector<8x8xf32>
    %51 = vector.multi_reduction <add>, %50, %cst_28 [2] : vector<8x8x32xf32> to vector<8x8xf32>
    %cst_29 = arith.constant dense<0xFF800000> : vector<8xf32>
    %52 = vector.multi_reduction <maximumf>, %51, %cst_29 [1] : vector<8x8xf32> to vector<8xf32>
    %53 = vector.shape_cast %52 : vector<8xf32> to vector<8x1xf32>
    %54 = vector.broadcast %53 : vector<8x1xf32> to vector<8x8xf32>
    %55 = arith.subf %51, %54 : vector<8x8xf32>
    %56 = math.exp %55 : vector<8x8xf32>
    %cst_30 = arith.constant dense<0.000000e+00> : vector<8xf32>
    %57 = vector.multi_reduction <add>, %56, %cst_30 [1] : vector<8x8xf32> to vector<8xf32>
    %58 = vector.shape_cast %57 : vector<8xf32> to vector<8x1xf32>
    %59 = vector.broadcast %58 : vector<8x1xf32> to vector<8x8xf32>
    %60 = arith.divf %56, %59 : vector<8x8xf32>
    %61 = vector.shape_cast %60 : vector<8x8xf32> to vector<8x8x1xf32>
    %62 = vector.broadcast %61 : vector<8x8x1xf32> to vector<8x8x32xf32>
    %63 = arith.mulf %62, %8 : vector<8x8x32xf32>
    %cst_31 = arith.constant dense<0.000000e+00> : vector<8x32xf32>
    %64 = vector.multi_reduction <add>, %63, %cst_31 [1] : vector<8x8x32xf32> to vector<8x32xf32>
    %cst_32 = arith.constant dense<0.000000e+00> : vector<8x32xf32>
    %65 = tpu.matmul %64, %15, %cst_32 {dimension_numbers = #tpu.dot_dimension_numbers<[1], [0], [0], [1], [0, 0, 1, 1], [], []>} : vector<8x32xf32>, vector<32x32xf32>, vector<8x32xf32> -> vector<8x32xf32>
    %66 = arith.addf %65, %47 : vector<8x32xf32>
    %67 = math.tanh %66 : vector<8x32xf32>
    %c0_33 = arith.constant 0 : index
    %c0_34 = arith.constant 0 : index
    %c0_35 = arith.constant 0 : index
    %68 = vector.load %arg11[%c0_33, %c0_34, %c0_35] : memref<6x8x32xf32, #tpu.memory_space<vmem>>, vector<1x8x32xf32>
    %69 = vector.shape_cast %68 : vector<1x8x32xf32> to vector<8x32xf32>
    %70 = vector.shape_cast %67 : vector<8x32xf32> to vector<1x8x32xf32>
    tpu.vector_store %arg11[%c0_33, %c0_34, %c0_35], %70 {strides = array<i32>} : memref<6x8x32xf32, #tpu.memory_space<vmem>>, vector<1x8x32xf32>,
    %c0_36 = arith.constant 0 : index
    %c0_37 = arith.constant 0 : index
    %c0_38 = arith.constant 0 : index
    %71 = vector.load %arg12[%c0_36, %c0_37, %c0_38] : memref<6x8x8xf32, #tpu.memory_space<vmem>>, vector<1x8x8xf32>
    %72 = vector.shape_cast %71 : vector<1x8x8xf32> to vector<8x8xf32>
    %73 = vector.shape_cast %60 : vector<8x8xf32> to vector<1x8x8xf32>
    tpu.vector_store %arg12[%c0_36, %c0_37, %c0_38], %73 {strides = array<i32>} : memref<6x8x8xf32, #tpu.memory_space<vmem>>, vector<1x8x8xf32>,
    %74 = vector.extract_strided_slice %7 {offsets = [8, 0], sizes = [8, 128], strides = [1, 1]} : vector<48x128xf32> to vector<8x128xf32>
    %cst_39 = arith.constant dense<0.000000e+00> : vector<8x128xf32>
    %75 = tpu.matmul %67, %13, %cst_39 {dimension_numbers = #tpu.dot_dimension_numbers<[1], [0], [0], [1], [0, 0, 1, 1], [], []>} : vector<8x32xf32>, vector<32x128xf32>, vector<8x128xf32> -> vector<8x128xf32>
    %cst_40 = arith.constant dense<0.000000e+00> : vector<8x128xf32>
    %76 = tpu.matmul %46, %14, %cst_40 {dimension_numbers = #tpu.dot_dimension_numbers<[1], [0], [0], [1], [0, 0, 1, 1], [], []>} : vector<8x32xf32>, vector<32x128xf32>, vector<8x128xf32> -> vector<8x128xf32>
    %77 = arith.addf %74, %75 : vector<8x128xf32>
    %78 = vector.extract_strided_slice %77 {offsets = [0, 0], sizes = [8, 64], strides = [1, 1]} : vector<8x128xf32> to vector<8x64xf32>
    %79 = vector.extract_strided_slice %76 {offsets = [0, 0], sizes = [8, 64], strides = [1, 1]} : vector<8x128xf32> to vector<8x64xf32>
    %80 = arith.addf %78, %79 : vector<8x64xf32>
    %81 = arith.negf %80 : vector<8x64xf32>
    %82 = math.exp %81 : vector<8x64xf32>
    %cst_41 = arith.constant 1.000000e+00 : f32
    %83 = vector.broadcast %cst_41 : f32 to vector<8x64xf32>
    %84 = arith.addf %83, %82 : vector<8x64xf32>
    %85 = arith.divf %83, %84 : vector<8x64xf32>
    %86 = vector.extract_strided_slice %85 {offsets = [0, 0], sizes = [8, 32], strides = [1, 1]} : vector<8x64xf32> to vector<8x32xf32>
    %87 = vector.extract_strided_slice %85 {offsets = [0, 32], sizes = [8, 32], strides = [1, 1]} : vector<8x64xf32> to vector<8x32xf32>
    %88 = vector.extract_strided_slice %77 {offsets = [0, 64], sizes = [8, 32], strides = [1, 1]} : vector<8x128xf32> to vector<8x32xf32>
    %89 = vector.extract_strided_slice %76 {offsets = [0, 64], sizes = [8, 32], strides = [1, 1]} : vector<8x128xf32> to vector<8x32xf32>
    %90 = arith.addf %89, %19 : vector<8x32xf32>
    %91 = arith.mulf %86, %90 : vector<8x32xf32>
    %92 = arith.addf %88, %91 : vector<8x32xf32>
    %93 = math.tanh %92 : vector<8x32xf32>
    %cst_42 = arith.constant 1.000000e+00 : f32
    %94 = vector.broadcast %cst_42 : f32 to vector<8x32xf32>
    %95 = arith.subf %94, %87 : vector<8x32xf32>
    %96 = arith.mulf %95, %93 : vector<8x32xf32>
    %97 = arith.mulf %87, %46 : vector<8x32xf32>
    %98 = arith.addf %96, %97 : vector<8x32xf32>
    %cst_43 = arith.constant dense<0.000000e+00> : vector<8x32xf32>
    %99 = tpu.matmul %98, %16, %cst_43 {dimension_numbers = #tpu.dot_dimension_numbers<[1], [0], [0], [1], [0, 0, 1, 1], [], []>} : vector<8x32xf32>, vector<32x32xf32>, vector<8x32xf32> -> vector<8x32xf32>
    %100 = vector.shape_cast %98 : vector<8x32xf32> to vector<8x1x32xf32>
    %101 = vector.broadcast %100 : vector<8x1x32xf32> to vector<8x8x32xf32>
    %102 = arith.mulf %101, %12 : vector<8x8x32xf32>
    %cst_44 = arith.constant dense<0.000000e+00> : vector<8x8xf32>
    %103 = vector.multi_reduction <add>, %102, %cst_44 [2] : vector<8x8x32xf32> to vector<8x8xf32>
    %cst_45 = arith.constant dense<0xFF800000> : vector<8xf32>
    %104 = vector.multi_reduction <maximumf>, %103, %cst_45 [1] : vector<8x8xf32> to vector<8xf32>
    %105 = vector.shape_cast %104 : vector<8xf32> to vector<8x1xf32>
    %106 = vector.broadcast %105 : vector<8x1xf32> to vector<8x8xf32>
    %107 = arith.subf %103, %106 : vector<8x8xf32>
    %108 = math.exp %107 : vector<8x8xf32>
    %cst_46 = arith.constant dense<0.000000e+00> : vector<8xf32>
    %109 = vector.multi_reduction <add>, %108, %cst_46 [1] : vector<8x8xf32> to vector<8xf32>
    %110 = vector.shape_cast %109 : vector<8xf32> to vector<8x1xf32>
    %111 = vector.broadcast %110 : vector<8x1xf32> to vector<8x8xf32>
    %112 = arith.divf %108, %111 : vector<8x8xf32>
    %113 = vector.shape_cast %112 : vector<8x8xf32> to vector<8x8x1xf32>
    %114 = vector.broadcast %113 : vector<8x8x1xf32> to vector<8x8x32xf32>
    %115 = arith.mulf %114, %8 : vector<8x8x32xf32>
    %cst_47 = arith.constant dense<0.000000e+00> : vector<8x32xf32>
    %116 = vector.multi_reduction <add>, %115, %cst_47 [1] : vector<8x8x32xf32> to vector<8x32xf32>
    %cst_48 = arith.constant dense<0.000000e+00> : vector<8x32xf32>
    %117 = tpu.matmul %116, %15, %cst_48 {dimension_numbers = #tpu.dot_dimension_numbers<[1], [0], [0], [1], [0, 0, 1, 1], [], []>} : vector<8x32xf32>, vector<32x32xf32>, vector<8x32xf32> -> vector<8x32xf32>
    %118 = arith.addf %117, %99 : vector<8x32xf32>
    %119 = math.tanh %118 : vector<8x32xf32>
    %c1 = arith.constant 1 : index
    %c0_49 = arith.constant 0 : index
    %c0_50 = arith.constant 0 : index
    %120 = vector.load %arg11[%c1, %c0_49, %c0_50] : memref<6x8x32xf32, #tpu.memory_space<vmem>>, vector<1x8x32xf32>
    %121 = vector.shape_cast %120 : vector<1x8x32xf32> to vector<8x32xf32>
    %122 = vector.shape_cast %119 : vector<8x32xf32> to vector<1x8x32xf32>
    tpu.vector_store %arg11[%c1, %c0_49, %c0_50], %122 {strides = array<i32>} : memref<6x8x32xf32, #tpu.memory_space<vmem>>, vector<1x8x32xf32>,
    %c1_51 = arith.constant 1 : index
    %c0_52 = arith.constant 0 : index
    %c0_53 = arith.constant 0 : index
    %123 = vector.load %arg12[%c1_51, %c0_52, %c0_53] : memref<6x8x8xf32, #tpu.memory_space<vmem>>, vector<1x8x8xf32>
    %124 = vector.shape_cast %123 : vector<1x8x8xf32> to vector<8x8xf32>
    %125 = vector.shape_cast %112 : vector<8x8xf32> to vector<1x8x8xf32>
    tpu.vector_store %arg12[%c1_51, %c0_52, %c0_53], %125 {strides = array<i32>} : memref<6x8x8xf32, #tpu.memory_space<vmem>>, vector<1x8x8xf32>,
    %126 = vector.extract_strided_slice %7 {offsets = [16, 0], sizes = [8, 128], strides = [1, 1]} : vector<48x128xf32> to vector<8x128xf32>
    %cst_54 = arith.constant dense<0.000000e+00> : vector<8x128xf32>
    %127 = tpu.matmul %119, %13, %cst_54 {dimension_numbers = #tpu.dot_dimension_numbers<[1], [0], [0], [1], [0, 0, 1, 1], [], []>} : vector<8x32xf32>, vector<32x128xf32>, vector<8x128xf32> -> vector<8x128xf32>
    %cst_55 = arith.constant dense<0.000000e+00> : vector<8x128xf32>
    %128 = tpu.matmul %98, %14, %cst_55 {dimension_numbers = #tpu.dot_dimension_numbers<[1], [0], [0], [1], [0, 0, 1, 1], [], []>} : vector<8x32xf32>, vector<32x128xf32>, vector<8x128xf32> -> vector<8x128xf32>
    %129 = arith.addf %126, %127 : vector<8x128xf32>
    %130 = vector.extract_strided_slice %129 {offsets = [0, 0], sizes = [8, 64], strides = [1, 1]} : vector<8x128xf32> to vector<8x64xf32>
    %131 = vector.extract_strided_slice %128 {offsets = [0, 0], sizes = [8, 64], strides = [1, 1]} : vector<8x128xf32> to vector<8x64xf32>
    %132 = arith.addf %130, %131 : vector<8x64xf32>
    %133 = arith.negf %132 : vector<8x64xf32>
    %134 = math.exp %133 : vector<8x64xf32>
    %cst_56 = arith.constant 1.000000e+00 : f32
    %135 = vector.broadcast %cst_56 : f32 to vector<8x64xf32>
    %136 = arith.addf %135, %134 : vector<8x64xf32>
    %137 = arith.divf %135, %136 : vector<8x64xf32>
    %138 = vector.extract_strided_slice %137 {offsets = [0, 0], sizes = [8, 32], strides = [1, 1]} : vector<8x64xf32> to vector<8x32xf32>
    %139 = vector.extract_strided_slice %137 {offsets = [0, 32], sizes = [8, 32], strides = [1, 1]} : vector<8x64xf32> to vector<8x32xf32>
    %140 = vector.extract_strided_slice %129 {offsets = [0, 64], sizes = [8, 32], strides = [1, 1]} : vector<8x128xf32> to vector<8x32xf32>
    %141 = vector.extract_strided_slice %128 {offsets = [0, 64], sizes = [8, 32], strides = [1, 1]} : vector<8x128xf32> to vector<8x32xf32>
    %142 = arith.addf %141, %19 : vector<8x32xf32>
    %143 = arith.mulf %138, %142 : vector<8x32xf32>
    %144 = arith.addf %140, %143 : vector<8x32xf32>
    %145 = math.tanh %144 : vector<8x32xf32>
    %cst_57 = arith.constant 1.000000e+00 : f32
    %146 = vector.broadcast %cst_57 : f32 to vector<8x32xf32>
    %147 = arith.subf %146, %139 : vector<8x32xf32>
    %148 = arith.mulf %147, %145 : vector<8x32xf32>
    %149 = arith.mulf %139, %98 : vector<8x32xf32>
    %150 = arith.addf %148, %149 : vector<8x32xf32>
    %cst_58 = arith.constant dense<0.000000e+00> : vector<8x32xf32>
    %151 = tpu.matmul %150, %16, %cst_58 {dimension_numbers = #tpu.dot_dimension_numbers<[1], [0], [0], [1], [0, 0, 1, 1], [], []>} : vector<8x32xf32>, vector<32x32xf32>, vector<8x32xf32> -> vector<8x32xf32>
    %152 = vector.shape_cast %150 : vector<8x32xf32> to vector<8x1x32xf32>
    %153 = vector.broadcast %152 : vector<8x1x32xf32> to vector<8x8x32xf32>
    %154 = arith.mulf %153, %12 : vector<8x8x32xf32>
    %cst_59 = arith.constant dense<0.000000e+00> : vector<8x8xf32>
    %155 = vector.multi_reduction <add>, %154, %cst_59 [2] : vector<8x8x32xf32> to vector<8x8xf32>
    %cst_60 = arith.constant dense<0xFF800000> : vector<8xf32>
    %156 = vector.multi_reduction <maximumf>, %155, %cst_60 [1] : vector<8x8xf32> to vector<8xf32>
    %157 = vector.shape_cast %156 : vector<8xf32> to vector<8x1xf32>
    %158 = vector.broadcast %157 : vector<8x1xf32> to vector<8x8xf32>
    %159 = arith.subf %155, %158 : vector<8x8xf32>
    %160 = math.exp %159 : vector<8x8xf32>
    %cst_61 = arith.constant dense<0.000000e+00> : vector<8xf32>
    %161 = vector.multi_reduction <add>, %160, %cst_61 [1] : vector<8x8xf32> to vector<8xf32>
    %162 = vector.shape_cast %161 : vector<8xf32> to vector<8x1xf32>
    %163 = vector.broadcast %162 : vector<8x1xf32> to vector<8x8xf32>
    %164 = arith.divf %160, %163 : vector<8x8xf32>
    %165 = vector.shape_cast %164 : vector<8x8xf32> to vector<8x8x1xf32>
    %166 = vector.broadcast %165 : vector<8x8x1xf32> to vector<8x8x32xf32>
    %167 = arith.mulf %166, %8 : vector<8x8x32xf32>
    %cst_62 = arith.constant dense<0.000000e+00> : vector<8x32xf32>
    %168 = vector.multi_reduction <add>, %167, %cst_62 [1] : vector<8x8x32xf32> to vector<8x32xf32>
    %cst_63 = arith.constant dense<0.000000e+00> : vector<8x32xf32>
    %169 = tpu.matmul %168, %15, %cst_63 {dimension_numbers = #tpu.dot_dimension_numbers<[1], [0], [0], [1], [0, 0, 1, 1], [], []>} : vector<8x32xf32>, vector<32x32xf32>, vector<8x32xf32> -> vector<8x32xf32>
    %170 = arith.addf %169, %151 : vector<8x32xf32>
    %171 = math.tanh %170 : vector<8x32xf32>
    %c2 = arith.constant 2 : index
    %c0_64 = arith.constant 0 : index
    %c0_65 = arith.constant 0 : index
    %172 = vector.load %arg11[%c2, %c0_64, %c0_65] : memref<6x8x32xf32, #tpu.memory_space<vmem>>, vector<1x8x32xf32>
    %173 = vector.shape_cast %172 : vector<1x8x32xf32> to vector<8x32xf32>
    %174 = vector.shape_cast %171 : vector<8x32xf32> to vector<1x8x32xf32>
    tpu.vector_store %arg11[%c2, %c0_64, %c0_65], %174 {strides = array<i32>} : memref<6x8x32xf32, #tpu.memory_space<vmem>>, vector<1x8x32xf32>,
    %c2_66 = arith.constant 2 : index
    %c0_67 = arith.constant 0 : index
    %c0_68 = arith.constant 0 : index
    %175 = vector.load %arg12[%c2_66, %c0_67, %c0_68] : memref<6x8x8xf32, #tpu.memory_space<vmem>>, vector<1x8x8xf32>
    %176 = vector.shape_cast %175 : vector<1x8x8xf32> to vector<8x8xf32>
    %177 = vector.shape_cast %164 : vector<8x8xf32> to vector<1x8x8xf32>
    tpu.vector_store %arg12[%c2_66, %c0_67, %c0_68], %177 {strides = array<i32>} : memref<6x8x8xf32, #tpu.memory_space<vmem>>, vector<1x8x8xf32>,
    %178 = vector.extract_strided_slice %7 {offsets = [24, 0], sizes = [8, 128], strides = [1, 1]} : vector<48x128xf32> to vector<8x128xf32>
    %cst_69 = arith.constant dense<0.000000e+00> : vector<8x128xf32>
    %179 = tpu.matmul %171, %13, %cst_69 {dimension_numbers = #tpu.dot_dimension_numbers<[1], [0], [0], [1], [0, 0, 1, 1], [], []>} : vector<8x32xf32>, vector<32x128xf32>, vector<8x128xf32> -> vector<8x128xf32>
    %cst_70 = arith.constant dense<0.000000e+00> : vector<8x128xf32>
    %180 = tpu.matmul %150, %14, %cst_70 {dimension_numbers = #tpu.dot_dimension_numbers<[1], [0], [0], [1], [0, 0, 1, 1], [], []>} : vector<8x32xf32>, vector<32x128xf32>, vector<8x128xf32> -> vector<8x128xf32>
    %181 = arith.addf %178, %179 : vector<8x128xf32>
    %182 = vector.extract_strided_slice %181 {offsets = [0, 0], sizes = [8, 64], strides = [1, 1]} : vector<8x128xf32> to vector<8x64xf32>
    %183 = vector.extract_strided_slice %180 {offsets = [0, 0], sizes = [8, 64], strides = [1, 1]} : vector<8x128xf32> to vector<8x64xf32>
    %184 = arith.addf %182, %183 : vector<8x64xf32>
    %185 = arith.negf %184 : vector<8x64xf32>
    %186 = math.exp %185 : vector<8x64xf32>
    %cst_71 = arith.constant 1.000000e+00 : f32
    %187 = vector.broadcast %cst_71 : f32 to vector<8x64xf32>
    %188 = arith.addf %187, %186 : vector<8x64xf32>
    %189 = arith.divf %187, %188 : vector<8x64xf32>
    %190 = vector.extract_strided_slice %189 {offsets = [0, 0], sizes = [8, 32], strides = [1, 1]} : vector<8x64xf32> to vector<8x32xf32>
    %191 = vector.extract_strided_slice %189 {offsets = [0, 32], sizes = [8, 32], strides = [1, 1]} : vector<8x64xf32> to vector<8x32xf32>
    %192 = vector.extract_strided_slice %181 {offsets = [0, 64], sizes = [8, 32], strides = [1, 1]} : vector<8x128xf32> to vector<8x32xf32>
    %193 = vector.extract_strided_slice %180 {offsets = [0, 64], sizes = [8, 32], strides = [1, 1]} : vector<8x128xf32> to vector<8x32xf32>
    %194 = arith.addf %193, %19 : vector<8x32xf32>
    %195 = arith.mulf %190, %194 : vector<8x32xf32>
    %196 = arith.addf %192, %195 : vector<8x32xf32>
    %197 = math.tanh %196 : vector<8x32xf32>
    %cst_72 = arith.constant 1.000000e+00 : f32
    %198 = vector.broadcast %cst_72 : f32 to vector<8x32xf32>
    %199 = arith.subf %198, %191 : vector<8x32xf32>
    %200 = arith.mulf %199, %197 : vector<8x32xf32>
    %201 = arith.mulf %191, %150 : vector<8x32xf32>
    %202 = arith.addf %200, %201 : vector<8x32xf32>
    %cst_73 = arith.constant dense<0.000000e+00> : vector<8x32xf32>
    %203 = tpu.matmul %202, %16, %cst_73 {dimension_numbers = #tpu.dot_dimension_numbers<[1], [0], [0], [1], [0, 0, 1, 1], [], []>} : vector<8x32xf32>, vector<32x32xf32>, vector<8x32xf32> -> vector<8x32xf32>
    %204 = vector.shape_cast %202 : vector<8x32xf32> to vector<8x1x32xf32>
    %205 = vector.broadcast %204 : vector<8x1x32xf32> to vector<8x8x32xf32>
    %206 = arith.mulf %205, %12 : vector<8x8x32xf32>
    %cst_74 = arith.constant dense<0.000000e+00> : vector<8x8xf32>
    %207 = vector.multi_reduction <add>, %206, %cst_74 [2] : vector<8x8x32xf32> to vector<8x8xf32>
    %cst_75 = arith.constant dense<0xFF800000> : vector<8xf32>
    %208 = vector.multi_reduction <maximumf>, %207, %cst_75 [1] : vector<8x8xf32> to vector<8xf32>
    %209 = vector.shape_cast %208 : vector<8xf32> to vector<8x1xf32>
    %210 = vector.broadcast %209 : vector<8x1xf32> to vector<8x8xf32>
    %211 = arith.subf %207, %210 : vector<8x8xf32>
    %212 = math.exp %211 : vector<8x8xf32>
    %cst_76 = arith.constant dense<0.000000e+00> : vector<8xf32>
    %213 = vector.multi_reduction <add>, %212, %cst_76 [1] : vector<8x8xf32> to vector<8xf32>
    %214 = vector.shape_cast %213 : vector<8xf32> to vector<8x1xf32>
    %215 = vector.broadcast %214 : vector<8x1xf32> to vector<8x8xf32>
    %216 = arith.divf %212, %215 : vector<8x8xf32>
    %217 = vector.shape_cast %216 : vector<8x8xf32> to vector<8x8x1xf32>
    %218 = vector.broadcast %217 : vector<8x8x1xf32> to vector<8x8x32xf32>
    %219 = arith.mulf %218, %8 : vector<8x8x32xf32>
    %cst_77 = arith.constant dense<0.000000e+00> : vector<8x32xf32>
    %220 = vector.multi_reduction <add>, %219, %cst_77 [1] : vector<8x8x32xf32> to vector<8x32xf32>
    %cst_78 = arith.constant dense<0.000000e+00> : vector<8x32xf32>
    %221 = tpu.matmul %220, %15, %cst_78 {dimension_numbers = #tpu.dot_dimension_numbers<[1], [0], [0], [1], [0, 0, 1, 1], [], []>} : vector<8x32xf32>, vector<32x32xf32>, vector<8x32xf32> -> vector<8x32xf32>
    %222 = arith.addf %221, %203 : vector<8x32xf32>
    %223 = math.tanh %222 : vector<8x32xf32>
    %c3 = arith.constant 3 : index
    %c0_79 = arith.constant 0 : index
    %c0_80 = arith.constant 0 : index
    %224 = vector.load %arg11[%c3, %c0_79, %c0_80] : memref<6x8x32xf32, #tpu.memory_space<vmem>>, vector<1x8x32xf32>
    %225 = vector.shape_cast %224 : vector<1x8x32xf32> to vector<8x32xf32>
    %226 = vector.shape_cast %223 : vector<8x32xf32> to vector<1x8x32xf32>
    tpu.vector_store %arg11[%c3, %c0_79, %c0_80], %226 {strides = array<i32>} : memref<6x8x32xf32, #tpu.memory_space<vmem>>, vector<1x8x32xf32>,
    %c3_81 = arith.constant 3 : index
    %c0_82 = arith.constant 0 : index
    %c0_83 = arith.constant 0 : index
    %227 = vector.load %arg12[%c3_81, %c0_82, %c0_83] : memref<6x8x8xf32, #tpu.memory_space<vmem>>, vector<1x8x8xf32>
    %228 = vector.shape_cast %227 : vector<1x8x8xf32> to vector<8x8xf32>
    %229 = vector.shape_cast %216 : vector<8x8xf32> to vector<1x8x8xf32>
    tpu.vector_store %arg12[%c3_81, %c0_82, %c0_83], %229 {strides = array<i32>} : memref<6x8x8xf32, #tpu.memory_space<vmem>>, vector<1x8x8xf32>,
    %230 = vector.extract_strided_slice %7 {offsets = [32, 0], sizes = [8, 128], strides = [1, 1]} : vector<48x128xf32> to vector<8x128xf32>
    %cst_84 = arith.constant dense<0.000000e+00> : vector<8x128xf32>
    %231 = tpu.matmul %223, %13, %cst_84 {dimension_numbers = #tpu.dot_dimension_numbers<[1], [0], [0], [1], [0, 0, 1, 1], [], []>} : vector<8x32xf32>, vector<32x128xf32>, vector<8x128xf32> -> vector<8x128xf32>
    %cst_85 = arith.constant dense<0.000000e+00> : vector<8x128xf32>
    %232 = tpu.matmul %202, %14, %cst_85 {dimension_numbers = #tpu.dot_dimension_numbers<[1], [0], [0], [1], [0, 0, 1, 1], [], []>} : vector<8x32xf32>, vector<32x128xf32>, vector<8x128xf32> -> vector<8x128xf32>
    %233 = arith.addf %230, %231 : vector<8x128xf32>
    %234 = vector.extract_strided_slice %233 {offsets = [0, 0], sizes = [8, 64], strides = [1, 1]} : vector<8x128xf32> to vector<8x64xf32>
    %235 = vector.extract_strided_slice %232 {offsets = [0, 0], sizes = [8, 64], strides = [1, 1]} : vector<8x128xf32> to vector<8x64xf32>
    %236 = arith.addf %234, %235 : vector<8x64xf32>
    %237 = arith.negf %236 : vector<8x64xf32>
    %238 = math.exp %237 : vector<8x64xf32>
    %cst_86 = arith.constant 1.000000e+00 : f32
    %239 = vector.broadcast %cst_86 : f32 to vector<8x64xf32>
    %240 = arith.addf %239, %238 : vector<8x64xf32>
    %241 = arith.divf %239, %240 : vector<8x64xf32>
    %242 = vector.extract_strided_slice %241 {offsets = [0, 0], sizes = [8, 32], strides = [1, 1]} : vector<8x64xf32> to vector<8x32xf32>
    %243 = vector.extract_strided_slice %241 {offsets = [0, 32], sizes = [8, 32], strides = [1, 1]} : vector<8x64xf32> to vector<8x32xf32>
    %244 = vector.extract_strided_slice %233 {offsets = [0, 64], sizes = [8, 32], strides = [1, 1]} : vector<8x128xf32> to vector<8x32xf32>
    %245 = vector.extract_strided_slice %232 {offsets = [0, 64], sizes = [8, 32], strides = [1, 1]} : vector<8x128xf32> to vector<8x32xf32>
    %246 = arith.addf %245, %19 : vector<8x32xf32>
    %247 = arith.mulf %242, %246 : vector<8x32xf32>
    %248 = arith.addf %244, %247 : vector<8x32xf32>
    %249 = math.tanh %248 : vector<8x32xf32>
    %cst_87 = arith.constant 1.000000e+00 : f32
    %250 = vector.broadcast %cst_87 : f32 to vector<8x32xf32>
    %251 = arith.subf %250, %243 : vector<8x32xf32>
    %252 = arith.mulf %251, %249 : vector<8x32xf32>
    %253 = arith.mulf %243, %202 : vector<8x32xf32>
    %254 = arith.addf %252, %253 : vector<8x32xf32>
    %cst_88 = arith.constant dense<0.000000e+00> : vector<8x32xf32>
    %255 = tpu.matmul %254, %16, %cst_88 {dimension_numbers = #tpu.dot_dimension_numbers<[1], [0], [0], [1], [0, 0, 1, 1], [], []>} : vector<8x32xf32>, vector<32x32xf32>, vector<8x32xf32> -> vector<8x32xf32>
    %256 = vector.shape_cast %254 : vector<8x32xf32> to vector<8x1x32xf32>
    %257 = vector.broadcast %256 : vector<8x1x32xf32> to vector<8x8x32xf32>
    %258 = arith.mulf %257, %12 : vector<8x8x32xf32>
    %cst_89 = arith.constant dense<0.000000e+00> : vector<8x8xf32>
    %259 = vector.multi_reduction <add>, %258, %cst_89 [2] : vector<8x8x32xf32> to vector<8x8xf32>
    %cst_90 = arith.constant dense<0xFF800000> : vector<8xf32>
    %260 = vector.multi_reduction <maximumf>, %259, %cst_90 [1] : vector<8x8xf32> to vector<8xf32>
    %261 = vector.shape_cast %260 : vector<8xf32> to vector<8x1xf32>
    %262 = vector.broadcast %261 : vector<8x1xf32> to vector<8x8xf32>
    %263 = arith.subf %259, %262 : vector<8x8xf32>
    %264 = math.exp %263 : vector<8x8xf32>
    %cst_91 = arith.constant dense<0.000000e+00> : vector<8xf32>
    %265 = vector.multi_reduction <add>, %264, %cst_91 [1] : vector<8x8xf32> to vector<8xf32>
    %266 = vector.shape_cast %265 : vector<8xf32> to vector<8x1xf32>
    %267 = vector.broadcast %266 : vector<8x1xf32> to vector<8x8xf32>
    %268 = arith.divf %264, %267 : vector<8x8xf32>
    %269 = vector.shape_cast %268 : vector<8x8xf32> to vector<8x8x1xf32>
    %270 = vector.broadcast %269 : vector<8x8x1xf32> to vector<8x8x32xf32>
    %271 = arith.mulf %270, %8 : vector<8x8x32xf32>
    %cst_92 = arith.constant dense<0.000000e+00> : vector<8x32xf32>
    %272 = vector.multi_reduction <add>, %271, %cst_92 [1] : vector<8x8x32xf32> to vector<8x32xf32>
    %cst_93 = arith.constant dense<0.000000e+00> : vector<8x32xf32>
    %273 = tpu.matmul %272, %15, %cst_93 {dimension_numbers = #tpu.dot_dimension_numbers<[1], [0], [0], [1], [0, 0, 1, 1], [], []>} : vector<8x32xf32>, vector<32x32xf32>, vector<8x32xf32> -> vector<8x32xf32>
    %274 = arith.addf %273, %255 : vector<8x32xf32>
    %275 = math.tanh %274 : vector<8x32xf32>
    %c4 = arith.constant 4 : index
    %c0_94 = arith.constant 0 : index
    %c0_95 = arith.constant 0 : index
    %276 = vector.load %arg11[%c4, %c0_94, %c0_95] : memref<6x8x32xf32, #tpu.memory_space<vmem>>, vector<1x8x32xf32>
    %277 = vector.shape_cast %276 : vector<1x8x32xf32> to vector<8x32xf32>
    %278 = vector.shape_cast %275 : vector<8x32xf32> to vector<1x8x32xf32>
    tpu.vector_store %arg11[%c4, %c0_94, %c0_95], %278 {strides = array<i32>} : memref<6x8x32xf32, #tpu.memory_space<vmem>>, vector<1x8x32xf32>,
    %c4_96 = arith.constant 4 : index
    %c0_97 = arith.constant 0 : index
    %c0_98 = arith.constant 0 : index
    %279 = vector.load %arg12[%c4_96, %c0_97, %c0_98] : memref<6x8x8xf32, #tpu.memory_space<vmem>>, vector<1x8x8xf32>
    %280 = vector.shape_cast %279 : vector<1x8x8xf32> to vector<8x8xf32>
    %281 = vector.shape_cast %268 : vector<8x8xf32> to vector<1x8x8xf32>
    tpu.vector_store %arg12[%c4_96, %c0_97, %c0_98], %281 {strides = array<i32>} : memref<6x8x8xf32, #tpu.memory_space<vmem>>, vector<1x8x8xf32>,
    %282 = vector.extract_strided_slice %7 {offsets = [40, 0], sizes = [8, 128], strides = [1, 1]} : vector<48x128xf32> to vector<8x128xf32>
    %cst_99 = arith.constant dense<0.000000e+00> : vector<8x128xf32>
    %283 = tpu.matmul %275, %13, %cst_99 {dimension_numbers = #tpu.dot_dimension_numbers<[1], [0], [0], [1], [0, 0, 1, 1], [], []>} : vector<8x32xf32>, vector<32x128xf32>, vector<8x128xf32> -> vector<8x128xf32>
    %cst_100 = arith.constant dense<0.000000e+00> : vector<8x128xf32>
    %284 = tpu.matmul %254, %14, %cst_100 {dimension_numbers = #tpu.dot_dimension_numbers<[1], [0], [0], [1], [0, 0, 1, 1], [], []>} : vector<8x32xf32>, vector<32x128xf32>, vector<8x128xf32> -> vector<8x128xf32>
    %285 = arith.addf %282, %283 : vector<8x128xf32>
    %286 = vector.extract_strided_slice %285 {offsets = [0, 0], sizes = [8, 64], strides = [1, 1]} : vector<8x128xf32> to vector<8x64xf32>
    %287 = vector.extract_strided_slice %284 {offsets = [0, 0], sizes = [8, 64], strides = [1, 1]} : vector<8x128xf32> to vector<8x64xf32>
    %288 = arith.addf %286, %287 : vector<8x64xf32>
    %289 = arith.negf %288 : vector<8x64xf32>
    %290 = math.exp %289 : vector<8x64xf32>
    %cst_101 = arith.constant 1.000000e+00 : f32
    %291 = vector.broadcast %cst_101 : f32 to vector<8x64xf32>
    %292 = arith.addf %291, %290 : vector<8x64xf32>
    %293 = arith.divf %291, %292 : vector<8x64xf32>
    %294 = vector.extract_strided_slice %293 {offsets = [0, 0], sizes = [8, 32], strides = [1, 1]} : vector<8x64xf32> to vector<8x32xf32>
    %295 = vector.extract_strided_slice %293 {offsets = [0, 32], sizes = [8, 32], strides = [1, 1]} : vector<8x64xf32> to vector<8x32xf32>
    %296 = vector.extract_strided_slice %285 {offsets = [0, 64], sizes = [8, 32], strides = [1, 1]} : vector<8x128xf32> to vector<8x32xf32>
    %297 = vector.extract_strided_slice %284 {offsets = [0, 64], sizes = [8, 32], strides = [1, 1]} : vector<8x128xf32> to vector<8x32xf32>
    %298 = arith.addf %297, %19 : vector<8x32xf32>
    %299 = arith.mulf %294, %298 : vector<8x32xf32>
    %300 = arith.addf %296, %299 : vector<8x32xf32>
    %301 = math.tanh %300 : vector<8x32xf32>
    %cst_102 = arith.constant 1.000000e+00 : f32
    %302 = vector.broadcast %cst_102 : f32 to vector<8x32xf32>
    %303 = arith.subf %302, %295 : vector<8x32xf32>
    %304 = arith.mulf %303, %301 : vector<8x32xf32>
    %305 = arith.mulf %295, %254 : vector<8x32xf32>
    %306 = arith.addf %304, %305 : vector<8x32xf32>
    %cst_103 = arith.constant dense<0.000000e+00> : vector<8x32xf32>
    %307 = tpu.matmul %306, %16, %cst_103 {dimension_numbers = #tpu.dot_dimension_numbers<[1], [0], [0], [1], [0, 0, 1, 1], [], []>} : vector<8x32xf32>, vector<32x32xf32>, vector<8x32xf32> -> vector<8x32xf32>
    %308 = vector.shape_cast %306 : vector<8x32xf32> to vector<8x1x32xf32>
    %309 = vector.broadcast %308 : vector<8x1x32xf32> to vector<8x8x32xf32>
    %310 = arith.mulf %309, %12 : vector<8x8x32xf32>
    %cst_104 = arith.constant dense<0.000000e+00> : vector<8x8xf32>
    %311 = vector.multi_reduction <add>, %310, %cst_104 [2] : vector<8x8x32xf32> to vector<8x8xf32>
    %cst_105 = arith.constant dense<0xFF800000> : vector<8xf32>
    %312 = vector.multi_reduction <maximumf>, %311, %cst_105 [1] : vector<8x8xf32> to vector<8xf32>
    %313 = vector.shape_cast %312 : vector<8xf32> to vector<8x1xf32>
    %314 = vector.broadcast %313 : vector<8x1xf32> to vector<8x8xf32>
    %315 = arith.subf %311, %314 : vector<8x8xf32>
    %316 = math.exp %315 : vector<8x8xf32>
    %cst_106 = arith.constant dense<0.000000e+00> : vector<8xf32>
    %317 = vector.multi_reduction <add>, %316, %cst_106 [1] : vector<8x8xf32> to vector<8xf32>
    %318 = vector.shape_cast %317 : vector<8xf32> to vector<8x1xf32>
    %319 = vector.broadcast %318 : vector<8x1xf32> to vector<8x8xf32>
    %320 = arith.divf %316, %319 : vector<8x8xf32>
    %321 = vector.shape_cast %320 : vector<8x8xf32> to vector<8x8x1xf32>
    %322 = vector.broadcast %321 : vector<8x8x1xf32> to vector<8x8x32xf32>
    %323 = arith.mulf %322, %8 : vector<8x8x32xf32>
    %cst_107 = arith.constant dense<0.000000e+00> : vector<8x32xf32>
    %324 = vector.multi_reduction <add>, %323, %cst_107 [1] : vector<8x8x32xf32> to vector<8x32xf32>
    %cst_108 = arith.constant dense<0.000000e+00> : vector<8x32xf32>
    %325 = tpu.matmul %324, %15, %cst_108 {dimension_numbers = #tpu.dot_dimension_numbers<[1], [0], [0], [1], [0, 0, 1, 1], [], []>} : vector<8x32xf32>, vector<32x32xf32>, vector<8x32xf32> -> vector<8x32xf32>
    %326 = arith.addf %325, %307 : vector<8x32xf32>
    %327 = math.tanh %326 : vector<8x32xf32>
    %c5 = arith.constant 5 : index
    %c0_109 = arith.constant 0 : index
    %c0_110 = arith.constant 0 : index
    %328 = vector.load %arg11[%c5, %c0_109, %c0_110] : memref<6x8x32xf32, #tpu.memory_space<vmem>>, vector<1x8x32xf32>
    %329 = vector.shape_cast %328 : vector<1x8x32xf32> to vector<8x32xf32>
    %330 = vector.shape_cast %327 : vector<8x32xf32> to vector<1x8x32xf32>
    tpu.vector_store %arg11[%c5, %c0_109, %c0_110], %330 {strides = array<i32>} : memref<6x8x32xf32, #tpu.memory_space<vmem>>, vector<1x8x32xf32>,
    %c5_111 = arith.constant 5 : index
    %c0_112 = arith.constant 0 : index
    %c0_113 = arith.constant 0 : index
    %331 = vector.load %arg12[%c5_111, %c0_112, %c0_113] : memref<6x8x8xf32, #tpu.memory_space<vmem>>, vector<1x8x8xf32>
    %332 = vector.shape_cast %331 : vector<1x8x8xf32> to vector<8x8xf32>
    %333 = vector.shape_cast %320 : vector<8x8xf32> to vector<1x8x8xf32>
    tpu.vector_store %arg12[%c5_111, %c0_112, %c0_113], %333 {strides = array<i32>} : memref<6x8x8xf32, #tpu.memory_space<vmem>>, vector<1x8x8xf32>,
    %c0_114 = arith.constant 0 : index
    %c0_115 = arith.constant 0 : index
    %334 = vector.load %arg13[%c0_114, %c0_115] : memref<8x32xf32, #tpu.memory_space<vmem>>, vector<8x32xf32>
    tpu.vector_store %arg13[%c0_114, %c0_115], %306 {strides = array<i32>} : memref<8x32xf32, #tpu.memory_space<vmem>>, vector<8x32xf32>,
    %c0_116 = arith.constant 0 : index
    %c0_117 = arith.constant 0 : index
    %335 = vector.load %arg14[%c0_116, %c0_117] : memref<8x32xf32, #tpu.memory_space<vmem>>, vector<8x32xf32>
    tpu.vector_store %arg14[%c0_116, %c0_117], %327 {strides = array<i32>} : memref<8x32xf32, #tpu.memory_space<vmem>>, vector<8x32xf32>,
    return
  }
}

</mosaic_0001>

<bundles_post_ra>
// kernel: tpu_custom_call.1
= control target key start
LH: loop header
LB: loop body
LE: loop exit
PB: predicated region body
PF: predicated region fallthrough
CT: control target
= control target key end

     0   :  { %20 = vsyncpa [#allocation3], 0  ;;  %s8776_s0 = inlined_call_operand.vmem [shape: s32[48,1], index: 0, kind: input, shape index: {}]   ;;  %s8777_s1 = inlined_call_operand.hbm [shape: f32[8,8,32], index: 1, kind: input, shape index: {}]   ;;  %s8778_s2 = inlined_call_operand.hbm [shape: f32[8,32], index: 2, kind: input, shape index: {}]   ;;  %s8779_s3 = inlined_call_operand.hbm [shape: f32[8,32], index: 3, kind: input, shape index: {}]   ;;  %s8780_s4 = inlined_call_operand.vmem [shape: f32[64,128], index: 4, kind: input, shape index: {}]   ;;  %s8781_s5 = inlined_call_operand.vmem [shape: f32[1,32], index: 5, kind: input, shape index: {}]   ;;  %s8782_s6 = inlined_call_operand.hbm [shape: f32[32,128], index: 6, kind: input, shape index: {}]   ;;  %s8783_s7 = inlined_call_operand.hbm [shape: f32[32,128], index: 7, kind: input, shape index: {}]   ;;  %s8784_s8 = inlined_call_operand.hbm [shape: f32[32,32], index: 8, kind: input, shape index: {}]   ;;  %s8785_s9 = inlined_call_operand.hbm [shape: f32[32,32], index: 9, kind: input, shape index: {}]   ;;  %s8786_s10 = inlined_call_operand.hbm [shape: f32[32,32], index: 10, kind: input, shape index: {}]   ;;  %s8787_s11 = inlined_call_operand.hbm [shape: f32[6,8,32], index: 11, kind: output, shape index: {0}]   ;;  %s8788_s12 = inlined_call_operand.hbm [shape: f32[6,8,8], index: 12, kind: output, shape index: {1}]   ;;  %s8789_s13 = inlined_call_operand.hbm [shape: f32[8,32], index: 13, kind: output, shape index: {2}]   ;;  %s8790_s14 = inlined_call_operand.hbm [shape: f32[8,32], index: 14, kind: output, shape index: {3}]  }
   0x1   :  { %21 = vsyncpa [#allocation6], 0 }
   0x2   :  { %22 = vsyncpa [#allocation9], 0 }
   0x3   :  { %23 = vsyncpa [#allocation12], 0 }
   0x4   :  { %24 = vsyncpa [#allocation15], 0 }
   0x5   :  { %25 = vsyncpa [#allocation4], 0 }
   0x6   :  { %26 = vsyncpa [#allocation18], 0 }
   0x7   :  { %27 = vsyncpa [#allocation21], 0  ;;  %s7152_s29 = smov [#allocation5]   ;;  %s6872_s17 = scalar_lea.hbm %s8778_s2, 128 }
   0x8   :  { %s48_s30 = sshll.u32 %s7152_s29, 4  ;;  %p6873_p0 = scmp.ne.s32.totalorder %s8778_s2, %s6872_s17  ;;  %s49_s30 = int_to_ptr.vmem [resolvable:$true] %s48_s30 }
   0x9   :  { %p6876_p1 = scmp.lt.u32.totalorder %s6872_s17, %s8778_s2 }
   0xb   :  { %p6878_p2 = pnand %p6876_p1, %p6873_p0 }
   0xd   :  { %6881 = shalt.err (!%p6878_p2)
}
   0xe   :  { %s6882_s22 = scalar_lea.vmem %s49_s30, 128  ;;  %p6887_p4 = scmp.lt.s32.totalorder %s49_s30, %s49_s30 }
   0xf   :  { %p6883_p3 = scmp.ne.s32.totalorder %s49_s30, %s6882_s22  ;;  %p6888_p5 = scmp.lt.s32.totalorder %s6882_s22, %s6882_s22 }
  0x11   :  { %p6889_p6 = por %p6888_p5, %p6887_p4 }
  0x13   :  { %p6890_p7 = pnand %p6889_p6, %p6883_p3 }
  0x15   :  { %6893 = shalt.err (!%p6890_p7)
}
  0x16   :  { %51 = dma.hbm_to_vmem [thread:$0]  %s8778_s2, 128, %s49_s30, [#allocation6]  }
  0x17   :  { %s7153_s25 = smov [#allocation8]   ;;  %s7154_s27 = smov [#allocation11]  }
  0x18   :  { %s71_s26 = sshll.u32 %s7153_s25, 4  ;;  %s95_s28 = sshll.u32 %s7154_s27, 4  ;;  %s72_s26 = int_to_ptr.vmem [resolvable:$true] %s71_s26  ;;  %s96_s28 = int_to_ptr.vmem [resolvable:$true] %s95_s28 }
  0x19   :  { %s6894_s16 = scalar_lea.hbm %s8782_s6, 512 }
  0x1a   :  { %p6895_p8 = scmp.ne.s32.totalorder %s8782_s6, %s6894_s16  ;;  %p6898_p9 = scmp.lt.u32.totalorder %s6894_s16, %s8782_s6 }
  0x1c   :  { %p6900_p10 = pnand %p6898_p9, %p6895_p8 }
  0x1e   :  { %6903 = shalt.err (!%p6900_p10)
}
  0x1f   :  { %s6904_s2 = scalar_lea.vmem %s72_s26, 512  ;;  %p6909_p12 = scmp.lt.s32.totalorder %s72_s26, %s72_s26 }
  0x20   :  { %p6905_p11 = scmp.ne.s32.totalorder %s72_s26, %s6904_s2  ;;  %p6910_p13 = scmp.lt.s32.totalorder %s6904_s2, %s6904_s2 }
  0x22   :  { %p6911_p0 = por %p6910_p13, %p6909_p12 }
  0x24   :  { %p6912_p1 = pnand %p6911_p0, %p6905_p11 }
  0x26   :  { %6915 = shalt.err (!%p6912_p1)
}
  0x27   :  { %s7155_s30 = smov 128   ;;  %s7156_s21 = smov 8  }
  0x28   :  { %77 = dma.hbm_to_vmem [thread:$0]  %s8782_s6, 512, %s72_s26, [#allocation9], %s7155_s30, %s7155_s30, %s7156_s21  }
  0x29   :  { %s6916_s27 = scalar_lea.hbm %s8784_s8, 512 }
  0x2a   :  { %p6917_p2 = scmp.ne.s32.totalorder %s8784_s8, %s6916_s27  ;;  %p6920_p3 = scmp.lt.u32.totalorder %s6916_s27, %s8784_s8 }
  0x2c   :  { %p6922_p4 = pnand %p6920_p3, %p6917_p2 }
  0x2e   :  { %6925 = shalt.err (!%p6922_p4)
}
  0x2f   :  { %s6926_s18 = scalar_lea.vmem %s96_s28, 512  ;;  %p6931_p6 = scmp.lt.s32.totalorder %s96_s28, %s96_s28 }
  0x30   :  { %p6927_p5 = scmp.ne.s32.totalorder %s96_s28, %s6926_s18  ;;  %p6932_p7 = scmp.lt.s32.totalorder %s6926_s18, %s6926_s18 }
  0x32   :  { %p6933_p8 = por %p6932_p7, %p6931_p6 }
  0x34   :  { %p6934_p9 = pnand %p6933_p8, %p6927_p5 }
  0x36   :  { %6937 = shalt.err (!%p6934_p9)
}
  0x37   :  { %101 = dma.hbm_to_vmem [thread:$0]  %s8784_s8, 512, %s96_s28, [#allocation12], %s7155_s30, %s7155_s30, %s7156_s21  }
  0x38   :  { %s7157_s19 = smov [#allocation2]   ;;  %s7158_s2 = smov [#allocation7]  }
  0x39   :  { %s35_s20 = sshll.u32 %s7157_s19, 4  ;;  %s58_s22 = sshll.u32 %s7158_s2, 4  ;;  %s36_s20 = int_to_ptr.vmem [resolvable:$true] %s35_s20  ;;  %s59_s22 = int_to_ptr.vmem [resolvable:$true] %s58_s22 }
  0x3a   :  { %s6938_s25 = scalar_lea.hbm %s8777_s1, 1024 }
  0x3b   :  { %p6939_p10 = scmp.ne.s32.totalorder %s8777_s1, %s6938_s25  ;;  %p6942_p11 = scmp.lt.u32.totalorder %s6938_s25, %s8777_s1 }
  0x3d   :  { %p6944_p12 = pnand %p6942_p11, %p6939_p10 }
  0x3f   :  { %6947 = shalt.err (!%p6944_p12)
}
  0x40   :  { %s6948_s8 = scalar_lea.vmem %s36_s20, 1024  ;;  %p6953_p0 = scmp.lt.s32.totalorder %s36_s20, %s36_s20 }
  0x41   :  { %p6949_p13 = scmp.ne.s32.totalorder %s36_s20, %s6948_s8  ;;  %p6954_p1 = scmp.lt.s32.totalorder %s6948_s8, %s6948_s8 }
  0x43   :  { %p6955_p2 = por %p6954_p1, %p6953_p0 }
  0x45   :  { %p6956_p3 = pnand %p6955_p2, %p6949_p13 }
  0x47   :  { %6959 = shalt.err (!%p6956_p3)
}
  0x48   :  { %41 = dma.hbm_to_vmem [thread:$0]  %s8777_s1, 1024, %s36_s20, [#allocation3], %s7155_s30, %s7155_s30, %s7156_s21  }
  0x49   :  { %s6960_s26 = scalar_lea.hbm %s8779_s3, 128 }
  0x4a   :  { %p6961_p4 = scmp.ne.s32.totalorder %s8779_s3, %s6960_s26  ;;  %p6964_p5 = scmp.lt.u32.totalorder %s6960_s26, %s8779_s3 }
  0x4c   :  { %p6966_p6 = pnand %p6964_p5, %p6961_p4 }
  0x4e   :  { %6969 = shalt.err (!%p6966_p6)
}
  0x4f   :  { %s6970_s25 = scalar_lea.vmem %s59_s22, 128  ;;  %p6975_p8 = scmp.lt.s32.totalorder %s59_s22, %s59_s22 }
  0x50   :  { %p6971_p7 = scmp.ne.s32.totalorder %s59_s22, %s6970_s25  ;;  %p6976_p9 = scmp.lt.s32.totalorder %s6970_s25, %s6970_s25 }
  0x52   :  { %p6977_p10 = por %p6976_p9, %p6975_p8 }
  0x54   :  { %p6978_p11 = pnand %p6977_p10, %p6971_p7 }
  0x56   :  { %6981 = shalt.err (!%p6978_p11)
}
  0x57   :  { %61 = dma.hbm_to_vmem [thread:$0]  %s8779_s3, 128, %s59_s22, [#allocation6]  }
  0x58   :  { %s7159_s27 = smov [#allocation10]   ;;  %s7160_s15 = smov [#allocation13]  }
  0x59   :  { %s83_s29 = sshll.u32 %s7159_s27, 4  ;;  %s107_s16 = sshll.u32 %s7160_s15, 4  ;;  %s84_s29 = int_to_ptr.vmem [resolvable:$true] %s83_s29  ;;  %s108_s16 = int_to_ptr.vmem [resolvable:$true] %s107_s16 }
  0x5a   :  { %s6982_s17 = scalar_lea.hbm %s8783_s7, 512 }
  0x5b   :  { %p6983_p12 = scmp.ne.s32.totalorder %s8783_s7, %s6982_s17  ;;  %p6986_p13 = scmp.lt.u32.totalorder %s6982_s17, %s8783_s7 }
  0x5d   :  { %p6988_p0 = pnand %p6986_p13, %p6983_p12 }
  0x5f   :  { %6991 = shalt.err (!%p6988_p0)
}
  0x60   :  { %s6992_s3 = scalar_lea.vmem %s84_s29, 512  ;;  %p6997_p2 = scmp.lt.s32.totalorder %s84_s29, %s84_s29 }
  0x61   :  { %p6993_p1 = scmp.ne.s32.totalorder %s84_s29, %s6992_s3  ;;  %p6998_p3 = scmp.lt.s32.totalorder %s6992_s3, %s6992_s3 }
  0x63   :  { %p6999_p4 = por %p6998_p3, %p6997_p2 }
  0x65   :  { %p7000_p5 = pnand %p6999_p4, %p6993_p1 }
  0x67   :  { %7003 = shalt.err (!%p7000_p5)
}
  0x68   :  { %89 = dma.hbm_to_vmem [thread:$0]  %s8783_s7, 512, %s84_s29, [#allocation9], %s7155_s30, %s7155_s30, %s7156_s21  }
  0x69   :  { %s7004_s25 = scalar_lea.hbm %s8785_s9, 512 }
  0x6a   :  { %p7005_p6 = scmp.ne.s32.totalorder %s8785_s9, %s7004_s25  ;;  %p7008_p7 = scmp.lt.u32.totalorder %s7004_s25, %s8785_s9 }
  0x6c   :  { %p7010_p8 = pnand %p7008_p7, %p7005_p6 }
  0x6e   :  { %7013 = shalt.err (!%p7010_p8)
}
  0x6f   :  { %s7014_s8 = scalar_lea.vmem %s108_s16, 512  ;;  %p7019_p10 = scmp.lt.s32.totalorder %s108_s16, %s108_s16 }
  0x70   :  { %p7015_p9 = scmp.ne.s32.totalorder %s108_s16, %s7014_s8  ;;  %p7020_p11 = scmp.lt.s32.totalorder %s7014_s8, %s7014_s8 }
  0x72   :  { %p7021_p12 = por %p7020_p11, %p7019_p10 }
  0x74   :  { %p7022_p13 = pnand %p7021_p12, %p7015_p9 }
  0x76   :  { %7025 = shalt.err (!%p7022_p13)
}
  0x77   :  { %113 = dma.hbm_to_vmem [thread:$0]  %s8785_s9, 512, %s108_s16, [#allocation12], %s7155_s30, %s7155_s30, %s7156_s21  }
  0x78   :  { %s7161_s28 = smov [#allocation14]   ;;  %s7026_s26 = scalar_lea.hbm %s8786_s10, 512 }
  0x79   :  { %s119_s17 = sshll.u32 %s7161_s28, 4  ;;  %p7027_p0 = scmp.ne.s32.totalorder %s8786_s10, %s7026_s26  ;;  %s120_s17 = int_to_ptr.vmem [resolvable:$true] %s119_s17 }
  0x7a   :  { %p7030_p1 = scmp.lt.u32.totalorder %s7026_s26, %s8786_s10 }
  0x7c   :  { %p7032_p2 = pnand %p7030_p1, %p7027_p0 }
  0x7e   :  { %7035 = shalt.err (!%p7032_p2)
}
  0x7f   :  { %s7036_s23 = scalar_lea.vmem %s120_s17, 512  ;;  %p7041_p4 = scmp.lt.s32.totalorder %s120_s17, %s120_s17 }
  0x80   :  { %p7037_p3 = scmp.ne.s32.totalorder %s120_s17, %s7036_s23  ;;  %p7042_p5 = scmp.lt.s32.totalorder %s7036_s23, %s7036_s23 }
  0x82   :  { %p7043_p6 = por %p7042_p5, %p7041_p4 }
  0x84   :  { %p7044_p7 = pnand %p7043_p6, %p7037_p3 }
  0x86   :  { %7047 = shalt.err (!%p7044_p7)
}
  0x87   :  { %125 = dma.hbm_to_vmem [thread:$0]  %s8786_s10, 512, %s120_s17, [#allocation15], %s7155_s30, %s7155_s30, %s7156_s21  }
  0x88   :  { %7136 = dma.done.wait [#allocation3], 1024  }
  0x89   :  { %7137 = vsyncadd [#allocation3], 4294966272 }
  0x8a   :  { %7138 = dma.done.wait [#allocation6], 256  }
  0x8b   :  { %7139 = vsyncadd [#allocation6], 4294967040 }
  0x8c   :  { %7140 = dma.done.wait [#allocation9], 1024  }
  0x8d   :  { %7141 = vsyncadd [#allocation9], 4294966272 }
  0x8e   :  { %7142 = dma.done.wait [#allocation12], 1024  }
  0x8f   :  { %7143 = vsyncadd [#allocation12], 4294966272 }
  0x90   :  { %7144 = dma.done.wait [#allocation15], 512  }
  0x91   :  { %7145 = vsyncadd [#allocation15], 4294966784  ;;  %v7162_v0 = vmov 0   ;;  %v152_v1 = vld [vmem:[%s8776_s0 + $0x10] sm:$0xff]  ;;  %v150_v2 = vld [vmem:[%s8776_s0] sm:$0xff]  ;;  %vm328_vm0 = vcmask 261120   ;;  %v156_v39 = vlaneseq }
  0x92   :  { %6607 = vset.pattern.permute.xlu1 %v7162_v0  ;;  %6606 = vset.pattern.permute.xlu0 %v7162_v0  ;;  %v153_v3 = vld [vmem:[%s8776_s0 + $0x18] sm:$0xff]  ;;  %v151_v4 = vld [vmem:[%s8776_s0 + $0x8] sm:$0xff]  ;;  %v194_v5 = vld [vmem:[%s8780_s4] sm:$0xff]  ;;  %v8793_v29 = vmov 0.0|0.0   ;;  %vm7164_vm1 = vmmov 0   ;;  %v8791_v37 = vmov 0.0  }
  0x93   :  { %165 = vperm.xlu1 %6607, %v152_v1   ;;  %159 = vperm.xlu0 %6606, %v150_v2   ;;  %v195_v6 = vld [vmem:[%s8780_s4 + $0x8] sm:$0xff]  ;;  %v325_v9 = vld [vmem:[#allocation11 + $0x8] sm:$0xff]  ;;  %v197_v11 = vld [vmem:[%s8780_s4 + $0x18] sm:$0xff]  ;;  %s7166_s15 = smov 64   ;;  %v7449_v40 = vand.u32 127, %v156_v39  ;;  %vm202_vm2 = vcmask 523264  }
  0x94   :  { %v324_v7 = vld [vmem:[#allocation11] sm:$0xff]  ;;  %v6400_v8 = vpack.c.bf16 %v195_v6, %v194_v5  ;;  %v196_v10 = vld [vmem:[%s8780_s4 + $0x10] sm:$0xff]  ;;  %v326_v14 = vld [vmem:[#allocation11 + $0x10] sm:$0xff]  ;;  %s7168_s8 = smov 96   ;;  %vm962_vm9 = vcmask 1041409   ;;  %vm964_vm10 = vcmask 1042434  }
  0x95   :  { %v7387_v12 = vpack.c.bf16 %v325_v9, %v324_v7  ;;  %v6404_v13 = vpack.c.bf16 %v197_v11, %v196_v10  ;;  %v327_v15 = vld [vmem:[#allocation11 + $0x18] sm:$0xff]  ;;  %v199_v18 = vld [vmem:[%s8780_s4 + $0x28] sm:$0xff]  ;;  %v7405_v21 = vld [vmem:[#allocation2 + $0x20] sm:$0xff]  ;;  %vm966_vm11 = vcmask 1043459   ;;  %vm968_vm12 = vcmask 1044484   ;;  %s7170_s7 = smov [#allocation17]  }
  0x96   :  { %v7389_v16 = vpack.c.bf16 %v327_v15, %v326_v14  ;;  %v198_v17 = vld [vmem:[%s8780_s4 + $0x20] sm:$0xff]  ;;  %v155_v19 = vld [vmem:[%s8776_s0 + $0x28] sm:$0xff]  ;;  %6401 = vmatprep.subr.bf16.mxu0 %v6400_v8  ;;  %v459_v24 = vld [vmem:[#allocation8 + $0x8] sm:$0xff]  ;;  %6130 = vmatprep.mubr.msk.f32.mxu1 %vm328_vm0, %v7405_v21  ;;  %vm970_vm13 = vcmask 1045509   ;;  %vm972_vm14 = vcmask 1046534   ;;  %vm974_vm15 = vcmask 1047559  }
  0x97   :  { %168 = vperm.xlu1 %6607, %v153_v3   ;;  %162 = vperm.xlu0 %6606, %v151_v4   ;;  %v154_v20 = vld [vmem:[%s8776_s0 + $0x20] sm:$0xff]  ;;  %v6408_v22 = vpack.c.bf16 %v199_v18, %v198_v17  ;;  %v458_v23 = vld [vmem:[#allocation8] sm:$0xff]  ;;  %v200_v25 = vld [vmem:[%s8780_s4 + $0x30] sm:$0xff]  ;;  %s5847_s29 = sshll.u32 %s7170_s7, 4  ;;  %s5848_s29 = int_to_ptr.vmem [resolvable:$true] %s5847_s29 }
  0x98   :  { %6568 = vmatprep.subr.bf16.mxu1 %v7387_v12  ;;  %6403 = vmatpush3.bf16.msra.mxu0 %v6400_v8  ;;  %v201_v26 = vld [vmem:[%s8780_s4 + $0x38] sm:$0xff]  ;;  %v7417_v27 = vld [vmem:[#allocation2 + $0x28] sm:$0xff]  ;;  %v7419_v28 = vpack.c.bf16 %v459_v24, %v458_v23  ;;  %v7422_v33 = vld [vmem:[#allocation2 + $0x30] sm:$0xff]  ;;  %s7048_s28 = scalar_lea.vmem %s5848_s29, 768  ;;  %p7053_p9 = scmp.lt.s32.totalorder %s5848_s29, %s5848_s29 }
  0x99   :  { %6570 = vmatpush3.bf16.msra.mxu1 %v7387_v12  ;;  %6405 = vmatprep.subr.bf16.mxu0 %v6404_v13  ;;  %v6412_v30 = vpack.c.bf16 %v201_v26, %v200_v25  ;;  %v460_v31 = vld [vmem:[#allocation8 + $0x10] sm:$0xff]  ;;  %v461_v32 = vld [vmem:[#allocation8 + $0x18] sm:$0xff]  ;;  %v7427_v34 = vld [vmem:[#allocation2 + $0x38] sm:$0xff]  ;;  %p7049_p8 = scmp.ne.s32.totalorder %s5848_s29, %s7048_s28  ;;  %p7054_p10 = scmp.lt.s32.totalorder %s7048_s28, %s7048_s28 }
  0x9a   :  { %6569 = vmatprep.subr.bf16.mxu1 %v7389_v16  ;;  %v7429_v35 = vpack.c.bf16 %v461_v32, %v460_v31  ;;  %v481_v36 = vld [vmem:[#allocation7] sm:$0xff]  ;;  %v7470_v52 = vld [vmem:[#allocation2] sm:$0xff]  ;;  %v462_v53 = vld [vmem:[#allocation10] sm:$0xff] }
  0x9b   :  { %174 = vperm.xlu1 %6607, %v155_v19   ;;  %171 = vperm.xlu0 %6606, %v154_v20   ;;  %v5914_v38 = vld [vmem:[%s8781_s5] ss:$0 sm:$0xff]  ;;  %v463_v54 = vld [vmem:[#allocation10 + $0x8] sm:$0xff]  ;;  %v7481_v58 = vld [vmem:[#allocation2 + $0x10] sm:$0xff]  ;;  %s7167_s5 = smov 32   ;;  %p7055_p11 = por %p7054_p10, %p7053_p9 }
  0x9c   :  { %6407 = vmatpush3.bf16.msra.mxu0 %v6404_v13  ;;  %v7477_v56 = vld [vmem:[#allocation2 + $0x8] sm:$0xff]  ;;  %v7479_v57 = vpack.c.bf16 %v463_v54, %v462_v53  ;;  %v464_v59 = vld [vmem:[#allocation10 + $0x10] sm:$0xff]  ;;  %v7488_v61 = vld [vmem:[#allocation2 + $0x18] sm:$0xff] }
  0x9d   :  { %6571 = vmatpush3.bf16.msra.mxu1 %v7389_v16  ;;  %6409 = vmatprep.subr.bf16.mxu0 %v6408_v22  ;;  %v465_v60 = vld [vmem:[#allocation10 + $0x18] sm:$0xff]  ;;  %v480_v63 = vld [vmem:[#allocation5] sm:$0xff]  ;;  %p7056_p12 = pnand %p7055_p11, %p7049_p8 }
  0x9e   :  { %6424 = vmatprep.subr.bf16.mxu1 %v8793_v29  ;;  %v7490_v62 = vpack.c.bf16 %v465_v60, %v464_v59 }
  0x9f   :  { %636 = vrot.lane.b32.xlu0 %v5914_v38, %s7166_s15 }
  0xa0   :  { %6131 = vmatmul.mubr.msk.f32.vlgmr.msra.gmra.mrb[0].mxu1 %vm328_vm0, %v7417_v27  ;;  %6411 = vmatpush3.bf16.msra.mxu0 %v6408_v22 }
  0xa1   :  { %6426 = vmatpush3.bf16.msra.mxu1 %v7419_v28  ;;  %6413 = vmatprep.subr.bf16.mxu0 %v6412_v30 }
  0xa2   :  { %6133 = vmatprep.mubr.msk.f32.mxu1 %vm328_vm0, %v7422_v33  ;;  %6427 = vmatprep.subr.bf16.mxu1 %v8793_v29 }
  0xa4   :  { %6134 = vmatmul.mubr.msk.f32.gmra.mrb[2].mxu1 %vm328_vm0, %v7427_v34  ;;  %6415 = vmatpush3.bf16.msra.mxu0 %v6412_v30 }
  0xa5   :  { %6429 = vmatpush3.bf16.msra.mxu1 %v7429_v35  ;;  %6417 = vmatprep.subr.bf16.mxu0 %v7387_v12 }
  0xa6   :  { %6144 = vmatprep.mubr.msk.f32.mxu1 %vm7164_vm1, %v8791_v37  ;;  %6436 = vmatprep.subr.bf16.mxu1 %v8793_v29 }
  0xa8   :  { %6145 = vmatmul.mubr.msk.f32.vlgmr.msra.gmra.mrb[4].mxu1 %vm328_vm0, %v481_v36 }
  0xa9   :  { %6166 = vmatprep.mubr.msk.f32.mxu1 %vm7164_vm1, %v8791_v37 }
 0x112   :  { %v166_v41 = vpop.permute.xlu1 %165  ;;  %v160_v42 = vpop.permute.xlu0 %159 }
 0x113   :  { %vm176_vm3 = vcmp.eq.s32.totalorder %v160_v42, %v7449_v40  ;;  %vm178_vm4 = vcmp.eq.s32.totalorder %v166_v41, %v7449_v40  ;;  %v7169_v41 = vmov 1966171168  }
 0x114   :  { %v5894_v43 = vsel %vm176_vm3, 1.0, %v8791_v37  ;;  %v5896_v46 = vsel %vm178_vm4, 1.0, %v8791_v37  ;;  %v739_v42 = vunpack.c.l.s4 %v7169_v41 }
 0x115   :  { %6107 = vmatprep.mubr.msk.f32.mxu0 %vm202_vm2, %v5894_v43 }
 0x116   :  { %v169_v44 = vpop.permute.xlu1 %168  ;;  %v163_v45 = vpop.permute.xlu0 %162  ;;  %v740_v43 = vunpack.c.0.s8 %v739_v42 }
 0x117   :  { %vm177_vm5 = vcmp.eq.s32.totalorder %v163_v45, %v7449_v40  ;;  %vm179_vm6 = vcmp.eq.s32.totalorder %v169_v44, %v7449_v40  ;;  %v7523_v44 = vshrl.u32 %v156_v39, 7 }
 0x118   :  { %v5895_v47 = vsel %vm177_vm5, 1.0, %v8791_v37  ;;  %v5897_v50 = vsel %vm179_vm6, 1.0, %v8791_v37 }
 0x119   :  { %6108 = vmatmul.mubr.msk.f32.vlgmr.msra.gmra.mrb[0].mxu0 %vm202_vm2, %v5895_v47  ;;  %v7533_v54 = vsub.s32 0, %v7523_v44 }
 0x11a   :  { %6419 = vmatpush3.bf16.msra.mxu0 %v7387_v12  ;;  %v175_v48 = vpop.permute.xlu1 %174  ;;  %6110 = vmatprep.mubr.msk.f32.mxu0 %vm202_vm2, %v5896_v46  ;;  %v172_v49 = vpop.permute.xlu0 %171 }
 0x11b   :  { %vm180_vm7 = vcmp.eq.s32.totalorder %v172_v49, %v7449_v40  ;;  %6421 = vmatprep.subr.bf16.mxu0 %v7389_v16  ;;  %vm181_vm8 = vcmp.eq.s32.totalorder %v175_v48, %v7449_v40  ;;  %v7526_v48 = vsub.s32 %v740_v43, %v7523_v44 }
 0x11c   :  { %v5898_v51 = vsel %vm180_vm7, 1.0, %v8791_v37  ;;  %v5899_v55 = vsel %vm181_vm8, 1.0, %v8791_v37 }
 0x11d   :  { %6111 = vmatmul.mubr.msk.f32.gmra.mrb[2].mxu0 %vm202_vm2, %v5897_v50 }
 0x11e   :  { %6113 = vmatprep.mubr.msk.f32.mxu0 %vm202_vm2, %v5898_v51  ;;  %6423 = vmatpush3.bf16.msra.mxu0 %v7389_v16  ;;  %v7516_v17 = vpop.permute.xlu0 %636 }
 0x11f   :  { %6430 = vmatprep.subr.bf16.mxu0 %v8793_v29 }
 0x121   :  { %6114 = vmatmul.mubr.msk.f32.gmra.mrb[4].mxu0 %vm202_vm2, %v5899_v55  ;;  %vm977_vm2 = vcmask 64512  }
 0x122   :  { %6124 = vmatprep.mubr.msk.f32.mxu0 %vm328_vm0, %v7470_v52 }
 0x125   :  { %6125 = vmatmul.mubr.msk.f32.vlgmr.msra.gmra.mrb[6].mxu0 %vm328_vm0, %v7477_v56 }
 0x126   :  { %6432 = vmatpush3.bf16.msra.mxu0 %v7479_v57  ;;  %6127 = vmatprep.mubr.msk.f32.mxu0 %vm328_vm0, %v7481_v58 }
 0x127   :  { %6433 = vmatprep.subr.bf16.mxu0 %v8793_v29 }
 0x129   :  { %6128 = vmatmul.mubr.msk.f32.gmra.mrb[8].mxu0 %vm328_vm0, %v7488_v61 }
 0x12a   :  { %6435 = vmatpush3.bf16.msra.mxu0 %v7490_v62  ;;  %6155 = vmatprep.mubr.msk.f32.mxu0 %vm7164_vm1, %v8791_v37 }
 0x12b   :  { %6448 = vmatprep.subr.bf16.mxu0 %v8793_v29 }
 0x12d   :  { %6156 = vmatmul.mubr.msk.f32.vlgmr.msra.gmra.mrb[10].mxu0 %vm328_vm0, %v480_v63 }
 0x12e   :  { %6450 = vmatpush3.bf16.msra.mxu0 %v7419_v28  ;;  %6188 = vmatprep.mubr.msk.f32.mxu0 %vm7164_vm1, %v8791_v37 }
 0x12f   :  { %6451 = vmatprep.subr.bf16.mxu0 %v8793_v29 }
 0x132   :  { %6453 = vmatpush3.bf16.msra.mxu0 %v7429_v35 }
 0x133   :  { %6454 = vmatprep.subr.bf16.mxu0 %v8793_v29 }
 0x173   :  { %v6132_v0 = vpop.f32.mrb[0].mxu1 }
 0x174   :  { %v439_v1 = vpop.f32.mrb[1].mxu1 }
 0x177   :  { %v6135_v2 = vpop.f32.mrb[2].mxu1 }
 0x178   :  { %v449_v3 = vpop.f32.mrb[3].mxu1 }
 0x17b   :  { %v551_v4 = vpop.f32.mrb[4].mxu1 }
 0x17c   :  { %v6146_v5 = vpop.f32.mrb[5].mxu1 }
 0x1ec   :  { %v7506_v6 = vpop.f32.mrb[0].mxu0 }
 0x1ed   :  { %v287_v7 = vpop.f32.mrb[1].mxu0 }
 0x1ee   :  { %v628_v8 = vadd.f32 %v551_v4, %v287_v7 }
 0x1f0   :  { %v7508_v9 = vpop.f32.mrb[2].mxu0 }
 0x1f1   :  { %8812 = vst [vmem:[#allocation30_spill] sm:$0xff] %v7508_v9  ;;  %v7510_v10 = vpop.f32.mrb[3].mxu0 }
 0x1f2   :  { %8813 = vst [vmem:[#allocation31_spill] sm:$0xff] %v7510_v10 }
 0x1f4   :  { %v7512_v11 = vpop.f32.mrb[4].mxu0 }
 0x1f5   :  { %8814 = vst [vmem:[#allocation32_spill] sm:$0xff] %v7512_v11  ;;  %v7514_v12 = vpop.f32.mrb[5].mxu0 }
 0x1f6   :  { %8815 = vst [vmem:[#allocation33_spill] sm:$0xff] %v7514_v12 }
 0x1f8   :  { %v6126_v13 = vpop.f32.mrb[6].mxu0 }
 0x1f9   :  { %v419_v14 = vpop.f32.mrb[7].mxu0 }
 0x1fc   :  { %v6129_v15 = vpop.f32.mrb[8].mxu0 }
 0x1fd   :  { %v429_v16 = vpop.f32.mrb[9].mxu0 }
 0x200   :  { %v624_v18 = vpop.f32.mrb[10].mxu0 }
 0x201   :  { %v6157_v19 = vpop.f32.mrb[11].mxu0  ;;  %v639_v20 = vadd.f32 %v7516_v17, %v624_v18  ;;  %v629_v22 = vadd.f32 %v628_v8, %v624_v18 }
 0x203   :  { %641 = vrot.lane.b32.xlu1 %v639_v20, %s7166_s15  ;;  %v5917_v23 = vmul.f32 -1.442695, %v629_v22 }
 0x205   :  { %6608 = vpow2.f32 %v5917_v23 }
 0x20f   :  { %v6609_v24 = vpop.eup %6608 }
 0x210   :  { %v633_v25 = vadd.f32 1.0, %v6609_v24 }
 0x212   :  { %6610 = vrcp.f32 %v633_v25 }
 0x21c   :  { %v6611_v26 = vpop.eup %6610 }
 0x21d   :  { %v651_v46 = vsub.f32 1.0, %v6611_v26 }
 0x275   :  { %v642_v30 = vpop.permute.xlu1 %641 }
 0x276   :  { %v644_v31 = vmul.f32 %v6611_v26, %v642_v30 }
 0x278   :  { %646 = vrot.lane.b32.xlu0 %v644_v31, %s7166_s15 }
 0x27c   :  { %657 = vrot.lane.b32.xlu0 %v480_v63, %s7167_s5 }
 0x280   :  { %836 = vrot.lane.b32.xlu0 %v6126_v13, %s7167_s5 }
 0x284   :  { %840 = vrot.lane.b32.xlu0 %v6129_v15, %s7167_s5 }
 0x288   :  { %844 = vrot.lane.b32.xlu0 %v6132_v0, %s7167_s5 }
 0x28c   :  { %848 = vrot.lane.b32.xlu0 %v6135_v2, %s7167_s5 }
 0x2ea   :  { %v647_v32 = vpop.permute.xlu0 %646 }
 0x2eb   :  { %v649_v36 = vadd.f32 %v647_v32, %v628_v8 }
 0x2ed   :  { %6612 = vtanh.f32 %v649_v36 }
 0x2ee   :  { %v658_v45 = vpop.permute.xlu0 %657 }
 0x2ef   :  { %v660_v49 = vmul.f32 %v6611_v26, %v658_v45 }
 0x2f2   :  { %v7539_v59 = vpop.permute.xlu0 %836 }
 0x2f7   :  { %v6613_v38 = vpop.eup %6612 }
 0x2f8   :  { %653 = vrot.lane.b32.xlu1 %v6613_v38, %s7168_s8 }
 0x2fc   :  { %834 = vrot.lane.b32.xlu1 %v419_v14, %s7167_s5 }
 0x300   :  { %838 = vrot.lane.b32.xlu1 %v429_v16, %s7167_s5  ;;  %v7551_v16 = vpop.permute.xlu0 %840 }
 0x304   :  { %842 = vrot.lane.b32.xlu1 %v439_v1, %s7167_s5  ;;  %v7565_v32 = vpop.permute.xlu0 %844 }
 0x308   :  { %846 = vrot.lane.b32.xlu1 %v449_v3, %s7167_s5 }
 0x36a   :  { %v654_v47 = vpop.permute.xlu1 %653 }
 0x36b   :  { %v656_v50 = vmul.f32 %v654_v47, %v651_v46  ;;  %v7577_v46 = vpop.permute.xlu0 %848 }
 0x36d   :  { %v7528_v51 = vadd.f32 %v660_v49, %v656_v50 }
 0x36e   :  { %v7530_v53 = vpop.permute.xlu1 %834 }
 0x36f   :  { %v737_v55 = vcombine.high %v7528_v51, %v7528_v51  ;;  %v744_v39 = vrot.slane %v7528_v51, %v7526_v48 }
 0x371   :  { %v760_v60 = vrot.slane %v744_v39, %v7526_v48  ;;  %v752_v63 = vcombine.high %v744_v39, %v744_v39  ;;  %v751_v0 = vrot.slane %v737_v55, %v7526_v48 }
 0x372   :  { %v7543_v1 = vpop.permute.xlu1 %838 }
 0x373   :  { %v789_v2 = vrot.slane %v760_v60, %v7533_v54  ;;  %v774_v3 = vrot.slane %v752_v63, %v7526_v48  ;;  %v782_v4 = vcombine.high %v760_v60, %v760_v60  ;;  %v767_v5 = vrot.slane %v751_v0, %v7526_v48 }
 0x374   :  { %v753_v7 = vcombine.high %v751_v0, %v751_v0 }
 0x375   :  { %v858_v8 = vmul.f32 %v7530_v53, %v789_v2  ;;  %v793_v13 = vrot.slane %v774_v3, %v7533_v54  ;;  %v797_v14 = vrot.slane %v782_v4, %v7533_v54  ;;  %v784_v15 = vcombine.high %v774_v3, %v774_v3 }
 0x376   :  { %v781_v20 = vrot.slane %v753_v7, %v7526_v48  ;;  %v7557_v22 = vpop.permute.xlu1 %842  ;;  %v805_v24 = vrot.slane %v767_v5, %v7533_v54  ;;  %v783_v30 = vcombine.high %v767_v5, %v767_v5 }
 0x377   :  { %874 = vrot.lane.b32.xlu1 %v858_v8, %s7168_s8  ;;  %v859_v18 = vmul.f32 %v7539_v59, %v793_v13  ;;  %v801_v19 = vrot.slane %v784_v15, %v7533_v54  ;;  %v860_v23 = vmul.f32 %v7543_v1, %v797_v14 }
 0x378   :  { %v809_v26 = vrot.slane %v781_v20, %v7533_v54  ;;  %v785_v31 = vcombine.high %v781_v20, %v781_v20  ;;  %v862_v36 = vmul.f32 %v7557_v22, %v805_v24  ;;  %v813_v42 = vrot.slane %v783_v30, %v7533_v54 }
 0x379   :  { %876 = vrot.lane.b32.xlu0 %v859_v18, %s7168_s8  ;;  %v861_v25 = vmul.f32 %v7551_v16, %v801_v19  ;;  %v7592_v18 = vsub.s32 %v7449_v40, %v7523_v44 }
 0x37a   :  { %v7569_v38 = vpop.permute.xlu1 %846  ;;  %v863_v41 = vmul.f32 %v7565_v32, %v809_v26  ;;  %v817_v43 = vrot.slane %v785_v31, %v7533_v54 }
 0x37b   :  { %878 = vrot.lane.b32.xlu1 %v860_v23, %s7168_s8  ;;  %v864_v45 = vmul.f32 %v7569_v38, %v813_v42 }
 0x37c   :  { %v865_v47 = vmul.f32 %v7577_v46, %v817_v43 }
 0x37d   :  { %880 = vrot.lane.b32.xlu0 %v861_v25, %s7168_s8 }
 0x37f   :  { %882 = vrot.lane.b32.xlu1 %v862_v36, %s7168_s8 }
 0x381   :  { %884 = vrot.lane.b32.xlu0 %v863_v41, %s7168_s8 }
 0x383   :  { %886 = vrot.lane.b32.xlu1 %v864_v45, %s7168_s8 }
 0x385   :  { %888 = vrot.lane.b32.xlu0 %v865_v47, %s7168_s8 }
 0x3e9   :  { %v875_v49 = vpop.permute.xlu1 %874 }
 0x3ea   :  { %v898_v50 = vsel %vm328_vm0, %v875_v49, 0.0 }
 0x3eb   :  { %899 = vadd.xlane.f32.xlu1 %v898_v50  ;;  %v877_v55 = vpop.permute.xlu0 %876 }
 0x3ec   :  { %v901_v39 = vsel %vm328_vm0, %v877_v55, 0.0 }
 0x3ed   :  { %v879_v60 = vpop.permute.xlu1 %878  ;;  %902 = vadd.xlane.f32.xlu0 %v901_v39 }
 0x3ee   :  { %v904_v0 = vsel %vm328_vm0, %v879_v60, 0.0 }
 0x3ef   :  { %v881_v63 = vpop.permute.xlu0 %880 }
 0x3f0   :  { %v907_v2 = vsel %vm328_vm0, %v881_v63, 0.0 }
 0x3f1   :  { %v883_v3 = vpop.permute.xlu1 %882  ;;  %905 = vadd.xlane.f32.xlu0 %v904_v0  ;;  %908 = vadd.xlane.f32.xlu1 %v907_v2 }
 0x3f2   :  { %v910_v5 = vsel %vm328_vm0, %v883_v3, 0.0 }
 0x3f3   :  { %v885_v4 = vpop.permute.xlu0 %884 }
 0x3f4   :  { %v913_v7 = vsel %vm328_vm0, %v885_v4, 0.0  ;;  %v7611_v4 = vsub.s32 1, %v7523_v44 }
 0x3f5   :  { %v887_v8 = vpop.permute.xlu1 %886  ;;  %911 = vadd.xlane.f32.xlu0 %v910_v5  ;;  %914 = vadd.xlane.f32.xlu1 %v913_v7  ;;  %v7614_v5 = vsub.s32 2, %v7523_v44  ;;  %v7617_v7 = vsub.s32 4, %v7523_v44 }
 0x3f6   :  { %v916_v14 = vsel %vm328_vm0, %v887_v8, 0.0  ;;  %v7620_v8 = vsub.s32 6, %v7523_v44 }
 0x3f7   :  { %v889_v13 = vpop.permute.xlu0 %888 }
 0x3f8   :  { %v919_v15 = vsel %vm328_vm0, %v889_v13, 0.0  ;;  %8816 = vst [vmem:[#allocation34_spill] sm:$0xff] %v7620_v8  ;;  %v7623_v13 = vsub.s32 3, %v7523_v44 }
 0x3f9   :  { %917 = vadd.xlane.f32.xlu0 %v916_v14  ;;  %920 = vadd.xlane.f32.xlu1 %v919_v15 }
 0x478   :  { %v900_v19 = vpop.xlane.xlu1 %899 }
 0x479   :  { %v933_v24 = vrot.slane %v900_v19, %v7592_v18 }
 0x47a   :  { %v903_v20 = vpop.xlane.xlu0 %902 }
 0x47b   :  { %v937_v23 = vrot.slane %v903_v20, %v7592_v18 }
 0x47d   :  { %v963_v31 = vsel %vm962_vm9, %v937_v23, %v933_v24 }
 0x47e   :  { %v909_v25 = vpop.xlane.xlu1 %908  ;;  %v906_v26 = vpop.xlane.xlu0 %905 }
 0x47f   :  { %v941_v30 = vrot.slane %v906_v26, %v7592_v18  ;;  %v945_v36 = vrot.slane %v909_v25, %v7592_v18 }
 0x481   :  { %v965_v41 = vsel %vm964_vm10, %v941_v30, %v963_v31 }
 0x482   :  { %v915_v40 = vpop.xlane.xlu1 %914  ;;  %v912_v42 = vpop.xlane.xlu0 %911  ;;  %v967_v47 = vsel %vm966_vm11, %v945_v36, %v965_v41 }
 0x483   :  { %v949_v43 = vrot.slane %v912_v42, %v7592_v18  ;;  %v953_v45 = vrot.slane %v915_v40, %v7592_v18 }
 0x485   :  { %v969_v49 = vsel %vm968_vm12, %v949_v43, %v967_v47  ;;  %v7631_v43 = vsub.s32 5, %v7523_v44 }
 0x486   :  { %v921_v50 = vpop.xlane.xlu1 %920  ;;  %v918_v55 = vpop.xlane.xlu0 %917  ;;  %v971_v63 = vsel %vm970_vm13, %v953_v45, %v969_v49 }
 0x487   :  { %v961_v39 = vrot.slane %v921_v50, %v7592_v18  ;;  %v957_v60 = vrot.slane %v918_v55, %v7592_v18 }
 0x489   :  { %v973_v0 = vsel %vm972_vm14, %v957_v60, %v971_v63  ;;  %v7635_v63 = vsub.s32 7, %v7523_v44 }
 0x48a   :  { %v975_v2 = vsel %vm974_vm15, %v961_v39, %v973_v0 }
 0x48b   :  { %v978_v3 = vsel %vm977_vm2, %v975_v2, -inf }
 0x48c   :  { %979 = vmax.xlane.f32.xlu0 %v978_v3 }
 0x519   :  { %v980_v14 = vpop.xlane.xlu0 %979 }
 0x51a   :  { %v985_v15 = vrot.slane %v980_v14, %v7533_v54  ;;  %v989_v23 = vrot.slane %v980_v14, %v7611_v4  ;;  %v993_v24 = vrot.slane %v980_v14, %v7614_v5  ;;  %v1001_v30 = vrot.slane %v980_v14, %v7617_v7 }
 0x51b   :  { %v1009_v31 = vrot.slane %v980_v14, %v7620_v8  ;;  %v997_v45 = vrot.slane %v980_v14, %v7623_v13  ;;  %v1005_v3 = vrot.slane %v980_v14, %v7631_v43 }
 0x51c   :  { %v1023_v36 = vsub.f32 %v903_v20, %v989_v23  ;;  %v1022_v41 = vsub.f32 %v900_v19, %v985_v15  ;;  %v1026_v47 = vsub.f32 %v912_v42, %v1001_v30  ;;  %v1024_v49 = vsub.f32 %v906_v26, %v993_v24 }
 0x51d   :  { %v1028_v2 = vsub.f32 %v918_v55, %v1009_v31  ;;  %v1025_v19 = vsub.f32 %v909_v25, %v997_v45  ;;  %v1013_v23 = vrot.slane %v980_v14, %v7635_v63  ;;  %v1027_v26 = vsub.f32 %v915_v40, %v1005_v3  ;;  %v470_v45 = vld [vmem:[#allocation14] sm:$0xff] }
 0x51e   :  { %v1032_v39 = vmul.f32 1.442695, %v1023_v36  ;;  %v1030_v60 = vmul.f32 1.442695, %v1022_v41  ;;  %v1038_v0 = vmul.f32 1.442695, %v1026_v47 }
 0x51f   :  { %v1034_v20 = vmul.f32 1.442695, %v1024_v49  ;;  %v1042_v15 = vmul.f32 1.442695, %v1028_v2  ;;  %v1036_v42 = vmul.f32 1.442695, %v1025_v19  ;;  %v1029_v44 = vsub.f32 %v921_v50, %v1013_v23 }
 0x520   :  { %6614 = vpow2.f32 %v1032_v39  ;;  %v1040_v24 = vmul.f32 1.442695, %v1027_v26  ;;  %v471_v47 = vld [vmem:[#allocation14 + $0x8] sm:$0xff] }
 0x521   :  { %6616 = vpow2.f32 %v1030_v60  ;;  %v1044_v25 = vmul.f32 1.442695, %v1029_v44  ;;  %v7663_v49 = vpack.c.bf16 %v471_v47, %v470_v45 }
 0x522   :  { %6618 = vpow2.f32 %v1038_v0 }
 0x523   :  { %6620 = vpow2.f32 %v1034_v20  ;;  %6438 = vmatpush3.bf16.msra.mxu1 %v7663_v49 }
 0x524   :  { %6622 = vpow2.f32 %v1042_v15  ;;  %6439 = vmatprep.subr.bf16.mxu1 %v8793_v29 }
 0x525   :  { %6624 = vpow2.f32 %v1036_v42 }
 0x526   :  { %6626 = vpow2.f32 %v1040_v24 }
 0x527   :  { %6628 = vpow2.f32 %v1044_v25 }
 0x52a   :  { %v7639_v30 = vpop.eup %6614 }
 0x52b   :  { %v7641_v36 = vpop.eup %6616  ;;  %1058 = vperm.xlu0 %6606, %v7639_v30  }
 0x52c   :  { %1055 = vperm.xlu1 %6607, %v7641_v36   ;;  %v7645_v55 = vpop.eup %6618 }
 0x52d   :  { %v7647_v14 = vpop.eup %6620 }
 0x52e   :  { %v7651_v40 = vpop.eup %6622 }
 0x52f   :  { %1067 = vperm.xlu0 %6606, %v7645_v55   ;;  %v7653_v50 = vpop.eup %6624 }
 0x530   :  { %1061 = vperm.xlu1 %6607, %v7647_v14   ;;  %v7657_v31 = vpop.eup %6626 }
 0x531   :  { %v7660_v41 = vpop.eup %6628 }
 0x533   :  { %1073 = vperm.xlu0 %6606, %v7651_v40  }
 0x534   :  { %1064 = vperm.xlu1 %6607, %v7653_v50  }
 0x538   :  { %1070 = vperm.xlu1 %6607, %v7657_v31  }
 0x53c   :  { %1076 = vperm.xlu1 %6607, %v7660_v41  }
 0x5aa   :  { %v1059_v60 = vpop.permute.xlu0 %1058 }
 0x5ab   :  { %v1056_v39 = vpop.permute.xlu1 %1055  ;;  %v1085_v2 = vrot.slane %v1059_v60, %v7592_v18 }
 0x5ac   :  { %v1081_v3 = vrot.slane %v1056_v39, %v7592_v18 }
 0x5ae   :  { %v1068_v19 = vpop.permute.xlu0 %1067  ;;  %v1110_v23 = vsel %vm962_vm9, %v1085_v2, %v1081_v3 }
 0x5af   :  { %v1062_v0 = vpop.permute.xlu1 %1061  ;;  %v1097_v44 = vrot.slane %v1068_v19, %v7592_v18  ;;  %v472_v19 = vld [vmem:[#allocation14 + $0x10] sm:$0xff] }
 0x5b0   :  { %v1089_v20 = vrot.slane %v1062_v0, %v7592_v18 }
 0x5b2   :  { %v1111_v26 = vsel %vm964_vm10, %v1089_v20, %v1110_v23  ;;  %v1074_v45 = vpop.permute.xlu0 %1073  ;;  %v473_v23 = vld [vmem:[#allocation14 + $0x18] sm:$0xff] }
 0x5b3   :  { %v1065_v15 = vpop.permute.xlu1 %1064  ;;  %v1105_v0 = vrot.slane %v1074_v45, %v7592_v18  ;;  %v8817_v45 = vmov 0.0  }
 0x5b4   :  { %v1093_v42 = vrot.slane %v1065_v15, %v7592_v18 }
 0x5b6   :  { %v1112_v24 = vsel %vm966_vm11, %v1093_v42, %v1111_v26  ;;  %v7683_v42 = vpack.c.bf16 %v473_v23, %v472_v19 }
 0x5b7   :  { %v1071_v25 = vpop.permute.xlu1 %1070  ;;  %v1113_v39 = vsel %vm968_vm12, %v1097_v44, %v1112_v24 }
 0x5b8   :  { %v1101_v47 = vrot.slane %v1071_v25, %v7592_v18  ;;  %6441 = vmatpush3.bf16.msra.mxu1 %v7683_v42 }
 0x5b9   :  { %6442 = vmatprep.subr.bf16.mxu1 %v8793_v29 }
 0x5ba   :  { %v1114_v60 = vsel %vm970_vm13, %v1101_v47, %v1113_v39 }
 0x5bb   :  { %v1077_v37 = vpop.permute.xlu1 %1076  ;;  %v1115_v3 = vsel %vm972_vm14, %v1105_v0, %v1114_v60 }
 0x5bc   :  { %v1109_v2 = vrot.slane %v1077_v37, %v7592_v18 }
 0x5be   :  { %v1116_v20 = vsel %vm974_vm15, %v1109_v2, %v1115_v3 }
 0x5bf   :  { %v1118_v15 = vsel %vm977_vm2, %v1116_v20, 0.0 }
 0x5c0   :  { %1119 = vadd.xlane.f32.xlu0 %v1118_v15 }
 0x5d6   :  { %663 = vrot.lane.b32.xlu0 %v7528_v51, %s7168_s8 }
 0x64d   :  { %v1120_v26 = vpop.xlane.xlu0 %1119 }
 0x64e   :  { %v1125_v37 = vrot.slane %v1120_v26, %v7533_v54  ;;  %v1129_v24 = vrot.slane %v1120_v26, %v7611_v4  ;;  %v1133_v25 = vrot.slane %v1120_v26, %v7614_v5  ;;  %v1137_v47 = vrot.slane %v1120_v26, %v7623_v13 }
 0x64f   :  { %v1141_v60 = vrot.slane %v1120_v26, %v7617_v7  ;;  %v1145_v3 = vrot.slane %v1120_v26, %v7631_v43  ;;  %v1149_v19 = vrot.slane %v1120_v26, %v7620_v8 }
 0x650   :  { %6630 = vrcp.f32 %v1125_v37 }
 0x651   :  { %v7691_v44 = vpop.permute.xlu0 %663  ;;  %6632 = vrcp.f32 %v1129_v24  ;;  %v1153_v24 = vrot.slane %v1120_v26, %v7635_v63  ;;  %v466_v26 = vld [vmem:[#allocation13] sm:$0xff] }
 0x652   :  { %6167 = vmatmul.mubr.msk.f32.vlgmr.msra.gmra.mrb[6].mxu1 %vm328_vm0, %v7691_v44  ;;  %6634 = vrcp.f32 %v1133_v25 }
 0x653   :  { %6177 = vmatprep.mubr.msk.f32.mxu1 %vm7164_vm1, %v8817_v45  ;;  %6636 = vrcp.f32 %v1137_v47 }
 0x654   :  { %6638 = vrcp.f32 %v1141_v60 }
 0x655   :  { %6640 = vrcp.f32 %v1145_v3  ;;  %v468_v3 = vld [vmem:[#allocation13 + $0x10] sm:$0xff] }
 0x656   :  { %6642 = vrcp.f32 %v1149_v19 }
 0x657   :  { %6644 = vrcp.f32 %v1153_v24 }
 0x65a   :  { %v6631_v39 = vpop.eup %6630 }
 0x65b   :  { %v1163_v0 = vmul.f32 %v6631_v39, %v7641_v36  ;;  %v6633_v2 = vpop.eup %6632 }
 0x65c   :  { %v1165_v20 = vmul.f32 %v6633_v2, %v7639_v30  ;;  %v6635_v15 = vpop.eup %6634 }
 0x65d   :  { %1180 = vperm.xlu1 %6607, %v1163_v0   ;;  %v1167_v23 = vmul.f32 %v6635_v15, %v7647_v14  ;;  %v6637_v37 = vpop.eup %6636  ;;  %v469_v15 = vld [vmem:[#allocation13 + $0x18] sm:$0xff] }
 0x65e   :  { %v1169_v36 = vmul.f32 %v6637_v37, %v7653_v50  ;;  %v6639_v25 = vpop.eup %6638  ;;  %v467_v50 = vld [vmem:[#allocation13 + $0x8] sm:$0xff] }
 0x65f   :  { %v1171_v47 = vmul.f32 %v6639_v25, %v7645_v55  ;;  %v6641_v30 = vpop.eup %6640  ;;  %v7714_v55 = vpack.c.bf16 %v469_v15, %v468_v3 }
 0x660   :  { %v1173_v39 = vmul.f32 %v6641_v30, %v7657_v31  ;;  %v6643_v60 = vpop.eup %6642 }
 0x661   :  { %1185 = vperm.xlu1 %6607, %v1165_v20   ;;  %v1175_v14 = vmul.f32 %v6643_v60, %v7651_v40  ;;  %v6645_v0 = vpop.eup %6644  ;;  %v7711_v20 = vpack.c.bf16 %v467_v50, %v466_v26  ;;  %8819 = vst [vmem:[#allocation36_spill] sm:$0xff] %v7714_v55 }
 0x662   :  { %v1177_v2 = vmul.f32 %v6645_v0, %v7660_v41 }
 0x663   :  { %8818 = vst [vmem:[#allocation35_spill] sm:$0xff] %v7711_v20  ;;  %6444 = vmatpush3.bf16.msra.mxu1 %v7711_v20 }
 0x664   :  { %6445 = vmatprep.subr.bf16.mxu1 %v8793_v29 }
 0x665   :  { %1190 = vperm.xlu1 %6607, %v1167_v23  }
 0x667   :  { %6447 = vmatpush3.bf16.msra.mxu1 %v7714_v55 }
 0x668   :  { %6460 = vmatprep.subr.bf16.mxu1 %v8793_v29 }
 0x669   :  { %1195 = vperm.xlu1 %6607, %v1169_v36  }
 0x66d   :  { %1200 = vperm.xlu1 %6607, %v1171_v47  }
 0x671   :  { %1205 = vperm.xlu1 %6607, %v1173_v39  }
 0x675   :  { %1210 = vperm.xlu1 %6607, %v1175_v14  }
 0x679   :  { %1215 = vperm.xlu1 %6607, %v1177_v2  }
 0x6dc   :  { %v1181_v40 = vpop.permute.xlu1 %1180 }
 0x6dd   :  { %v1218_v19 = vmul.f32 %v1181_v40, %v7470_v52  ;;  %v1374_v29 = vrot.slane %v1181_v40, %v7592_v18 }
 0x6df   :  { %v1226_v36 = vsel %vm328_vm0, %v1218_v19, 0.0 }
 0x6e0   :  { %v1186_v31 = vpop.permute.xlu1 %1185  ;;  %v1227_v60 = vrot.slane %v1226_v36, 4 }
 0x6e1   :  { %v1219_v41 = vmul.f32 %v1186_v31, %v7477_v56 }
 0x6e3   :  { %v1233_v24 = vsel %vm328_vm0, %v1219_v41, 0.0 }
 0x6e4   :  { %v1191_v23 = vpop.permute.xlu1 %1190  ;;  %v1234_v39 = vrot.slane %v1233_v24, 4 }
 0x6e5   :  { %v1220_v37 = vmul.f32 %v1191_v23, %v7481_v58  ;;  %v1228_v58 = vadd.f32 %v1227_v60, %v1226_v36 }
 0x6e6   :  { %v1235_v26 = vadd.f32 %v1234_v39, %v1233_v24 }
 0x6e7   :  { %v1240_v25 = vsel %vm328_vm0, %v1220_v37, 0.0  ;;  %v1378_v37 = vrot.slane %v1186_v31, %v7592_v18  ;;  %v1229_v9 = vrot.slane %v1228_v58, 2 }
 0x6e8   :  { %v1196_v47 = vpop.permute.xlu1 %1195  ;;  %v1241_v14 = vrot.slane %v1240_v25, 4  ;;  %v1236_v11 = vrot.slane %v1235_v26, 2 }
 0x6e9   :  { %v1221_v30 = vmul.f32 %v1196_v47, %v7488_v61  ;;  %v1386_v24 = vrot.slane %v1196_v47, %v7592_v18  ;;  %v1403_v31 = vsel %vm962_vm9, %v1378_v37, %v1374_v29 }
 0x6ea   :  { %v1242_v50 = vadd.f32 %v1241_v14, %v1240_v25 }
 0x6eb   :  { %v1247_v0 = vsel %vm328_vm0, %v1221_v30, 0.0  ;;  %v1382_v30 = vrot.slane %v1191_v23, %v7592_v18  ;;  %v1237_v23 = vadd.f32 %v1236_v11, %v1235_v26 }
 0x6ec   :  { %v1248_v56 = vrot.slane %v1247_v0, 4  ;;  %v1201_v2 = vpop.permute.xlu1 %1200 }
 0x6ed   :  { %v1222_v52 = vmul.f32 %v1201_v2, %v7405_v21  ;;  %v1243_v21 = vrot.slane %v1242_v50, 2  ;;  %v1390_v39 = vrot.slane %v1201_v2, %v7592_v18 }
 0x6ee   :  { %v1249_v15 = vadd.f32 %v1248_v56, %v1247_v0  ;;  %v1404_v56 = vsel %vm964_vm10, %v1382_v30, %v1403_v31  ;;  %v1238_v30 = vrot.slane %v1237_v23, 1 }
 0x6ef   :  { %v1254_v3 = vsel %vm328_vm0, %v1222_v52, 0.0 }
 0x6f0   :  { %v1255_v41 = vrot.slane %v1254_v3, 4  ;;  %v1206_v19 = vpop.permute.xlu1 %1205  ;;  %v1250_v25 = vrot.slane %v1249_v15, 2 }
 0x6f1   :  { %v1223_v61 = vmul.f32 %v1206_v19, %v7417_v27  ;;  %v1394_v40 = vrot.slane %v1206_v19, %v7592_v18 }
 0x6f2   :  { %v1256_v12 = vadd.f32 %v1255_v41, %v1254_v3  ;;  %v1230_v3 = vadd.f32 %v1229_v9, %v1228_v58  ;;  %v1244_v41 = vadd.f32 %v1243_v21, %v1242_v50  ;;  %v1251_v10 = vadd.f32 %v1250_v25, %v1249_v15 }
 0x6f3   :  { %v1261_v36 = vsel %vm328_vm0, %v1223_v61, 0.0  ;;  %v1405_v61 = vsel %vm966_vm11, %v1386_v24, %v1404_v56 }
 0x6f4   :  { %v1262_v60 = vrot.slane %v1261_v36, 4  ;;  %v1211_v14 = vpop.permute.xlu1 %1210  ;;  %v1257_v27 = vrot.slane %v1256_v12, 2  ;;  %v1406_v29 = vsel %vm968_vm12, %v1390_v39, %v1405_v61  ;;  %v1245_v21 = vrot.slane %v1244_v41, 1 }
 0x6f5   :  { %v1224_v0 = vmul.f32 %v1211_v14, %v7422_v33  ;;  %v1398_v47 = vrot.slane %v1211_v14, %v7592_v18  ;;  %v1407_v33 = vsel %vm970_vm13, %v1394_v40, %v1406_v29  ;;  %v1252_v25 = vrot.slane %v1251_v10, 1 }
 0x6f6   :  { %v1263_v52 = vadd.f32 %v1262_v60, %v1261_v36  ;;  %v1258_v20 = vadd.f32 %v1257_v27, %v1256_v12  ;;  %v1231_v36 = vrot.slane %v1230_v3, 1  ;;  %v1246_v40 = vadd.f32 %v1245_v21, %v1244_v41 }
 0x6f7   :  { %v1268_v2 = vsel %vm328_vm0, %v1224_v0, 0.0  ;;  %v1408_v50 = vsel %vm972_vm14, %v1398_v47, %v1407_v33  ;;  %v1253_v0 = vadd.f32 %v1252_v25, %v1251_v10 }
 0x6f8   :  { %v1264_v37 = vrot.slane %v1263_v52, 2  ;;  %v1269_v55 = vrot.slane %v1268_v2, 4  ;;  %v1216_v19 = vpop.permute.xlu1 %1215  ;;  %v1259_v60 = vrot.slane %v1258_v20, 1 }
 0x6f9   :  { %v1225_v11 = vmul.f32 %v1216_v19, %v7427_v34  ;;  %v1402_v26 = vrot.slane %v1216_v19, %v7592_v18  ;;  %v1239_v34 = vadd.f32 %v1238_v30, %v1237_v23 }
 0x6fa   :  { %v1265_v9 = vadd.f32 %v1264_v37, %v1263_v52  ;;  %v1270_v58 = vadd.f32 %v1269_v55, %v1268_v2  ;;  %v1232_v55 = vadd.f32 %v1231_v36, %v1230_v3  ;;  %v1260_v47 = vadd.f32 %v1259_v60, %v1258_v20 }
 0x6fb   :  { %v1275_v15 = vsel %vm328_vm0, %v1225_v11, 0.0  ;;  %v1409_v24 = vsel %vm974_vm15, %v1402_v26, %v1408_v50  ;;  %v8820_v20 = vmov 0.0|0.0  }
 0x6fc   :  { %v1271_v39 = vrot.slane %v1270_v58, 2  ;;  %v1276_v12 = vrot.slane %v1275_v15, 4  ;;  %1411 = vst.msk [vmem:[#allocation17] sm:$0xff] %vm977_vm2, %v1409_v24  ;;  %v1266_v14 = vrot.slane %v1265_v9, 1  ;;  %v1290_v61 = vsel %vm962_vm9, %v1239_v34, %v1232_v55 }
 0x6fd   :  { %v1291_v37 = vsel %vm964_vm10, %v1246_v40, %v1290_v61 }
 0x6fe   :  { %v1272_v31 = vadd.f32 %v1271_v39, %v1270_v58  ;;  %v1277_v27 = vadd.f32 %v1276_v12, %v1275_v15  ;;  %v1267_v2 = vadd.f32 %v1266_v14, %v1265_v9  ;;  %v1292_v11 = vsel %vm966_vm11, %v1253_v0, %v1291_v37 }
 0x6ff   :  { %v1293_v23 = vsel %vm968_vm12, %v1260_v47, %v1292_v11 }
 0x700   :  { %v1273_v56 = vrot.slane %v1272_v31, 1  ;;  %v1278_v52 = vrot.slane %v1277_v27, 2  ;;  %v1294_v41 = vsel %vm970_vm13, %v1267_v2, %v1293_v23 }
 0x702   :  { %v1279_v29 = vadd.f32 %v1278_v52, %v1277_v27  ;;  %v1274_v19 = vadd.f32 %v1273_v56, %v1272_v31 }
 0x704   :  { %v1280_v33 = vrot.slane %v1279_v29, 1  ;;  %v1295_v10 = vsel %vm972_vm14, %v1274_v19, %v1294_v41 }
 0x706   :  { %v1281_v26 = vadd.f32 %v1280_v33, %v1279_v29 }
 0x708   :  { %v1296_v3 = vsel %vm974_vm15, %v1281_v26, %v1295_v10 }
 0x709   :  { %6178 = vmatmul.mubr.msk.f32.vlgmr.msra.gmra.mrb[6].mxu1 %vm328_vm0, %v1296_v3 }
 0x70a   :  { %6462 = vmatpush3.bf16.msra.mxu1 %v7663_v49  ;;  %6210 = vmatprep.mubr.msk.f32.mxu1 %vm7164_vm1, %v8817_v45 }
 0x70b   :  { %6463 = vmatprep.subr.bf16.mxu1 %v8820_v20 }
 0x70e   :  { %6465 = vmatpush3.bf16.msra.mxu1 %v7683_v42 }
 0x70f   :  { %6466 = vmatprep.subr.bf16.mxu1 %v8820_v20 }
 0x7dc   :  { %v1365_v30 = vpop.f32.mrb[6].mxu1 }
 0x7dd   :  { %6646 = vtanh.f32 %v1365_v30  ;;  %v6179_v9 = vpop.f32.mrb[7].mxu1 }
 0x7e7   :  { %v6647_v58 = vpop.eup %6646 }
 0x7e8   :  { %1370 = vst.msk [vmem:[#allocation16] sm:$0xff] %vm328_vm0, %v6647_v58  ;;  %6189 = vmatmul.mubr.msk.f32.vlgmr.msra.gmra.mrb[12].mxu0 %vm328_vm0, %v6647_v58 }
 0x7e9   :  { %6456 = vmatpush3.bf16.msra.mxu0 %v7479_v57  ;;  %6199 = vmatprep.mubr.msk.f32.mxu0 %vm7164_vm1, %v8817_v45 }
 0x7ea   :  { %6457 = vmatprep.subr.bf16.mxu0 %v8820_v20 }
 0x7ed   :  { %6459 = vmatpush3.bf16.msra.mxu0 %v7490_v62 }
 0x7ee   :  { %6472 = vmatprep.subr.bf16.mxu0 %v8820_v20 }
 0x7f0   :  { %6200 = vmatmul.mubr.msk.f32.vlgmr.msra.gmra.mrb[14].mxu0 %vm328_vm0, %v7691_v44 }
 0x7f1   :  { %6474 = vmatpush3.bf16.msra.mxu0 %v7419_v28  ;;  %6232 = vmatprep.mubr.msk.f32.mxu0 %vm7164_vm1, %v8817_v45 }
 0x7f2   :  { %6475 = vmatprep.subr.bf16.mxu0 %v8820_v20 }
 0x7f5   :  { %6477 = vmatpush3.bf16.msra.mxu0 %v7429_v35 }
 0x7f6   :  { %6478 = vmatprep.subr.bf16.mxu0 %v8820_v20 }
 0x8bb   :  { %v1481_v50 = vpop.f32.mrb[12].mxu0 }
 0x8bc   :  { %v1555_v21 = vadd.f32 %v7506_v6, %v1481_v50  ;;  %v6190_v15 = vpop.f32.mrb[13].mxu0 }
 0x8c3   :  { %v1551_v24 = vpop.f32.mrb[14].mxu0 }
 0x8c4   :  { %v1563_v36 = vadd.f32 %v1551_v24, %v7516_v17  ;;  %v6201_v25 = vpop.f32.mrb[15].mxu0  ;;  %v1556_v44 = vadd.f32 %v1555_v21, %v1551_v24 }
 0x8c6   :  { %1565 = vrot.lane.b32.xlu1 %v1563_v36, %s7166_s15  ;;  %v5922_v39 = vmul.f32 -1.442695, %v1556_v44 }
 0x8c8   :  { %6648 = vpow2.f32 %v5922_v39 }
 0x8d2   :  { %v6649_v12 = vpop.eup %6648 }
 0x8d3   :  { %v1560_v60 = vadd.f32 1.0, %v6649_v12 }
 0x8d5   :  { %6650 = vrcp.f32 %v1560_v60 }
 0x8df   :  { %v6651_v34 = vpop.eup %6650 }
 0x8e0   :  { %v1575_v55 = vsub.f32 1.0, %v6651_v34  ;;  %v1581_v56 = vmul.f32 %v6651_v34, %v7528_v51 }
 0x938   :  { %v1566_v14 = vpop.permute.xlu1 %1565 }
 0x939   :  { %v1568_v31 = vmul.f32 %v6651_v34, %v1566_v14 }
 0x93b   :  { %1570 = vrot.lane.b32.xlu1 %v1568_v31, %s7166_s15 }
 0x9ad   :  { %v1571_v27 = vpop.permute.xlu1 %1570 }
 0x9ae   :  { %v1573_v6 = vadd.f32 %v1571_v27, %v1555_v21 }
 0x9b0   :  { %6652 = vtanh.f32 %v1573_v6 }
 0x9ba   :  { %v6653_v40 = vpop.eup %6652 }
 0x9bb   :  { %1577 = vrot.lane.b32.xlu1 %v6653_v40, %s7168_s8 }
 0xa2d   :  { %v1578_v0 = vpop.permute.xlu1 %1577 }
 0xa2e   :  { %v1580_v52 = vmul.f32 %v1578_v0, %v1575_v55 }
 0xa30   :  { %v7787_v47 = vadd.f32 %v1581_v56, %v1580_v52 }
 0xa32   :  { %v1658_v61 = vcombine.high %v7787_v47, %v7787_v47  ;;  %v1665_v2 = vrot.slane %v7787_v47, %v7526_v48 }
 0xa34   :  { %v1681_v29 = vrot.slane %v1665_v2, %v7526_v48  ;;  %v1673_v37 = vcombine.high %v1665_v2, %v1665_v2  ;;  %v1672_v19 = vrot.slane %v1658_v61, %v7526_v48 }
 0xa36   :  { %v1710_v33 = vrot.slane %v1681_v29, %v7533_v54  ;;  %v1695_v11 = vrot.slane %v1673_v37, %v7526_v48  ;;  %v1674_v23 = vcombine.high %v1672_v19, %v1672_v19  ;;  %v1703_v51 = vcombine.high %v1681_v29, %v1681_v29 }
 0xa37   :  { %v1688_v58 = vrot.slane %v1672_v19, %v7526_v48 }
 0xa38   :  { %v1747_v26 = vmul.f32 %v1710_v33, %v7530_v53  ;;  %v1714_v41 = vrot.slane %v1695_v11, %v7533_v54  ;;  %v1705_v10 = vcombine.high %v1695_v11, %v1695_v11  ;;  %v1702_v3 = vrot.slane %v1674_v23, %v7526_v48 }
 0xa39   :  { %v1718_v9 = vrot.slane %v1703_v51, %v7533_v54  ;;  %v1726_v36 = vrot.slane %v1688_v58, %v7533_v54  ;;  %v1704_v12 = vcombine.high %v1688_v58, %v1688_v58 }
 0xa3a   :  { %1763 = vrot.lane.b32.xlu1 %v1747_v26, %s7168_s8  ;;  %v1722_v30 = vrot.slane %v1705_v10, %v7533_v54  ;;  %v1748_v50 = vmul.f32 %v1714_v41, %v7539_v59  ;;  %v1730_v15 = vrot.slane %v1702_v3, %v7533_v54  ;;  %v1706_v24 = vcombine.high %v1702_v3, %v1702_v3 }
 0xa3b   :  { %v1749_v25 = vmul.f32 %v1718_v9, %v7543_v1  ;;  %v1751_v60 = vmul.f32 %v1726_v36, %v7557_v22  ;;  %v1734_v14 = vrot.slane %v1704_v12, %v7533_v54 }
 0xa3c   :  { %v1750_v21 = vmul.f32 %v1722_v30, %v7551_v16  ;;  %v1752_v44 = vmul.f32 %v1730_v15, %v7565_v32  ;;  %v1738_v39 = vrot.slane %v1706_v24, %v7533_v54 }
 0xa3d   :  { %v1753_v31 = vmul.f32 %v1734_v14, %v7569_v38 }
 0xa3e   :  { %1765 = vrot.lane.b32.xlu1 %v1748_v50, %s7168_s8  ;;  %1769 = vrot.lane.b32.xlu0 %v1750_v21, %s7168_s8  ;;  %v1754_v34 = vmul.f32 %v1738_v39, %v7577_v46 }
 0xa42   :  { %1767 = vrot.lane.b32.xlu1 %v1749_v25, %s7168_s8  ;;  %1773 = vrot.lane.b32.xlu0 %v1752_v44, %s7168_s8 }
 0xa46   :  { %1771 = vrot.lane.b32.xlu1 %v1751_v60, %s7168_s8  ;;  %1777 = vrot.lane.b32.xlu0 %v1754_v34, %s7168_s8 }
 0xa4a   :  { %1775 = vrot.lane.b32.xlu1 %v1753_v31, %s7168_s8 }
 0xaac   :  { %v1764_v27 = vpop.permute.xlu1 %1763 }
 0xaad   :  { %v1787_v6 = vsel %vm328_vm0, %v1764_v27, 0.0 }
 0xaae   :  { %1788 = vadd.xlane.f32.xlu1 %v1787_v6 }
 0xab0   :  { %v1766_v40 = vpop.permute.xlu1 %1765  ;;  %v1770_v0 = vpop.permute.xlu0 %1769 }
 0xab1   :  { %v1790_v55 = vsel %vm328_vm0, %v1766_v40, 0.0  ;;  %v1796_v37 = vsel %vm328_vm0, %v1770_v0, 0.0 }
 0xab2   :  { %1791 = vadd.xlane.f32.xlu0 %v1790_v55 }
 0xab4   :  { %v1768_v56 = vpop.permute.xlu1 %1767  ;;  %v1774_v61 = vpop.permute.xlu0 %1773 }
 0xab5   :  { %v1793_v52 = vsel %vm328_vm0, %v1768_v56, 0.0  ;;  %v1802_v11 = vsel %vm328_vm0, %v1774_v61, 0.0 }
 0xab6   :  { %1794 = vadd.xlane.f32.xlu0 %v1793_v52 }
 0xab8   :  { %v1772_v2 = vpop.permute.xlu1 %1771  ;;  %v1778_v23 = vpop.permute.xlu0 %1777 }
 0xab9   :  { %v1799_v29 = vsel %vm328_vm0, %v1772_v2, 0.0  ;;  %v1808_v51 = vsel %vm328_vm0, %v1778_v23, 0.0 }
 0xaba   :  { %1800 = vadd.xlane.f32.xlu1 %v1799_v29  ;;  %1797 = vadd.xlane.f32.xlu0 %v1796_v37 }
 0xabc   :  { %v1776_v19 = vpop.permute.xlu1 %1775 }
 0xabd   :  { %v1805_v33 = vsel %vm328_vm0, %v1776_v19, 0.0 }
 0xabe   :  { %1806 = vadd.xlane.f32.xlu1 %v1805_v33  ;;  %1803 = vadd.xlane.f32.xlu0 %v1802_v11 }
 0xac2   :  { %1809 = vadd.xlane.f32.xlu0 %v1808_v51 }
 0xb3b   :  { %v1789_v41 = vpop.xlane.xlu1 %1788 }
 0xb3c   :  { %v1822_v9 = vrot.slane %v1789_v41, %v7592_v18 }
 0xb3f   :  { %v1792_v26 = vpop.xlane.xlu0 %1791 }
 0xb40   :  { %v1826_v3 = vrot.slane %v1792_v26, %v7592_v18 }
 0xb42   :  { %v1851_v21 = vsel %vm962_vm9, %v1826_v3, %v1822_v9 }
 0xb43   :  { %v1795_v10 = vpop.xlane.xlu0 %1794 }
 0xb44   :  { %v1830_v30 = vrot.slane %v1795_v10, %v7592_v18 }
 0xb46   :  { %v1852_v24 = vsel %vm964_vm10, %v1830_v30, %v1851_v21 }
 0xb47   :  { %v1801_v58 = vpop.xlane.xlu1 %1800  ;;  %v1798_v50 = vpop.xlane.xlu0 %1797 }
 0xb48   :  { %v1834_v15 = vrot.slane %v1798_v50, %v7592_v18  ;;  %v1838_v36 = vrot.slane %v1801_v58, %v7592_v18 }
 0xb4a   :  { %v1853_v25 = vsel %vm966_vm11, %v1834_v15, %v1852_v24 }
 0xb4b   :  { %v1807_v44 = vpop.xlane.xlu1 %1806  ;;  %v1804_v39 = vpop.xlane.xlu0 %1803  ;;  %v1854_v34 = vsel %vm968_vm12, %v1838_v36, %v1853_v25 }
 0xb4c   :  { %v1842_v12 = vrot.slane %v1804_v39, %v7592_v18  ;;  %v1846_v60 = vrot.slane %v1807_v44, %v7592_v18 }
 0xb4e   :  { %v1855_v14 = vsel %vm970_vm13, %v1842_v12, %v1854_v34 }
 0xb4f   :  { %v1810_v31 = vpop.xlane.xlu0 %1809  ;;  %v1856_v6 = vsel %vm972_vm14, %v1846_v60, %v1855_v14 }
 0xb50   :  { %v1850_v27 = vrot.slane %v1810_v31, %v7592_v18 }
 0xb52   :  { %v1857_v40 = vsel %vm974_vm15, %v1850_v27, %v1856_v6 }
 0xb53   :  { %v1859_v55 = vsel %vm977_vm2, %v1857_v40, -inf }
 0xb54   :  { %1860 = vmax.xlane.f32.xlu1 %v1859_v55 }
 0xbe1   :  { %v1861_v0 = vpop.xlane.xlu1 %1860 }
 0xbe2   :  { %v1866_v56 = vrot.slane %v1861_v0, %v7533_v54  ;;  %v1870_v52 = vrot.slane %v1861_v0, %v7611_v4  ;;  %v1874_v61 = vrot.slane %v1861_v0, %v7614_v5  ;;  %v1882_v2 = vrot.slane %v1861_v0, %v7617_v7 }
 0xbe3   :  { %v1878_v29 = vrot.slane %v1861_v0, %v7623_v13  ;;  %v1890_v11 = vrot.slane %v1861_v0, %v7620_v8  ;;  %v1886_v30 = vrot.slane %v1861_v0, %v7631_v43  ;;  %v1894_v36 = vrot.slane %v1861_v0, %v7635_v63 }
 0xbe4   :  { %v1904_v37 = vsub.f32 %v1792_v26, %v1870_v52  ;;  %v1903_v19 = vsub.f32 %v1789_v41, %v1866_v56  ;;  %v1905_v33 = vsub.f32 %v1795_v10, %v1874_v61  ;;  %v1907_v23 = vsub.f32 %v1801_v58, %v1882_v2 }
 0xbe5   :  { %v1906_v21 = vsub.f32 %v1798_v50, %v1878_v29  ;;  %v1909_v24 = vsub.f32 %v1807_v44, %v1890_v11  ;;  %v1908_v26 = vsub.f32 %v1804_v39, %v1886_v30  ;;  %v1910_v58 = vsub.f32 %v1810_v31, %v1894_v36 }
 0xbe6   :  { %v1913_v51 = vmul.f32 1.442695, %v1904_v37  ;;  %v1911_v3 = vmul.f32 1.442695, %v1903_v19  ;;  %v1915_v9 = vmul.f32 1.442695, %v1905_v33 }
 0xbe7   :  { %v1919_v15 = vmul.f32 1.442695, %v1907_v23  ;;  %v1917_v25 = vmul.f32 1.442695, %v1906_v21  ;;  %v1923_v41 = vmul.f32 1.442695, %v1909_v24 }
 0xbe8   :  { %6654 = vpow2.f32 %v1913_v51  ;;  %v1921_v10 = vmul.f32 1.442695, %v1908_v26  ;;  %v1925_v50 = vmul.f32 1.442695, %v1910_v58 }
 0xbe9   :  { %6656 = vpow2.f32 %v1911_v3 }
 0xbea   :  { %6658 = vpow2.f32 %v1915_v9 }
 0xbeb   :  { %6660 = vpow2.f32 %v1919_v15 }
 0xbec   :  { %6662 = vpow2.f32 %v1917_v25 }
 0xbed   :  { %6664 = vpow2.f32 %v1923_v41 }
 0xbee   :  { %6666 = vpow2.f32 %v1921_v10 }
 0xbef   :  { %6668 = vpow2.f32 %v1925_v50 }
 0xbf2   :  { %v7854_v12 = vpop.eup %6654 }
 0xbf3   :  { %v6657_v60 = vpop.eup %6656  ;;  %1939 = vperm.xlu1 %6607, %v7854_v12  }
 0xbf4   :  { %1936 = vperm.xlu0 %6606, %v6657_v60   ;;  %v7857_v44 = vpop.eup %6658 }
 0xbf5   :  { %v7859_v34 = vpop.eup %6660 }
 0xbf6   :  { %v7863_v39 = vpop.eup %6662 }
 0xbf7   :  { %1942 = vperm.xlu1 %6607, %v7857_v44   ;;  %v7865_v14 = vpop.eup %6664 }
 0xbf8   :  { %1948 = vperm.xlu0 %6606, %v7859_v34   ;;  %v7869_v31 = vpop.eup %6666 }
 0xbf9   :  { %v6669_v27 = vpop.eup %6668 }
 0xbfb   :  { %1945 = vperm.xlu1 %6607, %v7863_v39  }
 0xbfc   :  { %1954 = vperm.xlu0 %6606, %v7865_v14  }
 0xbff   :  { %1951 = vperm.xlu1 %6607, %v7869_v31  }
 0xc03   :  { %1957 = vperm.xlu1 %6607, %v6669_v27  }
 0xc72   :  { %v1940_v6 = vpop.permute.xlu1 %1939 }
 0xc73   :  { %v1937_v40 = vpop.permute.xlu0 %1936  ;;  %v1966_v0 = vrot.slane %v1940_v6, %v7592_v18 }
 0xc74   :  { %v1962_v56 = vrot.slane %v1937_v40, %v7592_v18 }
 0xc76   :  { %v1943_v55 = vpop.permute.xlu1 %1942  ;;  %v1991_v29 = vsel %vm962_vm9, %v1966_v0, %v1962_v56 }
 0xc77   :  { %v1970_v52 = vrot.slane %v1943_v55, %v7592_v18  ;;  %v1949_v61 = vpop.permute.xlu0 %1948 }
 0xc78   :  { %v1978_v11 = vrot.slane %v1949_v61, %v7592_v18 }
 0xc79   :  { %v1992_v19 = vsel %vm964_vm10, %v1970_v52, %v1991_v29 }
 0xc7a   :  { %v1946_v2 = vpop.permute.xlu1 %1945 }
 0xc7b   :  { %v1974_v37 = vrot.slane %v1946_v2, %v7592_v18  ;;  %v1955_v51 = vpop.permute.xlu0 %1954 }
 0xc7c   :  { %v1986_v21 = vrot.slane %v1955_v51, %v7592_v18 }
 0xc7d   :  { %v1993_v33 = vsel %vm966_vm11, %v1974_v37, %v1992_v19 }
 0xc7e   :  { %v1952_v23 = vpop.permute.xlu1 %1951  ;;  %v1994_v30 = vsel %vm968_vm12, %v1978_v11, %v1993_v33 }
 0xc7f   :  { %v1982_v3 = vrot.slane %v1952_v23, %v7592_v18 }
 0xc81   :  { %v1995_v9 = vsel %vm970_vm13, %v1982_v3, %v1994_v30 }
 0xc82   :  { %v1958_v15 = vpop.permute.xlu1 %1957  ;;  %v1996_v36 = vsel %vm972_vm14, %v1986_v21, %v1995_v9  ;;  %v7904_v21 = vld [vmem:[#allocation2] sm:$0xff] }
 0xc83   :  { %v1990_v24 = vrot.slane %v1958_v15, %v7592_v18  ;;  %8821 = vst [vmem:[#allocation37_spill] sm:$0xff] %v7904_v21 }
 0xc85   :  { %v1997_v25 = vsel %vm974_vm15, %v1990_v24, %v1996_v36  ;;  %v7907_v24 = vld [vmem:[#allocation2 + $0x8] sm:$0xff] }
 0xc86   :  { %v1999_v26 = vsel %vm977_vm2, %v1997_v25, 0.0 }
 0xc87   :  { %2000 = vadd.xlane.f32.xlu0 %v1999_v26  ;;  %v7914_v26 = vld [vmem:[#allocation2 + $0x10] sm:$0xff] }
 0xc88   :  { %8822 = vst [vmem:[#allocation38_spill] sm:$0xff] %v7914_v26 }
 0xd14   :  { %v2001_v41 = vpop.xlane.xlu0 %2000 }
 0xd15   :  { %v2034_v10 = vrot.slane %v2001_v41, %v7635_v63  ;;  %v2006_v58 = vrot.slane %v2001_v41, %v7533_v54  ;;  %v2010_v50 = vrot.slane %v2001_v41, %v7611_v4  ;;  %v2014_v6 = vrot.slane %v2001_v41, %v7614_v5 }
 0xd16   :  { %v2018_v40 = vrot.slane %v2001_v41, %v7623_v13  ;;  %v2022_v52 = vrot.slane %v2001_v41, %v7617_v7  ;;  %v2026_v29 = vrot.slane %v2001_v41, %v7631_v43  ;;  %v2030_v33 = vrot.slane %v2001_v41, %v7620_v8 }
 0xd17   :  { %6670 = vrcp.f32 %v2034_v10  ;;  %v7917_v10 = vld [vmem:[#allocation2 + $0x38] sm:$0xff] }
 0xd18   :  { %6672 = vrcp.f32 %v2006_v58  ;;  %8823 = vst [vmem:[#allocation39_spill] sm:$0xff] %v7917_v10 }
 0xd19   :  { %6674 = vrcp.f32 %v2010_v50 }
 0xd1a   :  { %6676 = vrcp.f32 %v2014_v6 }
 0xd1b   :  { %6678 = vrcp.f32 %v2018_v40 }
 0xd1c   :  { %6680 = vrcp.f32 %v2022_v52 }
 0xd1d   :  { %6682 = vrcp.f32 %v2026_v29 }
 0xd1e   :  { %6684 = vrcp.f32 %v2030_v33 }
 0xd21   :  { %v6671_v55 = vpop.eup %6670 }
 0xd22   :  { %v6673_v0 = vpop.eup %6672  ;;  %v2058_v56 = vmul.f32 %v6671_v55, %v6669_v27 }
 0xd23   :  { %v2044_v61 = vmul.f32 %v6673_v0, %v6657_v60  ;;  %v6675_v2 = vpop.eup %6674 }
 0xd24   :  { %2096 = vperm.xlu0 %6606, %v2058_v56   ;;  %v2046_v37 = vmul.f32 %v6675_v2, %v7854_v12  ;;  %v6677_v19 = vpop.eup %6676  ;;  %v7922_v56 = vld [vmem:[#allocation2 + $0x18] sm:$0xff] }
 0xd25   :  { %2061 = vperm.xlu1 %6607, %v2044_v61   ;;  %v2048_v11 = vmul.f32 %v6677_v19, %v7857_v44  ;;  %v6679_v27 = vpop.eup %6678  ;;  %8824 = vst [vmem:[#allocation40_spill] sm:$0xff] %v7922_v56 }
 0xd26   :  { %v2050_v60 = vmul.f32 %v6679_v27, %v7863_v39  ;;  %v6681_v23 = vpop.eup %6680  ;;  %v7927_v27 = vld [vmem:[#allocation2 + $0x20] sm:$0xff] }
 0xd27   :  { %v2052_v51 = vmul.f32 %v6681_v23, %v7859_v34  ;;  %v6683_v3 = vpop.eup %6682  ;;  %8825 = vst [vmem:[#allocation41_spill] sm:$0xff] %v7927_v27 }
 0xd28   :  { %v2054_v12 = vmul.f32 %v6683_v3, %v7869_v31  ;;  %v6685_v30 = vpop.eup %6684 }
 0xd29   :  { %2066 = vperm.xlu1 %6607, %v2046_v37   ;;  %v2056_v9 = vmul.f32 %v6685_v30, %v7865_v14 }
 0xd2d   :  { %2071 = vperm.xlu1 %6607, %v2048_v11  }
 0xd31   :  { %2076 = vperm.xlu1 %6607, %v2050_v60  }
 0xd35   :  { %2081 = vperm.xlu1 %6607, %v2052_v51  }
 0xd39   :  { %2086 = vperm.xlu1 %6607, %v2054_v12  }
 0xd3d   :  { %2091 = vperm.xlu1 %6607, %v2056_v9  }
 0xd41   :  { %1584 = vrot.lane.b32.xlu1 %v7787_v47, %s7168_s8 }
 0xda3   :  { %v7910_v36 = vpop.permute.xlu0 %2096 }
 0xda4   :  { %v2062_v44 = vpop.permute.xlu1 %2061  ;;  %v2106_v58 = vmul.f32 %v7917_v10, %v7910_v36 }
 0xda5   :  { %v2099_v39 = vmul.f32 %v7904_v21, %v2062_v44 }
 0xda6   :  { %v2156_v61 = vsel %vm328_vm0, %v2106_v58, 0.0 }
 0xda7   :  { %v2107_v31 = vsel %vm328_vm0, %v2099_v39, 0.0  ;;  %v2157_v23 = vrot.slane %v2156_v61, 4 }
 0xda8   :  { %v2067_v15 = vpop.permute.xlu1 %2066  ;;  %v2108_v50 = vrot.slane %v2107_v31, 4 }
 0xda9   :  { %v2100_v34 = vmul.f32 %v7907_v24, %v2067_v15  ;;  %v2260_v51 = vrot.slane %v2067_v15, %v7592_v18 }
 0xdaa   :  { %v2109_v2 = vadd.f32 %v2108_v50, %v2107_v31 }
 0xdab   :  { %v2114_v14 = vsel %vm328_vm0, %v2100_v34, 0.0  ;;  %v2256_v34 = vrot.slane %v2062_v44, %v7592_v18 }
 0xdac   :  { %v2072_v25 = vpop.permute.xlu1 %2071  ;;  %v2115_v6 = vrot.slane %v2114_v14, 4  ;;  %v2110_v12 = vrot.slane %v2109_v2, 2 }
 0xdad   :  { %v2101_v41 = vmul.f32 %v7914_v26, %v2072_v25  ;;  %v2264_v9 = vrot.slane %v2072_v25, %v7592_v18 }
 0xdae   :  { %v2116_v29 = vadd.f32 %v2115_v6, %v2114_v14 }
 0xdaf   :  { %v2121_v40 = vsel %vm328_vm0, %v2101_v41, 0.0 }
 0xdb0   :  { %v2122_v55 = vrot.slane %v2121_v40, 4  ;;  %v2077_v0 = vpop.permute.xlu1 %2076  ;;  %v2117_v30 = vrot.slane %v2116_v29, 2 }
 0xdb1   :  { %v2102_v52 = vmul.f32 %v7922_v56, %v2077_v0  ;;  %v2268_v14 = vrot.slane %v2077_v0, %v7592_v18 }
 0xdb2   :  { %v2123_v19 = vadd.f32 %v2122_v55, %v2121_v40  ;;  %v7936_v40 = vld [vmem:[#allocation2 + $0x28] sm:$0xff]  ;;  %v2158_v55 = vadd.f32 %v2157_v23, %v2156_v61  ;;  %v2118_v44 = vadd.f32 %v2117_v30, %v2116_v29  ;;  %v7945_v23 = vld [vmem:[#allocation2 + $0x30] sm:$0xff]  ;;  %v2284_v29 = vrot.slane %v7910_v36, %v7592_v18 }
 0xdb3   :  { %v2128_v37 = vsel %vm328_vm0, %v2102_v52, 0.0  ;;  %v2285_v52 = vsel %vm962_vm9, %v2260_v51, %v2256_v34 }
 0xdb4   :  { %v2129_v33 = vrot.slane %v2128_v37, 4  ;;  %v2082_v11 = vpop.permute.xlu1 %2081  ;;  %v2124_v31 = vrot.slane %v2123_v19, 2 }
 0xdb5   :  { %v2103_v60 = vmul.f32 %v7927_v27, %v2082_v11  ;;  %v2272_v6 = vrot.slane %v2082_v11, %v7592_v18 }
 0xdb6   :  { %v2130_v3 = vadd.f32 %v2129_v33, %v2128_v37  ;;  %v2111_v33 = vadd.f32 %v2110_v12, %v2109_v2  ;;  %v2125_v10 = vadd.f32 %v2124_v31, %v2123_v19 }
 0xdb7   :  { %v2135_v39 = vsel %vm328_vm0, %v2103_v60, 0.0  ;;  %v2286_v60 = vsel %vm964_vm10, %v2264_v9, %v2285_v52  ;;  %v2159_v9 = vrot.slane %v2158_v55, 2 }
 0xdb8   :  { %v2136_v41 = vrot.slane %v2135_v39, 4  ;;  %v2087_v58 = vpop.permute.xlu1 %2086  ;;  %v2131_v50 = vrot.slane %v2130_v3, 2  ;;  %v2287_v27 = vsel %vm966_vm11, %v2268_v14, %v2286_v60 }
 0xdb9   :  { %v2104_v15 = vmul.f32 %v7936_v40, %v2087_v58  ;;  %v2276_v37 = vrot.slane %v2087_v58, %v7592_v18  ;;  %v2288_v61 = vsel %vm968_vm12, %v2272_v6, %v2287_v27  ;;  %v2126_v27 = vrot.slane %v2125_v10, 1 }
 0xdba   :  { %v2137_v25 = vadd.f32 %v2136_v41, %v2135_v39  ;;  %v2132_v21 = vadd.f32 %v2131_v50, %v2130_v3  ;;  %v2119_v39 = vrot.slane %v2118_v44, 1  ;;  %v2160_v52 = vadd.f32 %v2159_v9, %v2158_v55 }
 0xdbb   :  { %v2142_v0 = vsel %vm328_vm0, %v2104_v15, 0.0  ;;  %v2289_v19 = vsel %vm970_vm13, %v2276_v37, %v2288_v61  ;;  %v8826_v15 = vld [vmem:[#allocation35_spill] sm:$0xff]  ;;  %v2127_v37 = vadd.f32 %v2126_v27, %v2125_v10 }
 0xdbc   :  { %v2138_v11 = vrot.slane %v2137_v25, 2  ;;  %v2143_v56 = vrot.slane %v2142_v0, 4  ;;  %v2092_v26 = vpop.permute.xlu1 %2091  ;;  %v2133_v50 = vrot.slane %v2132_v21, 1 }
 0xdbd   :  { %v2105_v51 = vmul.f32 %v7945_v23, %v2092_v26  ;;  %v2280_v2 = vrot.slane %v2092_v26, %v7592_v18  ;;  %v2112_v26 = vrot.slane %v2111_v33, 1 }
 0xdbe   :  { %v2139_v12 = vadd.f32 %v2138_v11, %v2137_v25  ;;  %v2144_v30 = vadd.f32 %v2143_v56, %v2142_v0  ;;  %v2120_v25 = vadd.f32 %v2119_v39, %v2118_v44  ;;  %v2134_v61 = vadd.f32 %v2133_v50, %v2132_v21 }
 0xdbf   :  { %v2149_v34 = vsel %vm328_vm0, %v2105_v51, 0.0  ;;  %v2290_v3 = vsel %vm972_vm14, %v2280_v2, %v2289_v19  ;;  %v2113_v11 = vadd.f32 %v2112_v26, %v2111_v33  ;;  %v8828_v26 = vld [vmem:[#allocation31_spill] sm:$0xff] }
 0xdc0   :  { %v2145_v31 = vrot.slane %v2144_v30, 2  ;;  %v2150_v14 = vrot.slane %v2149_v34, 4  ;;  %v2291_v41 = vsel %vm974_vm15, %v2284_v29, %v2290_v3  ;;  %v1585_v58 = vpop.permute.xlu1 %1584  ;;  %v2140_v36 = vrot.slane %v2139_v12, 1  ;;  %v8827_v29 = vld [vmem:[#allocation36_spill] sm:$0xff] }
 0xdc1   :  { %2294 = vst.msk [vmem:[#allocation17 + $0x8] sm:$0xff] %vm977_vm2, %v2291_v41  ;;  %6211 = vmatmul.mubr.msk.f32.vlgmr.msra.gmra.mrb[8].mxu1 %vm328_vm0, %v1585_v58  ;;  %v2171_v19 = vsel %vm962_vm9, %v2120_v25, %v2113_v11 }
 0xdc2   :  { %v2146_v56 = vadd.f32 %v2145_v31, %v2144_v30  ;;  %v2151_v6 = vadd.f32 %v2150_v14, %v2149_v34  ;;  %6468 = vmatpush3.bf16.msra.mxu1 %v8826_v15  ;;  %6221 = vmatprep.mubr.msk.f32.mxu1 %vm7164_vm1, %v8817_v45  ;;  %v2141_v51 = vadd.f32 %v2140_v36, %v2139_v12  ;;  %v2161_v30 = vrot.slane %v2160_v52, 1 }
 0xdc3   :  { %6469 = vmatprep.subr.bf16.mxu1 %v8820_v20  ;;  %v2172_v55 = vsel %vm964_vm10, %v2127_v37, %v2171_v19 }
 0xdc4   :  { %v2147_v60 = vrot.slane %v2146_v56, 1  ;;  %v2152_v0 = vrot.slane %v2151_v6, 2  ;;  %v2173_v9 = vsel %vm966_vm11, %v2134_v61, %v2172_v55  ;;  %v2162_v33 = vadd.f32 %v2161_v30, %v2160_v52 }
 0xdc5   :  { %v2174_v39 = vsel %vm968_vm12, %v2141_v51, %v2173_v9 }
 0xdc6   :  { %v2153_v2 = vadd.f32 %v2152_v0, %v2151_v6  ;;  %6471 = vmatpush3.bf16.msra.mxu1 %v8827_v29  ;;  %v2148_v34 = vadd.f32 %v2147_v60, %v2146_v56 }
 0xdc7   :  { %6484 = vmatprep.subr.bf16.mxu1 %v8820_v20 }
 0xdc8   :  { %v2154_v44 = vrot.slane %v2153_v2, 1  ;;  %v2175_v21 = vsel %vm970_vm13, %v2148_v34, %v2174_v39 }
 0xdca   :  { %v2155_v10 = vadd.f32 %v2154_v44, %v2153_v2 }
 0xdcc   :  { %v2176_v12 = vsel %vm972_vm14, %v2155_v10, %v2175_v21 }
 0xdcd   :  { %v2177_v3 = vsel %vm974_vm15, %v2162_v33, %v2176_v12 }
 0xdce   :  { %6222 = vmatmul.mubr.msk.f32.vlgmr.msra.gmra.mrb[8].mxu1 %vm328_vm0, %v2177_v3 }
 0xdcf   :  { %6486 = vmatpush3.bf16.msra.mxu1 %v7663_v49  ;;  %6254 = vmatprep.mubr.msk.f32.mxu1 %vm7164_vm1, %v8817_v45 }
 0xdd0   :  { %6487 = vmatprep.subr.bf16.mxu1 %v8820_v20 }
 0xdd3   :  { %6489 = vmatpush3.bf16.msra.mxu1 %v7683_v42 }
 0xdd4   :  { %6490 = vmatprep.subr.bf16.mxu1 %v8820_v20 }
 0xea1   :  { %v2246_v27 = vpop.f32.mrb[8].mxu1 }
 0xea2   :  { %6686 = vtanh.f32 %v2246_v27  ;;  %v6223_v31 = vpop.f32.mrb[9].mxu1 }
 0xeac   :  { %v6687_v14 = vpop.eup %6686 }
 0xead   :  { %2252 = vst.msk [vmem:[#allocation16 + $0x8] sm:$0xff] %vm328_vm0, %v6687_v14  ;;  %6233 = vmatmul.mubr.msk.f32.vlgmr.msra.gmra.mrb[16].mxu0 %vm328_vm0, %v6687_v14 }
 0xeae   :  { %6480 = vmatpush3.bf16.msra.mxu0 %v7479_v57  ;;  %6243 = vmatprep.mubr.msk.f32.mxu0 %vm7164_vm1, %v8817_v45 }
 0xeaf   :  { %6481 = vmatprep.subr.bf16.mxu0 %v8820_v20 }
 0xeb2   :  { %6483 = vmatpush3.bf16.msra.mxu0 %v7490_v62 }
 0xeb3   :  { %6496 = vmatprep.subr.bf16.mxu0 %v8820_v20 }
 0xeb5   :  { %6244 = vmatmul.mubr.msk.f32.vlgmr.msra.gmra.mrb[18].mxu0 %vm328_vm0, %v1585_v58 }
 0xeb6   :  { %6498 = vmatpush3.bf16.msra.mxu0 %v7419_v28  ;;  %6276 = vmatprep.mubr.msk.f32.mxu0 %vm7164_vm1, %v8817_v45 }
 0xeb7   :  { %6499 = vmatprep.subr.bf16.mxu0 %v8820_v20 }
 0xeba   :  { %6501 = vmatpush3.bf16.msra.mxu0 %v7429_v35 }
 0xebb   :  { %6502 = vmatprep.subr.bf16.mxu0 %v8820_v20 }
 0xf80   :  { %v2364_v41 = vpop.f32.mrb[16].mxu0 }
 0xf81   :  { %v2438_v50 = vadd.f32 %v2364_v41, %v8828_v26  ;;  %v6234_v36 = vpop.f32.mrb[17].mxu0 }
 0xf88   :  { %v2434_v56 = vpop.f32.mrb[18].mxu0 }
 0xf89   :  { %v2446_v6 = vadd.f32 %v2434_v56, %v7516_v17  ;;  %v6245_v52 = vpop.f32.mrb[19].mxu0  ;;  %v2439_v58 = vadd.f32 %v2438_v50, %v2434_v56 }
 0xf8b   :  { %2448 = vrot.lane.b32.xlu1 %v2446_v6, %s7166_s15  ;;  %v5927_v25 = vmul.f32 -1.442695, %v2439_v58 }
 0xf8d   :  { %6688 = vpow2.f32 %v5927_v25 }
 0xf97   :  { %v6689_v37 = vpop.eup %6688 }
 0xf98   :  { %v2443_v60 = vadd.f32 1.0, %v6689_v37 }
 0xf9a   :  { %6690 = vrcp.f32 %v2443_v60 }
 0xfa4   :  { %v6691_v0 = vpop.eup %6690 }
 0xfa5   :  { %v2458_v19 = vsub.f32 1.0, %v6691_v0  ;;  %v2464_v55 = vmul.f32 %v6691_v0, %v7787_v47 }
 0xffd   :  { %v2449_v11 = vpop.permute.xlu1 %2448 }
 0xffe   :  { %v2451_v61 = vmul.f32 %v6691_v0, %v2449_v11 }
0x1000   :  { %2453 = vrot.lane.b32.xlu1 %v2451_v61, %s7166_s15 }
0x1072   :  { %v2454_v51 = vpop.permute.xlu1 %2453 }
0x1073   :  { %v2456_v2 = vadd.f32 %v2454_v51, %v2438_v50 }
0x1075   :  { %6692 = vtanh.f32 %v2456_v2 }
0x107f   :  { %v6693_v30 = vpop.eup %6692 }
0x1080   :  { %2460 = vrot.lane.b32.xlu1 %v6693_v30, %s7168_s8 }
0x10f2   :  { %v2461_v34 = vpop.permute.xlu1 %2460 }
0x10f3   :  { %v2463_v44 = vmul.f32 %v2461_v34, %v2458_v19 }
0x10f5   :  { %v7998_v9 = vadd.f32 %v2464_v55, %v2463_v44 }
0x10f7   :  { %v2541_v10 = vcombine.high %v7998_v9, %v7998_v9  ;;  %v2548_v39 = vrot.slane %v7998_v9, %v7526_v48 }
0x10f9   :  { %v2564_v33 = vrot.slane %v2548_v39, %v7526_v48  ;;  %v2556_v21 = vcombine.high %v2548_v39, %v2548_v39  ;;  %v2555_v12 = vrot.slane %v2541_v10, %v7526_v48 }
0x10fb   :  { %v2593_v3 = vrot.slane %v2564_v33, %v7533_v54  ;;  %v2586_v27 = vcombine.high %v2564_v33, %v2564_v33  ;;  %v2578_v31 = vrot.slane %v2556_v21, %v7526_v48  ;;  %v2571_v47 = vrot.slane %v2555_v12, %v7526_v48 }
0x10fc   :  { %v2557_v50 = vcombine.high %v2555_v12, %v2555_v12 }
0x10fd   :  { %v2630_v14 = vmul.f32 %v2593_v3, %v7530_v53  ;;  %v2601_v41 = vrot.slane %v2586_v27, %v7533_v54  ;;  %v2597_v26 = vrot.slane %v2578_v31, %v7533_v54  ;;  %v2588_v36 = vcombine.high %v2578_v31, %v2578_v31 }
0x10fe   :  { %v2609_v6 = vrot.slane %v2571_v47, %v7533_v54  ;;  %v2587_v52 = vcombine.high %v2571_v47, %v2571_v47  ;;  %v2585_v37 = vrot.slane %v2557_v50, %v7526_v48 }
0x10ff   :  { %2646 = vrot.lane.b32.xlu1 %v2630_v14, %s7168_s8  ;;  %v2632_v56 = vmul.f32 %v2601_v41, %v7543_v1  ;;  %v2631_v58 = vmul.f32 %v2597_v26, %v7539_v59  ;;  %v2605_v25 = vrot.slane %v2588_v36, %v7533_v54 }
0x1100   :  { %v2634_v60 = vmul.f32 %v2609_v6, %v7557_v22  ;;  %v2617_v0 = vrot.slane %v2587_v52, %v7533_v54  ;;  %v2613_v61 = vrot.slane %v2585_v37, %v7533_v54  ;;  %v2589_v51 = vcombine.high %v2585_v37, %v2585_v37 }
0x1101   :  { %2650 = vrot.lane.b32.xlu0 %v2632_v56, %s7168_s8  ;;  %v2633_v11 = vmul.f32 %v2605_v25, %v7551_v16 }
0x1102   :  { %v2636_v2 = vmul.f32 %v2617_v0, %v7569_v38  ;;  %v2635_v30 = vmul.f32 %v2613_v61, %v7565_v32  ;;  %v2621_v19 = vrot.slane %v2589_v51, %v7533_v54 }
0x1103   :  { %2648 = vrot.lane.b32.xlu1 %v2631_v58, %s7168_s8 }
0x1104   :  { %v2637_v34 = vmul.f32 %v2621_v19, %v7577_v46 }
0x1105   :  { %2654 = vrot.lane.b32.xlu0 %v2634_v60, %s7168_s8 }
0x1107   :  { %2652 = vrot.lane.b32.xlu1 %v2633_v11, %s7168_s8 }
0x1109   :  { %2658 = vrot.lane.b32.xlu0 %v2636_v2, %s7168_s8 }
0x110b   :  { %2656 = vrot.lane.b32.xlu1 %v2635_v30, %s7168_s8 }
0x110f   :  { %2660 = vrot.lane.b32.xlu1 %v2637_v34, %s7168_s8 }
0x1171   :  { %v2647_v55 = vpop.permute.xlu1 %2646 }
0x1172   :  { %v2670_v44 = vsel %vm328_vm0, %v2647_v55, 0.0 }
0x1173   :  { %v2651_v10 = vpop.permute.xlu0 %2650  ;;  %2671 = vadd.xlane.f32.xlu0 %v2670_v44 }
0x1174   :  { %v2676_v33 = vsel %vm328_vm0, %v2651_v10, 0.0 }
0x1175   :  { %v2649_v39 = vpop.permute.xlu1 %2648 }
0x1176   :  { %v2673_v21 = vsel %vm328_vm0, %v2649_v39, 0.0 }
0x1177   :  { %v2655_v12 = vpop.permute.xlu0 %2654  ;;  %2677 = vadd.xlane.f32.xlu0 %v2676_v33  ;;  %2674 = vadd.xlane.f32.xlu1 %v2673_v21 }
0x1178   :  { %v2682_v31 = vsel %vm328_vm0, %v2655_v12, 0.0 }
0x1179   :  { %v2653_v3 = vpop.permute.xlu1 %2652 }
0x117a   :  { %v2679_v27 = vsel %vm328_vm0, %v2653_v3, 0.0 }
0x117b   :  { %2680 = vadd.xlane.f32.xlu0 %v2679_v27  ;;  %v2659_v47 = vpop.permute.xlu0 %2658  ;;  %2683 = vadd.xlane.f32.xlu1 %v2682_v31 }
0x117c   :  { %v2688_v26 = vsel %vm328_vm0, %v2659_v47, 0.0 }
0x117d   :  { %v2657_v14 = vpop.permute.xlu1 %2656 }
0x117e   :  { %v2685_v41 = vsel %vm328_vm0, %v2657_v14, 0.0 }
0x117f   :  { %2686 = vadd.xlane.f32.xlu0 %v2685_v41  ;;  %2689 = vadd.xlane.f32.xlu1 %v2688_v26 }
0x1181   :  { %v2661_v50 = vpop.permute.xlu1 %2660 }
0x1182   :  { %v2691_v36 = vsel %vm328_vm0, %v2661_v50, 0.0 }
0x1183   :  { %2692 = vadd.xlane.f32.xlu0 %v2691_v36 }
0x1200   :  { %v2672_v56 = vpop.xlane.xlu0 %2671 }
0x1201   :  { %v2705_v58 = vrot.slane %v2672_v56, %v7592_v18 }
0x1204   :  { %v2678_v6 = vpop.xlane.xlu0 %2677  ;;  %v2675_v52 = vpop.xlane.xlu1 %2674 }
0x1205   :  { %v2709_v25 = vrot.slane %v2675_v52, %v7592_v18  ;;  %v2713_v37 = vrot.slane %v2678_v6, %v7592_v18 }
0x1207   :  { %v2734_v60 = vsel %vm962_vm9, %v2709_v25, %v2705_v58 }
0x1208   :  { %v2681_v0 = vpop.xlane.xlu0 %2680  ;;  %v2684_v11 = vpop.xlane.xlu1 %2683  ;;  %v2735_v51 = vsel %vm964_vm10, %v2713_v37, %v2734_v60 }
0x1209   :  { %v2717_v61 = vrot.slane %v2681_v0, %v7592_v18  ;;  %v2721_v2 = vrot.slane %v2684_v11, %v7592_v18 }
0x120b   :  { %v2736_v30 = vsel %vm966_vm11, %v2717_v61, %v2735_v51 }
0x120c   :  { %v2687_v19 = vpop.xlane.xlu0 %2686  ;;  %v2690_v34 = vpop.xlane.xlu1 %2689  ;;  %v2737_v44 = vsel %vm968_vm12, %v2721_v2, %v2736_v30 }
0x120d   :  { %v2725_v55 = vrot.slane %v2687_v19, %v7592_v18  ;;  %v2729_v10 = vrot.slane %v2690_v34, %v7592_v18 }
0x120f   :  { %v2738_v39 = vsel %vm970_vm13, %v2725_v55, %v2737_v44 }
0x1210   :  { %v2693_v33 = vpop.xlane.xlu0 %2692  ;;  %v2739_v12 = vsel %vm972_vm14, %v2729_v10, %v2738_v39 }
0x1211   :  { %v2733_v21 = vrot.slane %v2693_v33, %v7592_v18 }
0x1213   :  { %v2740_v3 = vsel %vm974_vm15, %v2733_v21, %v2739_v12 }
0x1214   :  { %v2742_v27 = vsel %vm977_vm2, %v2740_v3, -inf }
0x1215   :  { %2743 = vmax.xlane.f32.xlu1 %v2742_v27 }
0x12a2   :  { %v2744_v31 = vpop.xlane.xlu1 %2743 }
0x12a3   :  { %v2749_v47 = vrot.slane %v2744_v31, %v7533_v54  ;;  %v2753_v14 = vrot.slane %v2744_v31, %v7611_v4  ;;  %v2757_v41 = vrot.slane %v2744_v31, %v7614_v5  ;;  %v2765_v26 = vrot.slane %v2744_v31, %v7617_v7 }
0x12a4   :  { %v2761_v50 = vrot.slane %v2744_v31, %v7623_v13  ;;  %v2773_v60 = vrot.slane %v2744_v31, %v7620_v8  ;;  %v2769_v2 = vrot.slane %v2744_v31, %v7631_v43  ;;  %v2777_v39 = vrot.slane %v2744_v31, %v7635_v63 }
0x12a5   :  { %v2787_v36 = vsub.f32 %v2675_v52, %v2753_v14  ;;  %v2788_v58 = vsub.f32 %v2678_v6, %v2757_v41  ;;  %v2786_v25 = vsub.f32 %v2672_v56, %v2749_v47  ;;  %v2790_v61 = vsub.f32 %v2684_v11, %v2765_v26 }
0x12a6   :  { %v2789_v55 = vsub.f32 %v2681_v0, %v2761_v50  ;;  %v2792_v44 = vsub.f32 %v2690_v34, %v2773_v60  ;;  %v2791_v52 = vsub.f32 %v2687_v19, %v2769_v2  ;;  %v2793_v12 = vsub.f32 %v2693_v33, %v2777_v39 }
0x12a7   :  { %v2796_v37 = vmul.f32 1.442695, %v2787_v36  ;;  %v2798_v51 = vmul.f32 1.442695, %v2788_v58  ;;  %v2794_v30 = vmul.f32 1.442695, %v2786_v25 }
0x12a8   :  { %v2802_v10 = vmul.f32 1.442695, %v2790_v61  ;;  %v2800_v21 = vmul.f32 1.442695, %v2789_v55  ;;  %v2806_v56 = vmul.f32 1.442695, %v2792_v44 }
0x12a9   :  { %6694 = vpow2.f32 %v2796_v37  ;;  %v2804_v6 = vmul.f32 1.442695, %v2791_v52  ;;  %v2808_v3 = vmul.f32 1.442695, %v2793_v12 }
0x12aa   :  { %6696 = vpow2.f32 %v2798_v51 }
0x12ab   :  { %6698 = vpow2.f32 %v2794_v30 }
0x12ac   :  { %6700 = vpow2.f32 %v2802_v10 }
0x12ad   :  { %6702 = vpow2.f32 %v2800_v21 }
0x12ae   :  { %6704 = vpow2.f32 %v2806_v56 }
0x12af   :  { %6706 = vpow2.f32 %v2804_v6 }
0x12b0   :  { %6708 = vpow2.f32 %v2808_v3 }
0x12b3   :  { %v6695_v11 = vpop.eup %6694 }
0x12b4   :  { %2822 = vperm.xlu1 %6607, %v6695_v11   ;;  %v6697_v27 = vpop.eup %6696 }
0x12b5   :  { %v6699_v0 = vpop.eup %6698 }
0x12b6   :  { %2819 = vperm.xlu0 %6606, %v6699_v0   ;;  %v8065_v34 = vpop.eup %6700 }
0x12b7   :  { %v6703_v31 = vpop.eup %6702 }
0x12b8   :  { %2825 = vperm.xlu1 %6607, %v6697_v27   ;;  %v8068_v19 = vpop.eup %6704 }
0x12b9   :  { %v8070_v47 = vpop.eup %6706 }
0x12ba   :  { %2828 = vperm.xlu0 %6606, %v6703_v31   ;;  %v8074_v33 = vpop.eup %6708 }
0x12bc   :  { %2831 = vperm.xlu1 %6607, %v8065_v34  }
0x12be   :  { %2834 = vperm.xlu0 %6606, %v8070_v47  }
0x12c0   :  { %2837 = vperm.xlu1 %6607, %v8068_v19  }
0x12c2   :  { %2840 = vperm.xlu0 %6606, %v8074_v33  }
0x1333   :  { %v2823_v14 = vpop.permute.xlu1 %2822 }
0x1334   :  { %v2849_v41 = vrot.slane %v2823_v14, %v7592_v18 }
0x1335   :  { %v2820_v26 = vpop.permute.xlu0 %2819 }
0x1336   :  { %v2845_v36 = vrot.slane %v2820_v26, %v7592_v18 }
0x1337   :  { %v2826_v50 = vpop.permute.xlu1 %2825 }
0x1338   :  { %v2853_v58 = vrot.slane %v2826_v50, %v7592_v18  ;;  %v2874_v25 = vsel %vm962_vm9, %v2849_v41, %v2845_v36 }
0x1339   :  { %v2829_v60 = vpop.permute.xlu0 %2828 }
0x133a   :  { %v2875_v37 = vsel %vm964_vm10, %v2853_v58, %v2874_v25  ;;  %v2857_v51 = vrot.slane %v2829_v60, %v7592_v18 }
0x133b   :  { %v2832_v61 = vpop.permute.xlu1 %2831 }
0x133c   :  { %v2861_v2 = vrot.slane %v2832_v61, %v7592_v18  ;;  %v2876_v30 = vsel %vm966_vm11, %v2857_v51, %v2875_v37 }
0x133d   :  { %v2835_v44 = vpop.permute.xlu0 %2834 }
0x133e   :  { %v2877_v55 = vsel %vm968_vm12, %v2861_v2, %v2876_v30  ;;  %v2865_v39 = vrot.slane %v2835_v44, %v7592_v18 }
0x133f   :  { %v2838_v10 = vpop.permute.xlu1 %2837 }
0x1340   :  { %v2869_v21 = vrot.slane %v2838_v10, %v7592_v18  ;;  %v2878_v52 = vsel %vm970_vm13, %v2865_v39, %v2877_v55 }
0x1341   :  { %v2841_v56 = vpop.permute.xlu0 %2840 }
0x1342   :  { %v2879_v6 = vsel %vm972_vm14, %v2869_v21, %v2878_v52  ;;  %v2873_v12 = vrot.slane %v2841_v56, %v7592_v18 }
0x1344   :  { %v2880_v3 = vsel %vm974_vm15, %v2873_v12, %v2879_v6 }
0x1345   :  { %v2882_v14 = vsel %vm977_vm2, %v2880_v3, 0.0 }
0x1346   :  { %2883 = vadd.xlane.f32.xlu1 %v2882_v14 }
0x13d3   :  { %v2884_v41 = vpop.xlane.xlu1 %2883 }
0x13d4   :  { %v2889_v26 = vrot.slane %v2884_v41, %v7533_v54  ;;  %v2893_v50 = vrot.slane %v2884_v41, %v7611_v4  ;;  %v2897_v36 = vrot.slane %v2884_v41, %v7614_v5  ;;  %v2901_v58 = vrot.slane %v2884_v41, %v7623_v13 }
0x13d5   :  { %v2905_v37 = vrot.slane %v2884_v41, %v7617_v7  ;;  %v2909_v51 = vrot.slane %v2884_v41, %v7631_v43  ;;  %v2913_v55 = vrot.slane %v2884_v41, %v7620_v8  ;;  %v2917_v39 = vrot.slane %v2884_v41, %v7635_v63  ;;  %v8829_v41 = vld [vmem:[#allocation37_spill] sm:$0xff] }
0x13d6   :  { %6710 = vrcp.f32 %v2889_v26 }
0x13d7   :  { %6712 = vrcp.f32 %v2893_v50 }
0x13d8   :  { %6714 = vrcp.f32 %v2897_v36 }
0x13d9   :  { %6716 = vrcp.f32 %v2901_v58 }
0x13da   :  { %6718 = vrcp.f32 %v2905_v37  ;;  %v8831_v37 = vld [vmem:[#allocation40_spill] sm:$0xff] }
0x13db   :  { %6720 = vrcp.f32 %v2909_v51 }
0x13dc   :  { %6722 = vrcp.f32 %v2913_v55 }
0x13dd   :  { %6724 = vrcp.f32 %v2917_v39 }
0x13e0   :  { %v6711_v25 = vpop.eup %6710 }
0x13e1   :  { %v2927_v60 = vmul.f32 %v6711_v25, %v6699_v0  ;;  %v6713_v61 = vpop.eup %6712 }
0x13e2   :  { %v2929_v2 = vmul.f32 %v6713_v61, %v6695_v11  ;;  %v6715_v30 = vpop.eup %6714 }
0x13e3   :  { %2944 = vperm.xlu0 %6606, %v2927_v60   ;;  %v2931_v44 = vmul.f32 %v6715_v30, %v6697_v27  ;;  %v6717_v10 = vpop.eup %6716 }
0x13e4   :  { %v2933_v21 = vmul.f32 %v6717_v10, %v6703_v31  ;;  %v6719_v52 = vpop.eup %6718 }
0x13e5   :  { %v2935_v0 = vmul.f32 %v6719_v52, %v8065_v34  ;;  %v6721_v56 = vpop.eup %6720 }
0x13e6   :  { %v2937_v11 = vmul.f32 %v6721_v56, %v8070_v47  ;;  %v6723_v6 = vpop.eup %6722  ;;  %v8830_v47 = vld [vmem:[#allocation38_spill] sm:$0xff] }
0x13e7   :  { %2949 = vperm.xlu0 %6606, %v2929_v2   ;;  %v2939_v12 = vmul.f32 %v6723_v6, %v8068_v19  ;;  %v6725_v27 = vpop.eup %6724 }
0x13e8   :  { %v2941_v3 = vmul.f32 %v6725_v27, %v8074_v33 }
0x13eb   :  { %2954 = vperm.xlu0 %6606, %v2931_v44   ;;  %v8832_v44 = vld [vmem:[#allocation41_spill] sm:$0xff] }
0x13ef   :  { %2959 = vperm.xlu0 %6606, %v2933_v21  }
0x13f3   :  { %2964 = vperm.xlu0 %6606, %v2935_v0  }
0x13f7   :  { %2969 = vperm.xlu0 %6606, %v2937_v11  }
0x13fb   :  { %2974 = vperm.xlu0 %6606, %v2939_v12  }
0x13ff   :  { %2979 = vperm.xlu0 %6606, %v2941_v3  }
0x1403   :  { %2467 = vrot.lane.b32.xlu0 %v7998_v9, %s7168_s8 }
0x1462   :  { %v2945_v31 = vpop.permute.xlu0 %2944 }
0x1463   :  { %v2982_v26 = vmul.f32 %v8829_v41, %v2945_v31  ;;  %v3139_v3 = vrot.slane %v2945_v31, %v7592_v18 }
0x1465   :  { %v2990_v19 = vsel %vm328_vm0, %v2982_v26, 0.0 }
0x1466   :  { %v2950_v14 = vpop.permute.xlu0 %2949  ;;  %v2991_v51 = vrot.slane %v2990_v19, 4 }
0x1467   :  { %v2983_v34 = vmul.f32 %v7907_v24, %v2950_v14  ;;  %v3143_v12 = vrot.slane %v2950_v14, %v7592_v18 }
0x1468   :  { %v2992_v21 = vadd.f32 %v2991_v51, %v2990_v19 }
0x1469   :  { %v2997_v58 = vsel %vm328_vm0, %v2983_v34, 0.0  ;;  %v3168_v14 = vsel %vm962_vm9, %v3143_v12, %v3139_v3 }
0x146a   :  { %v2955_v50 = vpop.permute.xlu0 %2954  ;;  %v2998_v61 = vrot.slane %v2997_v58, 4 }
0x146b   :  { %v2984_v36 = vmul.f32 %v8830_v47, %v2955_v50  ;;  %v3147_v41 = vrot.slane %v2955_v50, %v7592_v18  ;;  %v2993_v47 = vrot.slane %v2992_v21, 2 }
0x146c   :  { %v2999_v39 = vadd.f32 %v2998_v61, %v2997_v58 }
0x146d   :  { %v3004_v25 = vsel %vm328_vm0, %v2984_v36, 0.0 }
0x146e   :  { %v2960_v33 = vpop.permute.xlu0 %2959  ;;  %v3005_v2 = vrot.slane %v3004_v25, 4  ;;  %v3000_v34 = vrot.slane %v2999_v39, 2 }
0x146f   :  { %v2985_v60 = vmul.f32 %v8831_v37, %v2960_v33  ;;  %v3151_v58 = vrot.slane %v2960_v33, %v7592_v18 }
0x1470   :  { %v3006_v52 = vadd.f32 %v3005_v2, %v3004_v25  ;;  %v3001_v50 = vadd.f32 %v3000_v34, %v2999_v39  ;;  %v3169_v2 = vsel %vm964_vm10, %v3147_v41, %v3168_v14  ;;  %v8833_v39 = vld [vmem:[#allocation39_spill] sm:$0xff] }
0x1471   :  { %v3011_v30 = vsel %vm328_vm0, %v2985_v60, 0.0 }
0x1472   :  { %v3012_v24 = vrot.slane %v3011_v30, 4  ;;  %v2965_v55 = vpop.permute.xlu0 %2964  ;;  %v3007_v36 = vrot.slane %v3006_v52, 2 }
0x1473   :  { %v2986_v10 = vmul.f32 %v8832_v44, %v2965_v55  ;;  %v3155_v37 = vrot.slane %v2965_v55, %v7592_v18 }
0x1474   :  { %v3013_v56 = vadd.f32 %v3012_v24, %v3011_v30  ;;  %v2994_v24 = vadd.f32 %v2993_v47, %v2992_v21  ;;  %v3008_v44 = vadd.f32 %v3007_v36, %v3006_v52 }
0x1475   :  { %v3018_v0 = vsel %vm328_vm0, %v2986_v10, 0.0  ;;  %v3170_v10 = vsel %vm966_vm11, %v3151_v58, %v3169_v2 }
0x1476   :  { %v3019_v11 = vrot.slane %v3018_v0, 4  ;;  %v2970_v6 = vpop.permute.xlu0 %2969  ;;  %v3014_v25 = vrot.slane %v3013_v56, 2  ;;  %v3009_v36 = vrot.slane %v3008_v44, 1 }
0x1477   :  { %v2987_v27 = vmul.f32 %v7936_v40, %v2970_v6  ;;  %v3159_v31 = vrot.slane %v2970_v6, %v7592_v18 }
0x1478   :  { %v3020_v26 = vadd.f32 %v3019_v11, %v3018_v0  ;;  %v3015_v0 = vadd.f32 %v3014_v25, %v3013_v56  ;;  %v3171_v11 = vsel %vm968_vm12, %v3155_v37, %v3170_v10  ;;  %v2995_v25 = vrot.slane %v2994_v24, 1 }
0x1479   :  { %v3025_v19 = vsel %vm328_vm0, %v2987_v27, 0.0 }
0x147a   :  { %v3026_v60 = vrot.slane %v3025_v19, 4  ;;  %v2975_v61 = vpop.permute.xlu0 %2974  ;;  %v3021_v40 = vrot.slane %v3020_v26, 2  ;;  %v3016_v37 = vrot.slane %v3015_v0, 1 }
0x147b   :  { %v2988_v51 = vmul.f32 %v7945_v23, %v2975_v61  ;;  %v3163_v33 = vrot.slane %v2975_v61, %v7592_v18  ;;  %v3172_v23 = vsel %vm970_vm13, %v3159_v31, %v3171_v11 }
0x147c   :  { %v3027_v30 = vadd.f32 %v3026_v60, %v3025_v19  ;;  %v3022_v3 = vadd.f32 %v3021_v40, %v3020_v26  ;;  %v3002_v19 = vrot.slane %v3001_v50, 1  ;;  %v3017_v10 = vadd.f32 %v3016_v37, %v3015_v0 }
0x147d   :  { %v3032_v55 = vsel %vm328_vm0, %v2988_v51, 0.0  ;;  %v3173_v47 = vsel %vm972_vm14, %v3163_v33, %v3172_v23  ;;  %v2996_v33 = vadd.f32 %v2995_v25, %v2994_v24 }
0x147e   :  { %v3028_v12 = vrot.slane %v3027_v30, 2  ;;  %v3033_v27 = vrot.slane %v3032_v55, 4  ;;  %v2980_v6 = vpop.permute.xlu0 %2979  ;;  %v3023_v14 = vrot.slane %v3022_v3, 1  ;;  %v3003_v40 = vadd.f32 %v3002_v19, %v3001_v50 }
0x147f   :  { %v2989_v34 = vmul.f32 %v8833_v39, %v2980_v6  ;;  %v3167_v41 = vrot.slane %v2980_v6, %v7592_v18 }
0x1480   :  { %v3029_v21 = vadd.f32 %v3028_v12, %v3027_v30  ;;  %v3034_v52 = vadd.f32 %v3033_v27, %v3032_v55  ;;  %v3010_v30 = vadd.f32 %v3009_v36, %v3008_v44  ;;  %v3024_v12 = vadd.f32 %v3023_v14, %v3022_v3 }
0x1481   :  { %v3039_v56 = vsel %vm328_vm0, %v2989_v34, 0.0  ;;  %v3174_v58 = vsel %vm974_vm15, %v3167_v41, %v3173_v47  ;;  %v3054_v27 = vsel %vm962_vm9, %v3003_v40, %v2996_v33 }
0x1482   :  { %v3035_v60 = vrot.slane %v3034_v52, 2  ;;  %v3040_v26 = vrot.slane %v3039_v56, 4  ;;  %3177 = vst.msk [vmem:[#allocation17 + $0x10] sm:$0xff] %vm977_vm2, %v3174_v58  ;;  %v2468_v61 = vpop.permute.xlu0 %2467  ;;  %v3030_v31 = vrot.slane %v3029_v21, 1  ;;  %v3055_v23 = vsel %vm964_vm10, %v3010_v30, %v3054_v27 }
0x1483   :  { %6255 = vmatmul.mubr.msk.f32.vlgmr.msra.gmra.mrb[10].mxu1 %vm328_vm0, %v2468_v61  ;;  %v3056_v44 = vsel %vm966_vm11, %v3017_v10, %v3055_v23 }
0x1484   :  { %v3036_v51 = vadd.f32 %v3035_v60, %v3034_v52  ;;  %v3041_v2 = vadd.f32 %v3040_v26, %v3039_v56  ;;  %6492 = vmatpush3.bf16.msra.mxu1 %v8826_v15  ;;  %6265 = vmatprep.mubr.msk.f32.mxu1 %vm7164_vm1, %v8817_v45  ;;  %v3031_v6 = vadd.f32 %v3030_v31, %v3029_v21  ;;  %v8834_v56 = vld [vmem:[#allocation30_spill] sm:$0xff] }
0x1485   :  { %6493 = vmatprep.subr.bf16.mxu1 %v8820_v20  ;;  %v3057_v24 = vsel %vm968_vm12, %v3024_v12, %v3056_v44 }
0x1486   :  { %v3037_v55 = vrot.slane %v3036_v51, 1  ;;  %v3042_v11 = vrot.slane %v3041_v2, 2  ;;  %v3058_v41 = vsel %vm970_vm13, %v3031_v6, %v3057_v24 }
0x1488   :  { %v3043_v50 = vadd.f32 %v3042_v11, %v3041_v2  ;;  %6495 = vmatpush3.bf16.msra.mxu1 %v8827_v29  ;;  %v3038_v39 = vadd.f32 %v3037_v55, %v3036_v51 }
0x1489   :  { %6508 = vmatprep.subr.bf16.mxu1 %v8820_v20 }
0x148a   :  { %v3044_v34 = vrot.slane %v3043_v50, 1  ;;  %v3059_v3 = vsel %vm972_vm14, %v3038_v39, %v3058_v41 }
0x148c   :  { %v3045_v0 = vadd.f32 %v3044_v34, %v3043_v50 }
0x148e   :  { %v3060_v19 = vsel %vm974_vm15, %v3045_v0, %v3059_v3 }
0x148f   :  { %6266 = vmatmul.mubr.msk.f32.vlgmr.msra.gmra.mrb[10].mxu1 %vm328_vm0, %v3060_v19 }
0x1490   :  { %6510 = vmatpush3.bf16.msra.mxu1 %v7663_v49  ;;  %6298 = vmatprep.mubr.msk.f32.mxu1 %vm7164_vm1, %v8817_v45 }
0x1491   :  { %6511 = vmatprep.subr.bf16.mxu1 %v8820_v20 }
0x1494   :  { %6513 = vmatpush3.bf16.msra.mxu1 %v7683_v42 }
0x1495   :  { %6514 = vmatprep.subr.bf16.mxu1 %v8820_v20 }
0x1562   :  { %v3129_v21 = vpop.f32.mrb[10].mxu1 }
0x1563   :  { %6726 = vtanh.f32 %v3129_v21  ;;  %v6267_v52 = vpop.f32.mrb[11].mxu1 }
0x156d   :  { %v6727_v47 = vpop.eup %6726 }
0x156e   :  { %3135 = vst.msk [vmem:[#allocation16 + $0x10] sm:$0xff] %vm328_vm0, %v6727_v47  ;;  %6277 = vmatmul.mubr.msk.f32.vlgmr.msra.gmra.mrb[20].mxu0 %vm328_vm0, %v6727_v47 }
0x156f   :  { %6504 = vmatpush3.bf16.msra.mxu0 %v7479_v57  ;;  %6287 = vmatprep.mubr.msk.f32.mxu0 %vm7164_vm1, %v8817_v45 }
0x1570   :  { %6505 = vmatprep.subr.bf16.mxu0 %v8820_v20 }
0x1573   :  { %6507 = vmatpush3.bf16.msra.mxu0 %v7490_v62 }
0x1574   :  { %6520 = vmatprep.subr.bf16.mxu0 %v8820_v20 }
0x1576   :  { %6288 = vmatmul.mubr.msk.f32.vlgmr.msra.gmra.mrb[22].mxu0 %vm328_vm0, %v2468_v61 }
0x1577   :  { %6522 = vmatpush3.bf16.msra.mxu0 %v7419_v28  ;;  %6320 = vmatprep.mubr.msk.f32.mxu0 %vm7164_vm1, %v8817_v45 }
0x1578   :  { %6523 = vmatprep.subr.bf16.mxu0 %v8820_v20 }
0x157b   :  { %6525 = vmatpush3.bf16.msra.mxu0 %v7429_v35 }
0x157c   :  { %6526 = vmatprep.subr.bf16.mxu0 %v8820_v20 }
0x1641   :  { %v3247_v36 = vpop.f32.mrb[20].mxu0 }
0x1642   :  { %v3321_v58 = vadd.f32 %v8834_v56, %v3247_v36  ;;  %v6278_v25 = vpop.f32.mrb[21].mxu0 }
0x1649   :  { %v3317_v37 = vpop.f32.mrb[22].mxu0 }
0x164a   :  { %v3329_v60 = vadd.f32 %v3317_v37, %v7516_v17  ;;  %v6289_v26 = vpop.f32.mrb[23].mxu0  ;;  %v3322_v61 = vadd.f32 %v3321_v58, %v3317_v37 }
0x164c   :  { %3331 = vrot.lane.b32.xlu1 %v3329_v60, %s7166_s15  ;;  %v5932_v14 = vmul.f32 -1.442695, %v3322_v61 }
0x164e   :  { %6728 = vpow2.f32 %v5932_v14 }
0x1658   :  { %v6729_v40 = vpop.eup %6728 }
0x1659   :  { %v3326_v31 = vadd.f32 1.0, %v6729_v40 }
0x165b   :  { %6730 = vrcp.f32 %v3326_v31 }
0x1665   :  { %v6731_v51 = vpop.eup %6730 }
0x1666   :  { %v3341_v11 = vsub.f32 1.0, %v6731_v51  ;;  %v3347_v27 = vmul.f32 %v6731_v51, %v7998_v9 }
0x16be   :  { %v3332_v2 = vpop.permute.xlu1 %3331 }
0x16bf   :  { %v3334_v30 = vmul.f32 %v6731_v51, %v3332_v2 }
0x16c1   :  { %3336 = vrot.lane.b32.xlu0 %v3334_v30, %s7166_s15 }
0x1733   :  { %v3337_v33 = vpop.permute.xlu0 %3336 }
0x1734   :  { %v3339_v10 = vadd.f32 %v3337_v33, %v3321_v58 }
0x1736   :  { %6732 = vtanh.f32 %v3339_v10 }
0x1740   :  { %v6733_v55 = vpop.eup %6732 }
0x1741   :  { %3343 = vrot.lane.b32.xlu0 %v6733_v55, %s7168_s8 }
0x17b3   :  { %v3344_v12 = vpop.permute.xlu0 %3343 }
0x17b4   :  { %v3346_v6 = vmul.f32 %v3344_v12, %v3341_v11 }
0x17b6   :  { %v8181_v50 = vadd.f32 %v3347_v27, %v3346_v6 }
0x17b8   :  { %v3424_v23 = vcombine.high %v8181_v50, %v8181_v50  ;;  %v3431_v39 = vrot.slane %v8181_v50, %v7526_v48 }
0x17ba   :  { %v3447_v34 = vrot.slane %v3431_v39, %v7526_v48  ;;  %v3439_v44 = vcombine.high %v3431_v39, %v3431_v39  ;;  %v3438_v24 = vrot.slane %v3424_v23, %v7526_v48 }
0x17bc   :  { %v3476_v0 = vrot.slane %v3447_v34, %v7533_v54  ;;  %v3469_v41 = vcombine.high %v3447_v34, %v3447_v34  ;;  %v3461_v3 = vrot.slane %v3439_v44, %v7526_v48  ;;  %v3454_v9 = vrot.slane %v3438_v24, %v7526_v48 }
0x17bd   :  { %v3440_v47 = vcombine.high %v3438_v24, %v3438_v24 }
0x17be   :  { %v3513_v19 = vmul.f32 %v3476_v0, %v7530_v53  ;;  %v3484_v21 = vrot.slane %v3469_v41, %v7533_v54  ;;  %v3480_v52 = vrot.slane %v3461_v3, %v7533_v54  ;;  %v3471_v36 = vcombine.high %v3461_v3, %v3461_v3 }
0x17bf   :  { %v3492_v58 = vrot.slane %v3454_v9, %v7533_v54  ;;  %v3470_v25 = vcombine.high %v3454_v9, %v3454_v9  ;;  %v3468_v26 = vrot.slane %v3440_v47, %v7526_v48 }
0x17c0   :  { %3529 = vrot.lane.b32.xlu0 %v3513_v19, %s7168_s8  ;;  %v3515_v56 = vmul.f32 %v3484_v21, %v7543_v1  ;;  %v3514_v37 = vmul.f32 %v3480_v52, %v7539_v59  ;;  %v3488_v60 = vrot.slane %v3471_v36, %v7533_v54 }
0x17c1   :  { %v3517_v61 = vmul.f32 %v3492_v58, %v7557_v22  ;;  %v3500_v14 = vrot.slane %v3470_v25, %v7533_v54  ;;  %v3496_v31 = vrot.slane %v3468_v26, %v7533_v54  ;;  %v3472_v51 = vcombine.high %v3468_v26, %v3468_v26 }
0x17c2   :  { %3533 = vrot.lane.b32.xlu1 %v3515_v56, %s7168_s8  ;;  %v3516_v40 = vmul.f32 %v3488_v60, %v7551_v16 }
0x17c3   :  { %v3519_v2 = vmul.f32 %v3500_v14, %v7569_v38  ;;  %v3518_v30 = vmul.f32 %v3496_v31, %v7565_v32  ;;  %v3504_v33 = vrot.slane %v3472_v51, %v7533_v54 }
0x17c4   :  { %3531 = vrot.lane.b32.xlu0 %v3514_v37, %s7168_s8 }
0x17c5   :  { %v3520_v10 = vmul.f32 %v3504_v33, %v7577_v46 }
0x17c6   :  { %3537 = vrot.lane.b32.xlu1 %v3517_v61, %s7168_s8 }
0x17c8   :  { %3535 = vrot.lane.b32.xlu0 %v3516_v40, %s7168_s8 }
0x17ca   :  { %3541 = vrot.lane.b32.xlu1 %v3519_v2, %s7168_s8 }
0x17cc   :  { %3539 = vrot.lane.b32.xlu0 %v3518_v30, %s7168_s8 }
0x17d0   :  { %3543 = vrot.lane.b32.xlu0 %v3520_v10, %s7168_s8 }
0x1832   :  { %v3530_v55 = vpop.permute.xlu0 %3529 }
0x1833   :  { %v3553_v11 = vsel %vm328_vm0, %v3530_v55, 0.0 }
0x1834   :  { %v3534_v12 = vpop.permute.xlu1 %3533  ;;  %3554 = vadd.xlane.f32.xlu1 %v3553_v11 }
0x1835   :  { %v3559_v44 = vsel %vm328_vm0, %v3534_v12, 0.0 }
0x1836   :  { %v3532_v27 = vpop.permute.xlu0 %3531 }
0x1837   :  { %v3556_v6 = vsel %vm328_vm0, %v3532_v27, 0.0 }
0x1838   :  { %v3538_v23 = vpop.permute.xlu1 %3537  ;;  %3557 = vadd.xlane.f32.xlu0 %v3556_v6 }
0x1839   :  { %v3565_v39 = vsel %vm328_vm0, %v3538_v23, 0.0 }
0x183a   :  { %v3536_v34 = vpop.permute.xlu0 %3535  ;;  %3566 = vadd.xlane.f32.xlu1 %v3565_v39 }
0x183b   :  { %v3562_v3 = vsel %vm328_vm0, %v3536_v34, 0.0 }
0x183c   :  { %v3542_v24 = vpop.permute.xlu1 %3541  ;;  %3560 = vadd.xlane.f32.xlu0 %v3559_v44 }
0x183d   :  { %v3571_v0 = vsel %vm328_vm0, %v3542_v24, 0.0 }
0x183e   :  { %3572 = vadd.xlane.f32.xlu1 %v3571_v0  ;;  %v3540_v41 = vpop.permute.xlu0 %3539 }
0x183f   :  { %v3568_v9 = vsel %vm328_vm0, %v3540_v41, 0.0 }
0x1840   :  { %3563 = vadd.xlane.f32.xlu0 %v3562_v3 }
0x1842   :  { %v3544_v19 = vpop.permute.xlu0 %3543 }
0x1843   :  { %v3574_v21 = vsel %vm328_vm0, %v3544_v19, 0.0 }
0x1844   :  { %3569 = vadd.xlane.f32.xlu0 %v3568_v9 }
0x1848   :  { %3575 = vadd.xlane.f32.xlu0 %v3574_v21 }
0x18c1   :  { %v3555_v47 = vpop.xlane.xlu1 %3554 }
0x18c2   :  { %v3588_v25 = vrot.slane %v3555_v47, %v7592_v18 }
0x18c5   :  { %v3558_v52 = vpop.xlane.xlu0 %3557 }
0x18c6   :  { %v3592_v56 = vrot.slane %v3558_v52, %v7592_v18 }
0x18c7   :  { %v3567_v37 = vpop.xlane.xlu1 %3566 }
0x18c8   :  { %v3617_v26 = vsel %vm962_vm9, %v3592_v56, %v3588_v25  ;;  %v3604_v31 = vrot.slane %v3567_v37, %v7592_v18 }
0x18c9   :  { %v3561_v36 = vpop.xlane.xlu0 %3560 }
0x18ca   :  { %v3596_v58 = vrot.slane %v3561_v36, %v7592_v18 }
0x18cb   :  { %v3573_v2 = vpop.xlane.xlu1 %3572 }
0x18cc   :  { %v3618_v14 = vsel %vm964_vm10, %v3596_v58, %v3617_v26  ;;  %v3612_v55 = vrot.slane %v3573_v2, %v7592_v18 }
0x18cd   :  { %v3564_v60 = vpop.xlane.xlu0 %3563 }
0x18ce   :  { %v3600_v61 = vrot.slane %v3564_v60, %v7592_v18 }
0x18d0   :  { %v3619_v40 = vsel %vm966_vm11, %v3600_v61, %v3618_v14 }
0x18d1   :  { %v3570_v51 = vpop.xlane.xlu0 %3569  ;;  %v3620_v33 = vsel %vm968_vm12, %v3604_v31, %v3619_v40 }
0x18d2   :  { %v3608_v30 = vrot.slane %v3570_v51, %v7592_v18 }
0x18d4   :  { %v3621_v10 = vsel %vm970_vm13, %v3608_v30, %v3620_v33 }
0x18d5   :  { %v3576_v11 = vpop.xlane.xlu0 %3575  ;;  %v3622_v27 = vsel %vm972_vm14, %v3612_v55, %v3621_v10 }
0x18d6   :  { %v3616_v12 = vrot.slane %v3576_v11, %v7592_v18 }
0x18d8   :  { %v3623_v6 = vsel %vm974_vm15, %v3616_v12, %v3622_v27 }
0x18d9   :  { %v3625_v23 = vsel %vm977_vm2, %v3623_v6, -inf }
0x18da   :  { %3626 = vmax.xlane.f32.xlu1 %v3625_v23 }
0x1967   :  { %v3627_v39 = vpop.xlane.xlu1 %3626 }
0x1968   :  { %v3632_v34 = vrot.slane %v3627_v39, %v7533_v54  ;;  %v3636_v44 = vrot.slane %v3627_v39, %v7611_v4  ;;  %v3640_v24 = vrot.slane %v3627_v39, %v7614_v5  ;;  %v3648_v0 = vrot.slane %v3627_v39, %v7617_v7 }
0x1969   :  { %v3656_v41 = vrot.slane %v3627_v39, %v7620_v8  ;;  %v3644_v19 = vrot.slane %v3627_v39, %v7623_v13  ;;  %v3652_v14 = vrot.slane %v3627_v39, %v7631_v43  ;;  %v3660_v33 = vrot.slane %v3627_v39, %v7635_v63 }
0x196a   :  { %v3669_v3 = vsub.f32 %v3555_v47, %v3632_v34  ;;  %v3670_v9 = vsub.f32 %v3558_v52, %v3636_v44  ;;  %v3671_v21 = vsub.f32 %v3561_v36, %v3640_v24  ;;  %v3673_v56 = vsub.f32 %v3567_v37, %v3648_v0 }
0x196b   :  { %v3675_v26 = vsub.f32 %v3573_v2, %v3656_v41  ;;  %v3672_v40 = vsub.f32 %v3564_v60, %v3644_v19  ;;  %v3674_v47 = vsub.f32 %v3570_v51, %v3652_v14  ;;  %v3676_v36 = vsub.f32 %v3576_v11, %v3660_v33 }
0x196c   :  { %v3677_v58 = vmul.f32 1.442695, %v3669_v3  ;;  %v3679_v25 = vmul.f32 1.442695, %v3670_v9  ;;  %v3685_v61 = vmul.f32 1.442695, %v3673_v56 }
0x196d   :  { %v3681_v31 = vmul.f32 1.442695, %v3671_v21  ;;  %v3689_v30 = vmul.f32 1.442695, %v3675_v26  ;;  %v3683_v52 = vmul.f32 1.442695, %v3672_v40 }
0x196e   :  { %6734 = vpow2.f32 %v3677_v58  ;;  %v3687_v37 = vmul.f32 1.442695, %v3674_v47  ;;  %v3691_v60 = vmul.f32 1.442695, %v3676_v36 }
0x196f   :  { %6736 = vpow2.f32 %v3679_v25 }
0x1970   :  { %6738 = vpow2.f32 %v3685_v61 }
0x1971   :  { %6740 = vpow2.f32 %v3681_v31 }
0x1972   :  { %6742 = vpow2.f32 %v3689_v30 }
0x1973   :  { %6744 = vpow2.f32 %v3683_v52 }
0x1974   :  { %6746 = vpow2.f32 %v3687_v37 }
0x1975   :  { %6748 = vpow2.f32 %v3691_v60 }
0x1978   :  { %v6735_v10 = vpop.eup %6734 }
0x1979   :  { %v8248_v2 = vpop.eup %6736  ;;  %3702 = vperm.xlu0 %6606, %v6735_v10  }
0x197a   :  { %3705 = vperm.xlu1 %6607, %v8248_v2   ;;  %v8251_v55 = vpop.eup %6738 }
0x197b   :  { %v8253_v12 = vpop.eup %6740 }
0x197c   :  { %v8257_v51 = vpop.eup %6742 }
0x197d   :  { %3714 = vperm.xlu0 %6606, %v8251_v55   ;;  %v6745_v11 = vpop.eup %6744 }
0x197e   :  { %3708 = vperm.xlu1 %6607, %v8253_v12   ;;  %v8260_v27 = vpop.eup %6746 }
0x197f   :  { %v6749_v6 = vpop.eup %6748 }
0x1981   :  { %3720 = vperm.xlu0 %6606, %v8257_v51  }
0x1982   :  { %3711 = vperm.xlu1 %6607, %v6745_v11  }
0x1986   :  { %3717 = vperm.xlu1 %6607, %v8260_v27  }
0x198a   :  { %3723 = vperm.xlu1 %6607, %v6749_v6  }
0x19f8   :  { %v3703_v39 = vpop.permute.xlu0 %3702 }
0x19f9   :  { %v3706_v23 = vpop.permute.xlu1 %3705  ;;  %v3728_v24 = vrot.slane %v3703_v39, %v7592_v18 }
0x19fa   :  { %v3732_v44 = vrot.slane %v3706_v23, %v7592_v18 }
0x19fc   :  { %v3715_v41 = vpop.permute.xlu0 %3714  ;;  %v3757_v9 = vsel %vm962_vm9, %v3732_v44, %v3728_v24 }
0x19fd   :  { %v3709_v34 = vpop.permute.xlu1 %3708  ;;  %v3744_v58 = vrot.slane %v3715_v41, %v7592_v18 }
0x19fe   :  { %v3736_v0 = vrot.slane %v3709_v34, %v7592_v18 }
0x1a00   :  { %v3758_v21 = vsel %vm964_vm10, %v3736_v0, %v3757_v9  ;;  %v3721_v26 = vpop.permute.xlu0 %3720 }
0x1a01   :  { %v3712_v3 = vpop.permute.xlu1 %3711  ;;  %v3752_v31 = vrot.slane %v3721_v26, %v7592_v18 }
0x1a02   :  { %v3740_v19 = vrot.slane %v3712_v3, %v7592_v18 }
0x1a04   :  { %v3759_v56 = vsel %vm966_vm11, %v3740_v19, %v3758_v21 }
0x1a05   :  { %v3718_v25 = vpop.permute.xlu1 %3717  ;;  %v3760_v14 = vsel %vm968_vm12, %v3744_v58, %v3759_v56 }
0x1a06   :  { %v3748_v61 = vrot.slane %v3718_v25, %v7592_v18 }
0x1a08   :  { %v3761_v40 = vsel %vm970_vm13, %v3748_v61, %v3760_v14 }
0x1a09   :  { %v3724_v30 = vpop.permute.xlu1 %3723  ;;  %v3762_v47 = vsel %vm972_vm14, %v3752_v31, %v3761_v40 }
0x1a0a   :  { %v3756_v33 = vrot.slane %v3724_v30, %v7592_v18 }
0x1a0c   :  { %v3763_v52 = vsel %vm974_vm15, %v3756_v33, %v3762_v47  ;;  %v8294_v33 = vld [vmem:[#allocation2] sm:$0xff] }
0x1a0d   :  { %v3765_v36 = vsel %vm977_vm2, %v3763_v52, 0.0  ;;  %8835 = vst [vmem:[#allocation35_spill] sm:$0xff] %v8294_v33  ;;  %v8297_v52 = vld [vmem:[#allocation2 + $0x8] sm:$0xff] }
0x1a0e   :  { %3766 = vadd.xlane.f32.xlu0 %v3765_v36  ;;  %8836 = vst [vmem:[#allocation36_spill] sm:$0xff] %v8297_v52 }
0x1a9b   :  { %v3767_v37 = vpop.xlane.xlu0 %3766 }
0x1a9c   :  { %v3800_v60 = vrot.slane %v3767_v37, %v7635_v63  ;;  %v3772_v23 = vrot.slane %v3767_v37, %v7533_v54  ;;  %v3776_v39 = vrot.slane %v3767_v37, %v7611_v4  ;;  %v3780_v34 = vrot.slane %v3767_v37, %v7614_v5 }
0x1a9d   :  { %v3784_v44 = vrot.slane %v3767_v37, %v7623_v13  ;;  %v3788_v3 = vrot.slane %v3767_v37, %v7617_v7  ;;  %v3792_v21 = vrot.slane %v3767_v37, %v7631_v43  ;;  %v3796_v25 = vrot.slane %v3767_v37, %v7620_v8 }
0x1a9e   :  { %6750 = vrcp.f32 %v3800_v60  ;;  %v8304_v60 = vld [vmem:[#allocation2 + $0x10] sm:$0xff] }
0x1a9f   :  { %6752 = vrcp.f32 %v3772_v23  ;;  %8837 = vst [vmem:[#allocation31_spill] sm:$0xff] %v8304_v60 }
0x1aa0   :  { %6754 = vrcp.f32 %v3776_v39  ;;  %v8307_v39 = vld [vmem:[#allocation2 + $0x38] sm:$0xff] }
0x1aa1   :  { %6756 = vrcp.f32 %v3780_v34  ;;  %8838 = vst [vmem:[#allocation37_spill] sm:$0xff] %v8307_v39 }
0x1aa2   :  { %6758 = vrcp.f32 %v3784_v44 }
0x1aa3   :  { %6760 = vrcp.f32 %v3788_v3 }
0x1aa4   :  { %6762 = vrcp.f32 %v3792_v21 }
0x1aa5   :  { %6764 = vrcp.f32 %v3796_v25 }
0x1aa8   :  { %v6751_v24 = vpop.eup %6750 }
0x1aa9   :  { %v6753_v0 = vpop.eup %6752  ;;  %v3824_v41 = vmul.f32 %v6751_v24, %v6749_v6 }
0x1aaa   :  { %v3810_v9 = vmul.f32 %v6753_v0, %v6735_v10  ;;  %v6755_v19 = vpop.eup %6754 }
0x1aab   :  { %3862 = vperm.xlu0 %6606, %v3824_v41   ;;  %v3812_v56 = vmul.f32 %v6755_v19, %v8248_v2  ;;  %v6757_v58 = vpop.eup %6756 }
0x1aac   :  { %3827 = vperm.xlu1 %6607, %v3810_v9   ;;  %v3814_v26 = vmul.f32 %v6757_v58, %v8253_v12  ;;  %v6759_v6 = vpop.eup %6758  ;;  %v8312_v9 = vld [vmem:[#allocation2 + $0x18] sm:$0xff] }
0x1aad   :  { %v3816_v61 = vmul.f32 %v6759_v6, %v6745_v11  ;;  %v6761_v10 = vpop.eup %6760  ;;  %8839 = vst [vmem:[#allocation38_spill] sm:$0xff] %v8312_v9 }
0x1aae   :  { %v3818_v14 = vmul.f32 %v6761_v10, %v8251_v55  ;;  %v6763_v40 = vpop.eup %6762  ;;  %v8317_v10 = vld [vmem:[#allocation2 + $0x20] sm:$0xff] }
0x1aaf   :  { %v3820_v31 = vmul.f32 %v6763_v40, %v8260_v27  ;;  %v6765_v2 = vpop.eup %6764  ;;  %8840 = vst [vmem:[#allocation40_spill] sm:$0xff] %v8317_v10 }
0x1ab0   :  { %3832 = vperm.xlu1 %6607, %v3812_v56   ;;  %v3822_v30 = vmul.f32 %v6765_v2, %v8257_v51 }
0x1ab4   :  { %3837 = vperm.xlu1 %6607, %v3814_v26  }
0x1ab8   :  { %3842 = vperm.xlu1 %6607, %v3816_v61  }
0x1abc   :  { %3847 = vperm.xlu1 %6607, %v3818_v14  }
0x1ac0   :  { %3852 = vperm.xlu1 %6607, %v3820_v31  }
0x1ac4   :  { %3857 = vperm.xlu1 %6607, %v3822_v30  }
0x1ac8   :  { %3350 = vrot.lane.b32.xlu1 %v8181_v50, %s7168_s8 }
0x1b2a   :  { %v8300_v36 = vpop.permute.xlu0 %3862 }
0x1b2b   :  { %v3828_v12 = vpop.permute.xlu1 %3827  ;;  %v3872_v34 = vmul.f32 %v8307_v39, %v8300_v36 }
0x1b2c   :  { %v3865_v11 = vmul.f32 %v8294_v33, %v3828_v12 }
0x1b2d   :  { %v3922_v21 = vsel %vm328_vm0, %v3872_v34, 0.0 }
0x1b2e   :  { %v3873_v27 = vsel %vm328_vm0, %v3865_v11, 0.0  ;;  %v3923_v40 = vrot.slane %v3922_v21, 4 }
0x1b2f   :  { %v3833_v47 = vpop.permute.xlu1 %3832  ;;  %v3874_v44 = vrot.slane %v3873_v27, 4 }
0x1b30   :  { %v3866_v55 = vmul.f32 %v8297_v52, %v3833_v47  ;;  %v4026_v31 = vrot.slane %v3833_v47, %v7592_v18 }
0x1b31   :  { %v3875_v56 = vadd.f32 %v3874_v44, %v3873_v27 }
0x1b32   :  { %v3880_v51 = vsel %vm328_vm0, %v3866_v55, 0.0 }
0x1b33   :  { %v3838_v37 = vpop.permute.xlu1 %3837  ;;  %v3881_v24 = vrot.slane %v3880_v51, 4  ;;  %v3876_v30 = vrot.slane %v3875_v56, 2 }
0x1b34   :  { %v3867_v23 = vmul.f32 %v8304_v60, %v3838_v37  ;;  %v4030_v55 = vrot.slane %v3838_v37, %v7592_v18 }
0x1b35   :  { %v3882_v58 = vadd.f32 %v3881_v24, %v3880_v51  ;;  %v4022_v51 = vrot.slane %v3828_v12, %v7592_v18  ;;  %v3877_v39 = vadd.f32 %v3876_v30, %v3875_v56 }
0x1b36   :  { %v3887_v0 = vsel %vm328_vm0, %v3867_v23, 0.0 }
0x1b37   :  { %v3888_v41 = vrot.slane %v3887_v0, 4  ;;  %v3843_v3 = vpop.permute.xlu1 %3842  ;;  %v3883_v11 = vrot.slane %v3882_v58, 2 }
0x1b38   :  { %v3868_v19 = vmul.f32 %v8312_v9, %v3843_v3  ;;  %v4034_v34 = vrot.slane %v3843_v3, %v7592_v18 }
0x1b39   :  { %v3889_v26 = vadd.f32 %v3888_v41, %v3887_v0  ;;  %v3884_v12 = vadd.f32 %v3883_v11, %v3882_v58  ;;  %v4050_v58 = vrot.slane %v8300_v36, %v7592_v18 }
0x1b3a   :  { %v3894_v25 = vsel %vm328_vm0, %v3868_v19, 0.0  ;;  %v8326_v19 = vld [vmem:[#allocation2 + $0x28] sm:$0xff] }
0x1b3b   :  { %v3895_v6 = vrot.slane %v3894_v25, 4  ;;  %v3848_v61 = vpop.permute.xlu1 %3847  ;;  %v3890_v23 = vrot.slane %v3889_v26, 2 }
0x1b3c   :  { %v3869_v14 = vmul.f32 %v8317_v10, %v3848_v61  ;;  %v4038_v41 = vrot.slane %v3848_v61, %v7592_v18 }
0x1b3d   :  { %v3896_v2 = vadd.f32 %v3895_v6, %v3894_v25  ;;  %v3924_v25 = vadd.f32 %v3923_v40, %v3922_v21  ;;  %v4051_v6 = vsel %vm962_vm9, %v4026_v31, %v4022_v51  ;;  %v3891_v9 = vadd.f32 %v3890_v23, %v3889_v26  ;;  %v8335_v40 = vld [vmem:[#allocation2 + $0x30] sm:$0xff] }
0x1b3e   :  { %v3901_v27 = vsel %vm328_vm0, %v3869_v14, 0.0  ;;  %v4052_v10 = vsel %vm964_vm10, %v4030_v55, %v4051_v6  ;;  %v3885_v55 = vrot.slane %v3884_v12, 1 }
0x1b3f   :  { %v3902_v44 = vrot.slane %v3901_v27, 4  ;;  %v3853_v24 = vpop.permute.xlu1 %3852  ;;  %v3897_v0 = vrot.slane %v3896_v2, 2  ;;  %v4053_v60 = vsel %vm966_vm11, %v4034_v34, %v4052_v10  ;;  %v3925_v10 = vrot.slane %v3924_v25, 2 }
0x1b40   :  { %v3870_v47 = vmul.f32 %v8326_v19, %v3853_v24  ;;  %v4042_v14 = vrot.slane %v3853_v24, %v7592_v18  ;;  %v4054_v21 = vsel %vm968_vm12, %v4038_v41, %v4053_v60  ;;  %v3892_v60 = vrot.slane %v3891_v9, 1 }
0x1b41   :  { %v3903_v37 = vadd.f32 %v3902_v44, %v3901_v27  ;;  %v3898_v8 = vadd.f32 %v3897_v0, %v3896_v2  ;;  %v3878_v44 = vrot.slane %v3877_v39, 1  ;;  %v3926_v41 = vadd.f32 %v3925_v10, %v3924_v25 }
0x1b42   :  { %v3908_v3 = vsel %vm328_vm0, %v3870_v47, 0.0  ;;  %v4055_v26 = vsel %vm970_vm13, %v4042_v14, %v4054_v21  ;;  %v3886_v47 = vadd.f32 %v3885_v55, %v3884_v12  ;;  %v3893_v6 = vadd.f32 %v3892_v60, %v3891_v9 }
0x1b43   :  { %v3904_v61 = vrot.slane %v3903_v37, 2  ;;  %v3909_v33 = vrot.slane %v3908_v3, 4  ;;  %v3858_v52 = vpop.permute.xlu1 %3857  ;;  %v3899_v24 = vrot.slane %v3898_v8, 1 }
0x1b44   :  { %v3871_v31 = vmul.f32 %v8335_v40, %v3858_v52  ;;  %v4046_v56 = vrot.slane %v3858_v52, %v7592_v18 }
0x1b45   :  { %v3905_v30 = vadd.f32 %v3904_v61, %v3903_v37  ;;  %v3910_v11 = vadd.f32 %v3909_v33, %v3908_v3  ;;  %v3879_v3 = vadd.f32 %v3878_v44, %v3877_v39  ;;  %v3900_v61 = vadd.f32 %v3899_v24, %v3898_v8 }
0x1b46   :  { %v3915_v27 = vsel %vm328_vm0, %v3871_v31, 0.0  ;;  %v4056_v2 = vsel %vm972_vm14, %v4046_v56, %v4055_v26  ;;  %v3927_v56 = vrot.slane %v3926_v41, 1 }
0x1b47   :  { %v3911_v51 = vrot.slane %v3910_v11, 2  ;;  %v3916_v23 = vrot.slane %v3915_v27, 4  ;;  %v3351_v34 = vpop.permute.xlu1 %3350  ;;  %v4057_v52 = vsel %vm974_vm15, %v4050_v58, %v4056_v2  ;;  %v3906_v36 = vrot.slane %v3905_v30, 1 }
0x1b48   :  { %6299 = vmatmul.mubr.msk.f32.vlgmr.msra.gmra.mrb[12].mxu1 %vm328_vm0, %v3351_v34  ;;  %4060 = vst.msk [vmem:[#allocation17 + $0x18] sm:$0xff] %vm977_vm2, %v4057_v52  ;;  %v3937_v58 = vsel %vm962_vm9, %v3886_v47, %v3879_v3  ;;  %v3928_v39 = vadd.f32 %v3927_v56, %v3926_v41 }
0x1b49   :  { %v3912_v33 = vadd.f32 %v3911_v51, %v3910_v11  ;;  %v3917_v0 = vadd.f32 %v3916_v23, %v3915_v27  ;;  %6516 = vmatpush3.bf16.msra.mxu1 %v8826_v15  ;;  %6309 = vmatprep.mubr.msk.f32.mxu1 %vm7164_vm1, %v8817_v45  ;;  %v3907_v21 = vadd.f32 %v3906_v36, %v3905_v30  ;;  %v8841_v23 = vld [vmem:[#allocation33_spill] sm:$0xff] }
0x1b4a   :  { %6517 = vmatprep.subr.bf16.mxu1 %v8820_v20  ;;  %v3938_v25 = vsel %vm964_vm10, %v3893_v6, %v3937_v58 }
0x1b4b   :  { %v3913_v37 = vrot.slane %v3912_v33, 1  ;;  %v3918_v14 = vrot.slane %v3917_v0, 2  ;;  %v3939_v26 = vsel %vm966_vm11, %v3900_v61, %v3938_v25 }
0x1b4c   :  { %v3940_v10 = vsel %vm968_vm12, %v3907_v21, %v3939_v26 }
0x1b4d   :  { %v3919_v31 = vadd.f32 %v3918_v14, %v3917_v0  ;;  %6519 = vmatpush3.bf16.msra.mxu1 %v8827_v29  ;;  %v3914_v11 = vadd.f32 %v3913_v37, %v3912_v33 }
0x1b4e   :  { %6532 = vmatprep.subr.bf16.mxu1 %v8820_v20 }
0x1b4f   :  { %v3920_v12 = vrot.slane %v3919_v31, 1  ;;  %v3941_v8 = vsel %vm970_vm13, %v3914_v11, %v3940_v10 }
0x1b51   :  { %v3921_v9 = vadd.f32 %v3920_v12, %v3919_v31 }
0x1b53   :  { %v3942_v30 = vsel %vm972_vm14, %v3921_v9, %v3941_v8 }
0x1b54   :  { %v3943_v55 = vsel %vm974_vm15, %v3928_v39, %v3942_v30 }
0x1b55   :  { %6310 = vmatmul.mubr.msk.f32.vlgmr.msra.gmra.mrb[12].mxu1 %vm328_vm0, %v3943_v55 }
0x1b56   :  { %6534 = vmatpush3.bf16.msra.mxu1 %v7663_v49  ;;  %6342 = vmatprep.mubr.msk.f32.mxu1 %vm7164_vm1, %v8817_v45 }
0x1b57   :  { %6535 = vmatprep.subr.bf16.mxu1 %v8820_v20 }
0x1b5a   :  { %6537 = vmatpush3.bf16.msra.mxu1 %v7683_v42 }
0x1b5b   :  { %6538 = vmatprep.subr.bf16.mxu1 %v8820_v20 }
0x1c28   :  { %v4012_v27 = vpop.f32.mrb[12].mxu1 }
0x1c29   :  { %6766 = vtanh.f32 %v4012_v27  ;;  %v6311_v2 = vpop.f32.mrb[13].mxu1 }
0x1c33   :  { %v6767_v60 = vpop.eup %6766 }
0x1c34   :  { %4018 = vst.msk [vmem:[#allocation16 + $0x18] sm:$0xff] %vm328_vm0, %v6767_v60  ;;  %6321 = vmatmul.mubr.msk.f32.vlgmr.msra.gmra.mrb[24].mxu0 %vm328_vm0, %v6767_v60 }
0x1c35   :  { %6528 = vmatpush3.bf16.msra.mxu0 %v7479_v57  ;;  %6331 = vmatprep.mubr.msk.f32.mxu0 %vm7164_vm1, %v8817_v45 }
0x1c36   :  { %6529 = vmatprep.subr.bf16.mxu0 %v8820_v20 }
0x1c39   :  { %6531 = vmatpush3.bf16.msra.mxu0 %v7490_v62 }
0x1c3a   :  { %6544 = vmatprep.subr.bf16.mxu0 %v8820_v20 }
0x1c3c   :  { %6332 = vmatmul.mubr.msk.f32.vlgmr.msra.gmra.mrb[26].mxu0 %vm328_vm0, %v3351_v34 }
0x1c3d   :  { %6546 = vmatpush3.bf16.msra.mxu0 %v7419_v28  ;;  %6364 = vmatprep.mubr.msk.f32.mxu0 %vm7164_vm1, %v8817_v45 }
0x1c3e   :  { %6547 = vmatprep.subr.bf16.mxu0 %v8820_v20 }
0x1c41   :  { %6549 = vmatpush3.bf16.msra.mxu0 %v7429_v35 }
0x1c42   :  { %6550 = vmatprep.subr.bf16.mxu0 %v8820_v20 }
0x1d07   :  { %v4130_v51 = vpop.f32.mrb[24].mxu0 }
0x1d08   :  { %v4204_v44 = vadd.f32 %v4130_v51, %v8841_v23  ;;  %v6322_v24 = vpop.f32.mrb[25].mxu0 }
0x1d0f   :  { %v4200_v52 = vpop.f32.mrb[26].mxu0 }
0x1d10   :  { %v4212_v36 = vadd.f32 %v4200_v52, %v7516_v17  ;;  %v6333_v33 = vpop.f32.mrb[27].mxu0  ;;  %v4205_v28 = vadd.f32 %v4204_v44, %v4200_v52 }
0x1d12   :  { %4214 = vrot.lane.b32.xlu1 %v4212_v36, %s7166_s15  ;;  %v5937_v34 = vmul.f32 -1.442695, %v4205_v28 }
0x1d14   :  { %6768 = vpow2.f32 %v5937_v34 }
0x1d1e   :  { %v6769_v0 = vpop.eup %6768 }
0x1d1f   :  { %v4209_v41 = vadd.f32 1.0, %v6769_v0 }
0x1d21   :  { %6770 = vrcp.f32 %v4209_v41 }
0x1d2b   :  { %v6771_v47 = vpop.eup %6770 }
0x1d2c   :  { %v4224_v61 = vsub.f32 1.0, %v6771_v47  ;;  %v4230_v31 = vmul.f32 %v6771_v47, %v8181_v50 }
0x1d84   :  { %v4215_v35 = vpop.permute.xlu1 %4214 }
0x1d85   :  { %v4217_v6 = vmul.f32 %v6771_v47, %v4215_v35 }
0x1d87   :  { %4219 = vrot.lane.b32.xlu1 %v4217_v6, %s7166_s15 }
0x1df9   :  { %v4220_v37 = vpop.permute.xlu1 %4219 }
0x1dfa   :  { %v4222_v14 = vadd.f32 %v4220_v37, %v4204_v44 }
0x1dfc   :  { %6772 = vtanh.f32 %v4222_v14 }
0x1e06   :  { %v6773_v3 = vpop.eup %6772 }
0x1e07   :  { %4226 = vrot.lane.b32.xlu1 %v6773_v3, %s7168_s8 }
0x1e79   :  { %v4227_v21 = vpop.permute.xlu1 %4226 }
0x1e7a   :  { %v4229_v56 = vmul.f32 %v4227_v21, %v4224_v61 }
0x1e7c   :  { %v8388_v58 = vadd.f32 %v4230_v31, %v4229_v56 }
0x1e7e   :  { %v4307_v11 = vcombine.high %v8388_v58, %v8388_v58  ;;  %v4314_v25 = vrot.slane %v8388_v58, %v7526_v48 }
0x1e80   :  { %v4321_v12 = vrot.slane %v4307_v11, %v7526_v48  ;;  %v4322_v26 = vcombine.high %v4314_v25, %v4314_v25  ;;  %v4330_v9 = vrot.slane %v4314_v25, %v7526_v48 }
0x1e82   :  { %v4359_v10 = vrot.slane %v4330_v9, %v7533_v54  ;;  %v4352_v39 = vcombine.high %v4330_v9, %v4330_v9  ;;  %v4344_v8 = vrot.slane %v4322_v26, %v7526_v48  ;;  %v4337_v50 = vrot.slane %v4321_v12, %v7526_v48 }
0x1e83   :  { %v4323_v2 = vcombine.high %v4321_v12, %v4321_v12 }
0x1e84   :  { %v4396_v30 = vmul.f32 %v4359_v10, %v7530_v53  ;;  %v4367_v55 = vrot.slane %v4352_v39, %v7533_v54  ;;  %v4363_v27 = vrot.slane %v4344_v8, %v7533_v54  ;;  %v4354_v60 = vcombine.high %v4344_v8, %v4344_v8 }
0x1e85   :  { %v4375_v23 = vrot.slane %v4337_v50, %v7533_v54  ;;  %v4353_v44 = vcombine.high %v4337_v50, %v4337_v50  ;;  %v4351_v36 = vrot.slane %v4323_v2, %v7526_v48 }
0x1e86   :  { %4412 = vrot.lane.b32.xlu1 %v4396_v30, %s7168_s8  ;;  %v4398_v51 = vmul.f32 %v4367_v55, %v7543_v1  ;;  %v4397_v24 = vmul.f32 %v4363_v27, %v7539_v59  ;;  %v4371_v52 = vrot.slane %v4354_v60, %v7533_v54 }
0x1e87   :  { %v4400_v33 = vmul.f32 %v4375_v23, %v7557_v22  ;;  %v4383_v28 = vrot.slane %v4353_v44, %v7533_v54  ;;  %v4379_v0 = vrot.slane %v4351_v36, %v7533_v54  ;;  %v4355_v41 = vcombine.high %v4351_v36, %v4351_v36 }
0x1e88   :  { %4416 = vrot.lane.b32.xlu0 %v4398_v51, %s7168_s8  ;;  %v4399_v34 = vmul.f32 %v4371_v52, %v7551_v16 }
0x1e89   :  { %v4402_v47 = vmul.f32 %v4383_v28, %v7569_v38  ;;  %v4401_v35 = vmul.f32 %v4379_v0, %v7565_v32  ;;  %v4387_v6 = vrot.slane %v4355_v41, %v7533_v54 }
0x1e8a   :  { %4414 = vrot.lane.b32.xlu1 %v4397_v24, %s7168_s8 }
0x1e8b   :  { %v4403_v37 = vmul.f32 %v4387_v6, %v7577_v46 }
0x1e8c   :  { %4420 = vrot.lane.b32.xlu0 %v4400_v33, %s7168_s8 }
0x1e8e   :  { %4418 = vrot.lane.b32.xlu1 %v4399_v34, %s7168_s8 }
0x1e90   :  { %4424 = vrot.lane.b32.xlu0 %v4402_v47, %s7168_s8 }
0x1e92   :  { %4422 = vrot.lane.b32.xlu1 %v4401_v35, %s7168_s8 }
0x1e96   :  { %4426 = vrot.lane.b32.xlu1 %v4403_v37, %s7168_s8 }
0x1ef8   :  { %v4413_v14 = vpop.permute.xlu1 %4412 }
0x1ef9   :  { %v4436_v3 = vsel %vm328_vm0, %v4413_v14, 0.0 }
0x1efa   :  { %v4417_v61 = vpop.permute.xlu0 %4416  ;;  %4437 = vadd.xlane.f32.xlu0 %v4436_v3 }
0x1efb   :  { %v4442_v31 = vsel %vm328_vm0, %v4417_v61, 0.0 }
0x1efc   :  { %v4415_v21 = vpop.permute.xlu1 %4414 }
0x1efd   :  { %v4439_v56 = vsel %vm328_vm0, %v4415_v21, 0.0 }
0x1efe   :  { %v4421_v11 = vpop.permute.xlu0 %4420  ;;  %4443 = vadd.xlane.f32.xlu0 %v4442_v31  ;;  %4440 = vadd.xlane.f32.xlu1 %v4439_v56 }
0x1eff   :  { %v4448_v12 = vsel %vm328_vm0, %v4421_v11, 0.0 }
0x1f00   :  { %v4419_v25 = vpop.permute.xlu1 %4418 }
0x1f01   :  { %v4445_v26 = vsel %vm328_vm0, %v4419_v25, 0.0 }
0x1f02   :  { %4446 = vadd.xlane.f32.xlu0 %v4445_v26  ;;  %v4425_v9 = vpop.permute.xlu0 %4424  ;;  %4449 = vadd.xlane.f32.xlu1 %v4448_v12 }
0x1f03   :  { %v4454_v39 = vsel %vm328_vm0, %v4425_v9, 0.0 }
0x1f04   :  { %v4423_v10 = vpop.permute.xlu1 %4422 }
0x1f05   :  { %v4451_v8 = vsel %vm328_vm0, %v4423_v10, 0.0 }
0x1f06   :  { %4452 = vadd.xlane.f32.xlu0 %v4451_v8  ;;  %4455 = vadd.xlane.f32.xlu1 %v4454_v39 }
0x1f08   :  { %v4427_v50 = vpop.permute.xlu1 %4426 }
0x1f09   :  { %v4457_v30 = vsel %vm328_vm0, %v4427_v50, 0.0 }
0x1f0a   :  { %4458 = vadd.xlane.f32.xlu0 %v4457_v30 }
0x1f87   :  { %v4438_v55 = vpop.xlane.xlu0 %4437 }
0x1f88   :  { %v4471_v60 = vrot.slane %v4438_v55, %v7592_v18 }
0x1f8b   :  { %v4444_v27 = vpop.xlane.xlu0 %4443  ;;  %v4441_v2 = vpop.xlane.xlu1 %4440 }
0x1f8c   :  { %v4475_v51 = vrot.slane %v4441_v2, %v7592_v18  ;;  %v4479_v23 = vrot.slane %v4444_v27, %v7592_v18 }
0x1f8e   :  { %v4500_v44 = vsel %vm962_vm9, %v4475_v51, %v4471_v60 }
0x1f8f   :  { %v4447_v24 = vpop.xlane.xlu0 %4446  ;;  %v4450_v52 = vpop.xlane.xlu1 %4449  ;;  %v4501_v33 = vsel %vm964_vm10, %v4479_v23, %v4500_v44 }
0x1f90   :  { %v4483_v36 = vrot.slane %v4447_v24, %v7592_v18  ;;  %v4487_v28 = vrot.slane %v4450_v52, %v7592_v18 }
0x1f92   :  { %v4502_v34 = vsel %vm966_vm11, %v4483_v36, %v4501_v33  ;;  %v8842_v33 = vld [vmem:[#allocation34_spill] sm:$0xff] }
0x1f93   :  { %v4453_v0 = vpop.xlane.xlu0 %4452  ;;  %v4456_v41 = vpop.xlane.xlu1 %4455  ;;  %v4503_v35 = vsel %vm968_vm12, %v4487_v28, %v4502_v34 }
0x1f94   :  { %v4491_v47 = vrot.slane %v4453_v0, %v7592_v18  ;;  %v4495_v6 = vrot.slane %v4456_v41, %v7592_v18 }
0x1f96   :  { %v4504_v37 = vsel %vm970_vm13, %v4491_v47, %v4503_v35 }
0x1f97   :  { %v4459_v14 = vpop.xlane.xlu0 %4458  ;;  %v4505_v61 = vsel %vm972_vm14, %v4495_v6, %v4504_v37 }
0x1f98   :  { %v4499_v3 = vrot.slane %v4459_v14, %v7592_v18 }
0x1f9a   :  { %v4506_v21 = vsel %vm974_vm15, %v4499_v3, %v4505_v61 }
0x1f9b   :  { %v4508_v31 = vsel %vm977_vm2, %v4506_v21, -inf }
0x1f9c   :  { %4509 = vmax.xlane.f32.xlu1 %v4508_v31 }
0x2029   :  { %v4510_v56 = vpop.xlane.xlu1 %4509 }
0x202a   :  { %v4515_v11 = vrot.slane %v4510_v56, %v7533_v54  ;;  %v4519_v25 = vrot.slane %v4510_v56, %v7611_v4  ;;  %v4523_v12 = vrot.slane %v4510_v56, %v7614_v5  ;;  %v4527_v26 = vrot.slane %v4510_v56, %v7623_v13 }
0x202b   :  { %v4535_v9 = vrot.slane %v4510_v56, %v7631_v43  ;;  %v4531_v50 = vrot.slane %v4510_v56, %v7617_v7  ;;  %v4543_v23 = vrot.slane %v4510_v56, %v7635_v63  ;;  %v4539_v28 = vrot.slane %v4510_v56, %v8842_v33 }
0x202c   :  { %v4552_v10 = vsub.f32 %v4438_v55, %v4515_v11  ;;  %v4553_v39 = vsub.f32 %v4441_v2, %v4519_v25  ;;  %v4555_v8 = vsub.f32 %v4447_v24, %v4527_v26  ;;  %v4554_v30 = vsub.f32 %v4444_v27, %v4523_v12 }
0x202d   :  { %v4557_v44 = vsub.f32 %v4453_v0, %v4535_v9  ;;  %v4556_v34 = vsub.f32 %v4450_v52, %v4531_v50  ;;  %v4559_v35 = vsub.f32 %v4459_v14, %v4543_v23  ;;  %v4558_v2 = vsub.f32 %v4456_v41, %v4539_v28 }
0x202e   :  { %v4560_v60 = vmul.f32 1.442695, %v4552_v10  ;;  %v4562_v51 = vmul.f32 1.442695, %v4553_v39  ;;  %v4566_v36 = vmul.f32 1.442695, %v4555_v8 }
0x202f   :  { %v4564_v47 = vmul.f32 1.442695, %v4554_v30  ;;  %v4570_v55 = vmul.f32 1.442695, %v4557_v44  ;;  %v4568_v24 = vmul.f32 1.442695, %v4556_v34 }
0x2030   :  { %6774 = vpow2.f32 %v4560_v60  ;;  %v4574_v27 = vmul.f32 1.442695, %v4559_v35  ;;  %v4572_v6 = vmul.f32 1.442695, %v4558_v2 }
0x2031   :  { %6776 = vpow2.f32 %v4562_v51 }
0x2032   :  { %6778 = vpow2.f32 %v4566_v36 }
0x2033   :  { %6780 = vpow2.f32 %v4564_v47 }
0x2034   :  { %6782 = vpow2.f32 %v4570_v55 }
0x2035   :  { %6784 = vpow2.f32 %v4568_v24 }
0x2036   :  { %6786 = vpow2.f32 %v4574_v27 }
0x2037   :  { %6788 = vpow2.f32 %v4572_v6 }
0x203a   :  { %v6775_v37 = vpop.eup %6774 }
0x203b   :  { %v6777_v3 = vpop.eup %6776  ;;  %4585 = vperm.xlu0 %6606, %v6775_v37  }
0x203c   :  { %4588 = vperm.xlu1 %6607, %v6777_v3   ;;  %v8455_v0 = vpop.eup %6778 }
0x203d   :  { %v6781_v52 = vpop.eup %6780 }
0x203e   :  { %v8458_v14 = vpop.eup %6782 }
0x203f   :  { %4594 = vperm.xlu0 %6606, %v8455_v0   ;;  %v6785_v41 = vpop.eup %6784 }
0x2040   :  { %4591 = vperm.xlu1 %6607, %v6781_v52   ;;  %v8461_v61 = vpop.eup %6786 }
0x2041   :  { %v8463_v21 = vpop.eup %6788 }
0x2043   :  { %4600 = vperm.xlu0 %6606, %v8458_v14  }
0x2044   :  { %4597 = vperm.xlu1 %6607, %v6785_v41  }
0x2047   :  { %4606 = vperm.xlu0 %6606, %v8461_v61  }
0x2048   :  { %4603 = vperm.xlu1 %6607, %v8463_v21  }
0x20ba   :  { %v4586_v31 = vpop.permute.xlu0 %4585 }
0x20bb   :  { %v4589_v56 = vpop.permute.xlu1 %4588  ;;  %v4611_v25 = vrot.slane %v4586_v31, %v7592_v18 }
0x20bc   :  { %v4615_v11 = vrot.slane %v4589_v56, %v7592_v18 }
0x20be   :  { %v4595_v12 = vpop.permute.xlu0 %4594  ;;  %v4640_v10 = vsel %vm962_vm9, %v4615_v11, %v4611_v25 }
0x20bf   :  { %v4592_v26 = vpop.permute.xlu1 %4591  ;;  %v4623_v39 = vrot.slane %v4595_v12, %v7592_v18 }
0x20c0   :  { %v4619_v9 = vrot.slane %v4592_v26, %v7592_v18 }
0x20c2   :  { %v4641_v8 = vsel %vm964_vm10, %v4619_v9, %v4640_v10  ;;  %v4601_v50 = vpop.permute.xlu0 %4600 }
0x20c3   :  { %v4598_v30 = vpop.permute.xlu1 %4597  ;;  %v4642_v51 = vsel %vm966_vm11, %v4623_v39, %v4641_v8  ;;  %v4631_v23 = vrot.slane %v4601_v50, %v7592_v18 }
0x20c4   :  { %v4627_v60 = vrot.slane %v4598_v30, %v7592_v18 }
0x20c6   :  { %v4643_v44 = vsel %vm968_vm12, %v4627_v60, %v4642_v51  ;;  %v4607_v36 = vpop.permute.xlu0 %4606 }
0x20c7   :  { %v4604_v28 = vpop.permute.xlu1 %4603  ;;  %v4639_v34 = vrot.slane %v4607_v36, %v7592_v18  ;;  %v4644_v35 = vsel %vm970_vm13, %v4631_v23, %v4643_v44 }
0x20c8   :  { %v4635_v47 = vrot.slane %v4604_v28, %v7592_v18 }
0x20ca   :  { %v4645_v55 = vsel %vm972_vm14, %v4635_v47, %v4644_v35 }
0x20cb   :  { %v4646_v2 = vsel %vm974_vm15, %v4639_v34, %v4645_v55  ;;  %v8843_v55 = vld [vmem:[#allocation36_spill] sm:$0xff] }
0x20cc   :  { %v4648_v24 = vsel %vm977_vm2, %v4646_v2, 0.0  ;;  %v8844_v2 = vld [vmem:[#allocation35_spill] sm:$0xff] }
0x20cd   :  { %4649 = vadd.xlane.f32.xlu1 %v4648_v24 }
0x215a   :  { %v4650_v27 = vpop.xlane.xlu1 %4649 }
0x215b   :  { %v4655_v6 = vrot.slane %v4650_v27, %v7533_v54  ;;  %v4659_v31 = vrot.slane %v4650_v27, %v7611_v4  ;;  %v4663_v56 = vrot.slane %v4650_v27, %v7614_v5  ;;  %v4667_v11 = vrot.slane %v4650_v27, %v7623_v13 }
0x215c   :  { %v4671_v12 = vrot.slane %v4650_v27, %v7617_v7  ;;  %v4675_v10 = vrot.slane %v4650_v27, %v7631_v43  ;;  %v4679_v50 = vrot.slane %v4650_v27, %v8842_v33  ;;  %v4683_v51 = vrot.slane %v4650_v27, %v7635_v63 }
0x215d   :  { %6790 = vrcp.f32 %v4655_v6 }
0x215e   :  { %6792 = vrcp.f32 %v4659_v31 }
0x215f   :  { %6794 = vrcp.f32 %v4663_v56 }
0x2160   :  { %6796 = vrcp.f32 %v4667_v11  ;;  %v8846_v11 = vld [vmem:[#allocation38_spill] sm:$0xff] }
0x2161   :  { %6798 = vrcp.f32 %v4671_v12 }
0x2162   :  { %6800 = vrcp.f32 %v4675_v10 }
0x2163   :  { %6802 = vrcp.f32 %v4679_v50  ;;  %v8847_v50 = vld [vmem:[#allocation40_spill] sm:$0xff] }
0x2164   :  { %6804 = vrcp.f32 %v4683_v51 }
0x2167   :  { %v6791_v25 = vpop.eup %6790 }
0x2168   :  { %v4693_v26 = vmul.f32 %v6791_v25, %v6775_v37  ;;  %v6793_v9 = vpop.eup %6792 }
0x2169   :  { %v4695_v39 = vmul.f32 %v6793_v9, %v6777_v3  ;;  %v6795_v8 = vpop.eup %6794 }
0x216a   :  { %4710 = vperm.xlu0 %6606, %v4693_v26   ;;  %v4697_v30 = vmul.f32 %v6795_v8, %v6781_v52  ;;  %v6797_v60 = vpop.eup %6796 }
0x216b   :  { %v4699_v23 = vmul.f32 %v6797_v60, %v8455_v0  ;;  %v6799_v37 = vpop.eup %6798 }
0x216c   :  { %v4701_v44 = vmul.f32 %v6799_v37, %v6785_v41  ;;  %v6801_v36 = vpop.eup %6800 }
0x216d   :  { %v4703_v3 = vmul.f32 %v6801_v36, %v8458_v14  ;;  %v6803_v28 = vpop.eup %6802  ;;  %v8845_v14 = vld [vmem:[#allocation31_spill] sm:$0xff] }
0x216e   :  { %4715 = vperm.xlu0 %6606, %v4695_v39   ;;  %v4705_v34 = vmul.f32 %v6803_v28, %v8463_v21  ;;  %v6805_v52 = vpop.eup %6804 }
0x216f   :  { %v4707_v47 = vmul.f32 %v6805_v52, %v8461_v61 }
0x2172   :  { %4720 = vperm.xlu0 %6606, %v4697_v30  }
0x2176   :  { %4725 = vperm.xlu0 %6606, %v4699_v23  }
0x217a   :  { %4730 = vperm.xlu0 %6606, %v4701_v44  }
0x217e   :  { %4735 = vperm.xlu0 %6606, %v4703_v3  }
0x2182   :  { %4740 = vperm.xlu0 %6606, %v4705_v34  }
0x2186   :  { %4745 = vperm.xlu0 %6606, %v4707_v47  }
0x218a   :  { %4233 = vrot.lane.b32.xlu0 %v8388_v58, %s7168_s8 }
0x21e9   :  { %v4711_v0 = vpop.permute.xlu0 %4710 }
0x21ea   :  { %v4748_v24 = vmul.f32 %v8844_v2, %v4711_v0  ;;  %v4905_v52 = vrot.slane %v4711_v0, %v7592_v18 }
0x21ec   :  { %v4756_v21 = vsel %vm328_vm0, %v4748_v24, 0.0 }
0x21ed   :  { %v4716_v35 = vpop.permute.xlu0 %4715  ;;  %v4757_v26 = vrot.slane %v4756_v21, 4 }
0x21ee   :  { %v4749_v41 = vmul.f32 %v8843_v55, %v4716_v35  ;;  %v4909_v28 = vrot.slane %v4716_v35, %v7592_v18 }
0x21ef   :  { %v4758_v51 = vadd.f32 %v4757_v26, %v4756_v21 }
0x21f0   :  { %v4763_v31 = vsel %vm328_vm0, %v4749_v41, 0.0  ;;  %v4934_v35 = vsel %vm962_vm9, %v4909_v28, %v4905_v52 }
0x21f1   :  { %v4721_v27 = vpop.permute.xlu0 %4720  ;;  %v4764_v12 = vrot.slane %v4763_v31, 4  ;;  %v4759_v2 = vrot.slane %v4758_v51, 2 }
0x21f2   :  { %v4750_v6 = vmul.f32 %v8845_v14, %v4721_v27  ;;  %v4913_v55 = vrot.slane %v4721_v27, %v7592_v18 }
0x21f3   :  { %v4765_v60 = vadd.f32 %v4764_v12, %v4763_v31 }
0x21f4   :  { %v4770_v56 = vsel %vm328_vm0, %v4750_v6, 0.0  ;;  %v4935_v12 = vsel %vm964_vm10, %v4913_v55, %v4934_v35 }
0x21f5   :  { %v4726_v61 = vpop.permute.xlu0 %4725  ;;  %v4771_v9 = vrot.slane %v4770_v56, 4  ;;  %v4766_v47 = vrot.slane %v4765_v60, 2 }
0x21f6   :  { %v4751_v25 = vmul.f32 %v8846_v11, %v4726_v61  ;;  %v4917_v14 = vrot.slane %v4726_v61, %v7592_v18 }
0x21f7   :  { %v4772_v23 = vadd.f32 %v4771_v9, %v4770_v56  ;;  %v4767_v27 = vadd.f32 %v4766_v47, %v4765_v60  ;;  %v4760_v9 = vadd.f32 %v4759_v2, %v4758_v51  ;;  %v8848_v60 = vld [vmem:[#allocation37_spill] sm:$0xff] }
0x21f8   :  { %v4777_v10 = vsel %vm328_vm0, %v4751_v25, 0.0 }
0x21f9   :  { %v4778_v39 = vrot.slane %v4777_v10, 4  ;;  %v4731_v8 = vpop.permute.xlu0 %4730  ;;  %v4773_v24 = vrot.slane %v4772_v23, 2  ;;  %v4768_v47 = vrot.slane %v4767_v27, 1 }
0x21fa   :  { %v4752_v30 = vmul.f32 %v8847_v50, %v4731_v8  ;;  %v4921_v21 = vrot.slane %v4731_v8, %v7592_v18 }
0x21fb   :  { %v4779_v44 = vadd.f32 %v4778_v39, %v4777_v10  ;;  %v4774_v10 = vadd.f32 %v4773_v24, %v4772_v23  ;;  %v4936_v39 = vsel %vm966_vm11, %v4917_v14, %v4935_v12  ;;  %v4761_v14 = vrot.slane %v4760_v9, 1 }
0x21fc   :  { %v4784_v37 = vsel %vm328_vm0, %v4752_v30, 0.0  ;;  %v4937_v30 = vsel %vm968_vm12, %v4921_v21, %v4936_v39 }
0x21fd   :  { %v4785_v36 = vrot.slane %v4784_v37, 4  ;;  %v4736_v3 = vpop.permute.xlu0 %4735  ;;  %v4780_v31 = vrot.slane %v4779_v44, 2  ;;  %v4775_v2 = vrot.slane %v4774_v10, 1  ;;  %v4762_v12 = vadd.f32 %v4761_v14, %v4760_v9 }
0x21fe   :  { %v4753_v34 = vmul.f32 %v8326_v19, %v4736_v3  ;;  %v4925_v0 = vrot.slane %v4736_v3, %v7592_v18 }
0x21ff   :  { %v4786_v41 = vadd.f32 %v4785_v36, %v4784_v37  ;;  %v4781_v50 = vadd.f32 %v4780_v31, %v4779_v44 }
0x2200   :  { %v4791_v6 = vsel %vm328_vm0, %v4753_v34, 0.0 }
0x2201   :  { %v4792_v56 = vrot.slane %v4791_v6, 4  ;;  %v4741_v11 = vpop.permute.xlu0 %4740  ;;  %v4787_v19 = vrot.slane %v4786_v41, 2 }
0x2202   :  { %v4754_v25 = vmul.f32 %v8335_v40, %v4741_v11  ;;  %v4929_v61 = vrot.slane %v4741_v11, %v7592_v18  ;;  %v4938_v40 = vsel %vm970_vm13, %v4925_v0, %v4937_v30  ;;  %v4769_v11 = vadd.f32 %v4768_v47, %v4767_v27 }
0x2203   :  { %v4793_v26 = vadd.f32 %v4792_v56, %v4791_v6  ;;  %v4788_v28 = vadd.f32 %v4787_v19, %v4786_v41  ;;  %v4782_v6 = vrot.slane %v4781_v50, 1 }
0x2204   :  { %v4798_v8 = vsel %vm328_vm0, %v4754_v25, 0.0  ;;  %v4939_v55 = vsel %vm972_vm14, %v4929_v61, %v4938_v40  ;;  %v4776_v25 = vadd.f32 %v4775_v2, %v4774_v10  ;;  %v4820_v30 = vsel %vm962_vm9, %v4769_v11, %v4762_v12 }
0x2205   :  { %v4794_v37 = vrot.slane %v4793_v26, 2  ;;  %v4799_v36 = vrot.slane %v4798_v8, 4  ;;  %v4746_v3 = vpop.permute.xlu0 %4745  ;;  %v4789_v56 = vrot.slane %v4788_v28, 1 }
0x2206   :  { %v4755_v34 = vmul.f32 %v8848_v60, %v4746_v3  ;;  %v4933_v52 = vrot.slane %v4746_v3, %v7592_v18 }
0x2207   :  { %v4795_v51 = vadd.f32 %v4794_v37, %v4793_v26  ;;  %v4800_v23 = vadd.f32 %v4799_v36, %v4798_v8  ;;  %v4783_v26 = vadd.f32 %v4782_v6, %v4781_v50  ;;  %v4790_v8 = vadd.f32 %v4789_v56, %v4788_v28 }
0x2208   :  { %v4805_v44 = vsel %vm328_vm0, %v4755_v34, 0.0  ;;  %v4940_v24 = vsel %vm974_vm15, %v4933_v52, %v4939_v55  ;;  %v4821_v36 = vsel %vm964_vm10, %v4776_v25, %v4820_v30 }
0x2209   :  { %v4801_v31 = vrot.slane %v4800_v23, 2  ;;  %v4806_v41 = vrot.slane %v4805_v44, 4  ;;  %4943 = vst.msk [vmem:[#allocation17 + $0x20] sm:$0xff] %vm977_vm2, %v4940_v24  ;;  %v4234_v21 = vpop.permute.xlu0 %4233  ;;  %v4796_v35 = vrot.slane %v4795_v51, 1  ;;  %v4822_v10 = vsel %vm966_vm11, %v4783_v26, %v4821_v36 }
0x220a   :  { %6343 = vmatmul.mubr.msk.f32.vlgmr.msra.gmra.mrb[14].mxu1 %vm328_vm0, %v4234_v21  ;;  %v4823_v9 = vsel %vm968_vm12, %v4790_v8, %v4822_v10 }
0x220b   :  { %v4802_v19 = vadd.f32 %v4801_v31, %v4800_v23  ;;  %v4807_v0 = vadd.f32 %v4806_v41, %v4805_v44  ;;  %6540 = vmatpush3.bf16.msra.mxu1 %v8826_v15  ;;  %6353 = vmatprep.mubr.msk.f32.mxu1 %vm7164_vm1, %v8817_v45  ;;  %v4797_v37 = vadd.f32 %v4796_v35, %v4795_v51 }
0x220c   :  { %6541 = vmatprep.subr.bf16.mxu1 %v8820_v20 }
0x220d   :  { %v4803_v61 = vrot.slane %v4802_v19, 1  ;;  %v4808_v39 = vrot.slane %v4807_v0, 2  ;;  %v4824_v60 = vsel %vm970_vm13, %v4797_v37, %v4823_v9 }
0x220f   :  { %v4809_v27 = vadd.f32 %v4808_v39, %v4807_v0  ;;  %6543 = vmatpush3.bf16.msra.mxu1 %v8827_v29  ;;  %v4804_v3 = vadd.f32 %v4803_v61, %v4802_v19 }
0x2210   :  { %6556 = vmatprep.subr.bf16.mxu1 %v8820_v20 }
0x2211   :  { %v4810_v40 = vrot.slane %v4809_v27, 1  ;;  %v4825_v28 = vsel %vm972_vm14, %v4804_v3, %v4824_v60 }
0x2213   :  { %v4811_v50 = vadd.f32 %v4810_v40, %v4809_v27 }
0x2215   :  { %v4826_v34 = vsel %vm974_vm15, %v4811_v50, %v4825_v28 }
0x2216   :  { %6354 = vmatmul.mubr.msk.f32.vlgmr.msra.gmra.mrb[14].mxu1 %vm328_vm0, %v4826_v34 }
0x2217   :  { %6558 = vmatpush3.bf16.msra.mxu1 %v7663_v49  ;;  %6386 = vmatprep.mubr.msk.f32.mxu1 %vm7164_vm1, %v8817_v45 }
0x2218   :  { %6559 = vmatprep.subr.bf16.mxu1 %v8820_v20 }
0x221b   :  { %6561 = vmatpush3.bf16.msra.mxu1 %v7683_v42  ;;  %v8849_v42 = vld [vmem:[#allocation32_spill] sm:$0xff] }
0x221c   :  { %6562 = vmatprep.subr.bf16.mxu1 %v8820_v20 }
0x22e9   :  { %v4895_v52 = vpop.f32.mrb[14].mxu1 }
0x22ea   :  { %6806 = vtanh.f32 %v4895_v52  ;;  %v6355_v47 = vpop.f32.mrb[15].mxu1 }
0x22f4   :  { %v6807_v51 = vpop.eup %6806 }
0x22f5   :  { %4901 = vst.msk [vmem:[#allocation16 + $0x20] sm:$0xff] %vm328_vm0, %v6807_v51  ;;  %6365 = vmatmul.mubr.msk.f32.vlgmr.msra.gmra.mrb[28].mxu0 %vm328_vm0, %v6807_v51 }
0x22f6   :  { %6552 = vmatpush3.bf16.msra.mxu0 %v7479_v57  ;;  %6375 = vmatprep.mubr.msk.f32.mxu0 %vm7164_vm1, %v8817_v45 }
0x22f7   :  { %6553 = vmatprep.subr.bf16.mxu0 %v8820_v20 }
0x22fa   :  { %6555 = vmatpush3.bf16.msra.mxu0 %v7490_v62 }
0x22fd   :  { %6376 = vmatmul.mubr.msk.f32.vlgmr.msra.gmra.mrb[30].mxu0 %vm328_vm0, %v4234_v21 }
0x23c8   :  { %v5013_v49 = vpop.f32.mrb[28].mxu0 }
0x23c9   :  { %v5087_v23 = vadd.f32 %v8849_v42, %v5013_v49  ;;  %v6366_v55 = vpop.f32.mrb[29].mxu0 }
0x23d0   :  { %v5083_v2 = vpop.f32.mrb[30].mxu0 }
0x23d1   :  { %v5095_v44 = vadd.f32 %v5083_v2, %v7516_v17  ;;  %v6377_v24 = vpop.f32.mrb[31].mxu0  ;;  %v5088_v57 = vadd.f32 %v5087_v23, %v5083_v2 }
0x23d3   :  { %5097 = vrot.lane.b32.xlu1 %v5095_v44, %s7166_s15  ;;  %v5942_v14 = vmul.f32 -1.442695, %v5088_v57 }
0x23d5   :  { %6808 = vpow2.f32 %v5942_v14 }
0x23df   :  { %v6809_v6 = vpop.eup %6808 }
0x23e0   :  { %v5092_v31 = vadd.f32 1.0, %v6809_v6 }
0x23e2   :  { %6810 = vrcp.f32 %v5092_v31 }
0x23ec   :  { %v6811_v41 = vpop.eup %6810 }
0x23ed   :  { %v5107_v17 = vsub.f32 1.0, %v6811_v41  ;;  %v5113_v0 = vmul.f32 %v6811_v41, %v8388_v58 }
0x2445   :  { %v5098_v62 = vpop.permute.xlu1 %5097 }
0x2446   :  { %v5100_v56 = vmul.f32 %v6811_v41, %v5098_v62 }
0x2448   :  { %5102 = vrot.lane.b32.xlu0 %v5100_v56, %s7166_s15 }
0x24ba   :  { %v5103_v21 = vpop.permute.xlu0 %5102 }
0x24bb   :  { %v5105_v11 = vadd.f32 %v5103_v21, %v5087_v23 }
0x24bd   :  { %6812 = vtanh.f32 %v5105_v11 }
0x24c7   :  { %v6813_v35 = vpop.eup %6812 }
0x24c8   :  { %5109 = vrot.lane.b32.xlu0 %v6813_v35, %s7168_s8 }
0x253a   :  { %v5110_v19 = vpop.permute.xlu0 %5109 }
0x253b   :  { %v5112_v25 = vmul.f32 %v5110_v19, %v5107_v17 }
0x253d   :  { %v8564_v12 = vadd.f32 %v5113_v0, %v5112_v25 }
0x253f   :  { %v5190_v26 = vcombine.high %v8564_v12, %v8564_v12  ;;  %v5197_v61 = vrot.slane %v8564_v12, %v7526_v48 }
0x2541   :  { %v5204_v39 = vrot.slane %v5190_v26, %v7526_v48  ;;  %v5205_v8 = vcombine.high %v5197_v61, %v5197_v61  ;;  %v5213_v30 = vrot.slane %v5197_v61, %v7526_v48 }
0x2543   :  { %v5220_v37 = vrot.slane %v5204_v39, %v7526_v48  ;;  %v5227_v27 = vrot.slane %v5205_v8, %v7526_v48  ;;  %v5235_v36 = vcombine.high %v5213_v30, %v5213_v30  ;;  %v5242_v58 = vrot.slane %v5213_v30, %v7533_v54 }
0x2544   :  { %v5206_v10 = vcombine.high %v5204_v39, %v5204_v39 }
0x2545   :  { %v5250_v3 = vrot.slane %v5235_v36, %v7533_v54  ;;  %v5279_v40 = vmul.f32 %v5242_v58, %v7530_v53  ;;  %v5246_v9 = vrot.slane %v5227_v27, %v7533_v54  ;;  %v5237_v50 = vcombine.high %v5227_v27, %v5227_v27 }
0x2546   :  { %v5258_v28 = vrot.slane %v5220_v37, %v7533_v54  ;;  %v5236_v34 = vcombine.high %v5220_v37, %v5220_v37  ;;  %v5234_v51 = vrot.slane %v5206_v10, %v7526_v48 }
0x2547   :  { %v5281_v60 = vmul.f32 %v5250_v3, %v7543_v1  ;;  %5295 = vrot.lane.b32.xlu0 %v5279_v40, %s7168_s8  ;;  %v5280_v52 = vmul.f32 %v5246_v9, %v7539_v59  ;;  %v5254_v47 = vrot.slane %v5237_v50, %v7533_v54 }
0x2548   :  { %v5283_v53 = vmul.f32 %v5258_v28, %v7557_v22  ;;  %v5266_v49 = vrot.slane %v5236_v34, %v7533_v54  ;;  %v5262_v42 = vrot.slane %v5234_v51, %v7533_v54  ;;  %v5238_v23 = vcombine.high %v5234_v51, %v5234_v51 }
0x2549   :  { %5299 = vrot.lane.b32.xlu1 %v5281_v60, %s7168_s8  ;;  %v5282_v1 = vmul.f32 %v5254_v47, %v7551_v16 }
0x254a   :  { %v5285_v55 = vmul.f32 %v5266_v49, %v7569_v38  ;;  %v5284_v48 = vmul.f32 %v5262_v42, %v7565_v32  ;;  %v5270_v59 = vrot.slane %v5238_v23, %v7533_v54 }
0x254b   :  { %5297 = vrot.lane.b32.xlu0 %v5280_v52, %s7168_s8 }
0x254c   :  { %v5286_v22 = vmul.f32 %v5270_v59, %v7577_v46 }
0x254d   :  { %5303 = vrot.lane.b32.xlu1 %v5283_v53, %s7168_s8 }
0x254f   :  { %5301 = vrot.lane.b32.xlu0 %v5282_v1, %s7168_s8 }
0x2551   :  { %5307 = vrot.lane.b32.xlu1 %v5285_v55, %s7168_s8 }
0x2553   :  { %5305 = vrot.lane.b32.xlu0 %v5284_v48, %s7168_s8 }
0x2557   :  { %5309 = vrot.lane.b32.xlu0 %v5286_v22, %s7168_s8 }
0x25b9   :  { %v5296_v16 = vpop.permute.xlu0 %5295 }
0x25ba   :  { %v5319_v2 = vsel %vm328_vm0, %v5296_v16, 0.0 }
0x25bb   :  { %v5300_v44 = vpop.permute.xlu1 %5299  ;;  %5320 = vadd.xlane.f32.xlu1 %v5319_v2 }
0x25bc   :  { %v5325_v6 = vsel %vm328_vm0, %v5300_v44, 0.0 }
0x25bd   :  { %v5298_v38 = vpop.permute.xlu0 %5297 }
0x25be   :  { %v5322_v24 = vsel %vm328_vm0, %v5298_v38, 0.0 }
0x25bf   :  { %v5304_v57 = vpop.permute.xlu1 %5303  ;;  %5323 = vadd.xlane.f32.xlu0 %v5322_v24 }
0x25c0   :  { %v5331_v14 = vsel %vm328_vm0, %v5304_v57, 0.0 }
0x25c1   :  { %5332 = vadd.xlane.f32.xlu1 %v5331_v14  ;;  %v5302_v32 = vpop.permute.xlu0 %5301 }
0x25c2   :  { %v5328_v62 = vsel %vm328_vm0, %v5302_v32, 0.0 }
0x25c3   :  { %v5308_v31 = vpop.permute.xlu1 %5307  ;;  %5326 = vadd.xlane.f32.xlu0 %v5325_v6 }
0x25c4   :  { %v5337_v46 = vsel %vm328_vm0, %v5308_v31, 0.0 }
0x25c5   :  { %5338 = vadd.xlane.f32.xlu1 %v5337_v46  ;;  %v5306_v41 = vpop.permute.xlu0 %5305 }
0x25c6   :  { %v5334_v56 = vsel %vm328_vm0, %v5306_v41, 0.0 }
0x25c7   :  { %5329 = vadd.xlane.f32.xlu0 %v5328_v62 }
0x25c9   :  { %v5310_v21 = vpop.permute.xlu0 %5309 }
0x25ca   :  { %v5340_v11 = vsel %vm328_vm0, %v5310_v21, 0.0 }
0x25cb   :  { %5335 = vadd.xlane.f32.xlu0 %v5334_v56 }
0x25cf   :  { %5341 = vadd.xlane.f32.xlu0 %v5340_v11 }
0x2648   :  { %v5321_v17 = vpop.xlane.xlu1 %5320 }
0x2649   :  { %v5354_v26 = vrot.slane %v5321_v17, %v7592_v18 }
0x264c   :  { %v5324_v35 = vpop.xlane.xlu0 %5323 }
0x264d   :  { %v5358_v0 = vrot.slane %v5324_v35, %v7592_v18 }
0x264e   :  { %v5333_v61 = vpop.xlane.xlu1 %5332 }
0x264f   :  { %v5383_v8 = vsel %vm962_vm9, %v5358_v0, %v5354_v26  ;;  %v5370_v36 = vrot.slane %v5333_v61, %v7592_v18 }
0x2650   :  { %v5327_v19 = vpop.xlane.xlu0 %5326 }
0x2651   :  { %v5362_v25 = vrot.slane %v5327_v19, %v7592_v18 }
0x2652   :  { %v5339_v3 = vpop.xlane.xlu1 %5338 }
0x2653   :  { %v5384_v37 = vsel %vm964_vm10, %v5362_v25, %v5383_v8  ;;  %v5378_v50 = vrot.slane %v5339_v3, %v7592_v18 }
0x2654   :  { %v5330_v39 = vpop.xlane.xlu0 %5329 }
0x2655   :  { %v5366_v30 = vrot.slane %v5330_v39, %v7592_v18 }
0x2657   :  { %v5385_v27 = vsel %vm966_vm11, %v5366_v30, %v5384_v37 }
0x2658   :  { %v5336_v58 = vpop.xlane.xlu0 %5335  ;;  %v5386_v40 = vsel %vm968_vm12, %v5370_v36, %v5385_v27 }
0x2659   :  { %v5374_v10 = vrot.slane %v5336_v58, %v7592_v18 }
0x265b   :  { %v5387_v9 = vsel %vm970_vm13, %v5374_v10, %v5386_v40 }
0x265c   :  { %v5342_v60 = vpop.xlane.xlu0 %5341  ;;  %v5388_v34 = vsel %vm972_vm14, %v5378_v50, %v5387_v9 }
0x265d   :  { %v5382_v28 = vrot.slane %v5342_v60, %v7592_v18 }
0x265f   :  { %v5389_v52 = vsel %vm974_vm15, %v5382_v28, %v5388_v34 }
0x2660   :  { %v5391_v47 = vsel %vm977_vm2, %v5389_v52, -inf }
0x2661   :  { %5392 = vmax.xlane.f32.xlu1 %v5391_v47 }
0x26ee   :  { %v5393_v51 = vpop.xlane.xlu1 %5392 }
0x26ef   :  { %v5398_v53 = vrot.slane %v5393_v51, %v7533_v54  ;;  %v5402_v49 = vrot.slane %v5393_v51, %v7611_v4  ;;  %v5406_v1 = vrot.slane %v5393_v51, %v7614_v5  ;;  %v5414_v42 = vrot.slane %v5393_v51, %v7617_v7 }
0x26f0   :  { %v5422_v23 = vrot.slane %v5393_v51, %v8842_v33  ;;  %v5410_v59 = vrot.slane %v5393_v51, %v7623_v13  ;;  %v5418_v57 = vrot.slane %v5393_v51, %v7631_v43  ;;  %v5426_v31 = vrot.slane %v5393_v51, %v7635_v63 }
0x26f1   :  { %v5435_v55 = vsub.f32 %v5321_v17, %v5398_v53  ;;  %v5436_v48 = vsub.f32 %v5324_v35, %v5402_v49  ;;  %v5437_v22 = vsub.f32 %v5327_v19, %v5406_v1  ;;  %v5439_v16 = vsub.f32 %v5333_v61, %v5414_v42 }
0x26f2   :  { %v5441_v38 = vsub.f32 %v5339_v3, %v5422_v23  ;;  %v5438_v14 = vsub.f32 %v5330_v39, %v5410_v59  ;;  %v5440_v46 = vsub.f32 %v5336_v58, %v5418_v57  ;;  %v5442_v62 = vsub.f32 %v5342_v60, %v5426_v31 }
0x26f3   :  { %v5443_v2 = vmul.f32 1.442695, %v5435_v55  ;;  %v5445_v44 = vmul.f32 1.442695, %v5436_v48  ;;  %v5451_v24 = vmul.f32 1.442695, %v5439_v16 }
0x26f4   :  { %v5447_v32 = vmul.f32 1.442695, %v5437_v22  ;;  %v5455_v6 = vmul.f32 1.442695, %v5441_v38  ;;  %v5449_v41 = vmul.f32 1.442695, %v5438_v14 }
0x26f5   :  { %6814 = vpow2.f32 %v5443_v2  ;;  %v5453_v56 = vmul.f32 1.442695, %v5440_v46  ;;  %v5457_v35 = vmul.f32 1.442695, %v5442_v62 }
0x26f6   :  { %6816 = vpow2.f32 %v5445_v44 }
0x26f7   :  { %6818 = vpow2.f32 %v5451_v24 }
0x26f8   :  { %6820 = vpow2.f32 %v5447_v32 }
0x26f9   :  { %6822 = vpow2.f32 %v5455_v6 }
0x26fa   :  { %6824 = vpow2.f32 %v5449_v41 }
0x26fb   :  { %6826 = vpow2.f32 %v5453_v56 }
0x26fc   :  { %6828 = vpow2.f32 %v5457_v35 }
0x26ff   :  { %v6815_v21 = vpop.eup %6814 }
0x2700   :  { %v8631_v11 = vpop.eup %6816  ;;  %5468 = vperm.xlu0 %6606, %v6815_v21  }
0x2701   :  { %5471 = vperm.xlu1 %6607, %v8631_v11   ;;  %v8634_v17 = vpop.eup %6818 }
0x2702   :  { %v8636_v19 = vpop.eup %6820 }
0x2703   :  { %v8640_v0 = vpop.eup %6822 }
0x2704   :  { %5480 = vperm.xlu0 %6606, %v8634_v17   ;;  %v6825_v25 = vpop.eup %6824 }
0x2705   :  { %5474 = vperm.xlu1 %6607, %v8636_v19   ;;  %v8643_v26 = vpop.eup %6826 }
0x2706   :  { %v6829_v61 = vpop.eup %6828 }
0x2708   :  { %5486 = vperm.xlu0 %6606, %v8640_v0  }
0x2709   :  { %5477 = vperm.xlu1 %6607, %v6825_v25  }
0x270d   :  { %5483 = vperm.xlu1 %6607, %v8643_v26  }
0x2711   :  { %5489 = vperm.xlu1 %6607, %v6829_v61  }
0x277f   :  { %v5469_v8 = vpop.permute.xlu0 %5468 }
0x2780   :  { %v5472_v39 = vpop.permute.xlu1 %5471  ;;  %v5494_v27 = vrot.slane %v5469_v8, %v7592_v18 }
0x2781   :  { %v5498_v37 = vrot.slane %v5472_v39, %v7592_v18 }
0x2783   :  { %v5481_v58 = vpop.permute.xlu0 %5480  ;;  %v5523_v10 = vsel %vm962_vm9, %v5498_v37, %v5494_v27 }
0x2784   :  { %v5475_v30 = vpop.permute.xlu1 %5474  ;;  %v5510_v60 = vrot.slane %v5481_v58, %v7592_v18 }
0x2785   :  { %v5502_v36 = vrot.slane %v5475_v30, %v7592_v18  ;;  %v6866_v30 = vld [vmem:[#allocation2 + $0x10] sm:$0xff] }
0x2787   :  { %v5524_v9 = vsel %vm964_vm10, %v5502_v36, %v5523_v10  ;;  %v5487_v34 = vpop.permute.xlu0 %5486 }
0x2788   :  { %v5478_v3 = vpop.permute.xlu1 %5477  ;;  %v5518_v53 = vrot.slane %v5487_v34, %v7592_v18 }
0x2789   :  { %v5506_v40 = vrot.slane %v5478_v3, %v7592_v18 }
0x278b   :  { %v5525_v50 = vsel %vm966_vm11, %v5506_v40, %v5524_v9  ;;  %v6868_v40 = vld [vmem:[#allocation2 + $0x18] sm:$0xff] }
0x278c   :  { %v5484_v28 = vpop.permute.xlu1 %5483  ;;  %v5526_v47 = vsel %vm968_vm12, %v5510_v60, %v5525_v50 }
0x278d   :  { %v5514_v52 = vrot.slane %v5484_v28, %v7592_v18 }
0x278f   :  { %v5527_v51 = vsel %vm970_vm13, %v5514_v52, %v5526_v47 }
0x2790   :  { %v5490_v49 = vpop.permute.xlu1 %5489  ;;  %v5528_v42 = vsel %vm972_vm14, %v5518_v53, %v5527_v51  ;;  %v6869_v53 = vld [vmem:[#allocation2 + $0x20] sm:$0xff] }
0x2791   :  { %v5522_v1 = vrot.slane %v5490_v49, %v7592_v18 }
0x2793   :  { %v5529_v23 = vsel %vm974_vm15, %v5522_v1, %v5528_v42 }
0x2794   :  { %v5531_v55 = vsel %vm977_vm2, %v5529_v23, 0.0 }
0x2795   :  { %5532 = vadd.xlane.f32.xlu0 %v5531_v55 }
0x2822   :  { %v5533_v48 = vpop.xlane.xlu0 %5532 }
0x2823   :  { %v5566_v59 = vrot.slane %v5533_v48, %v7635_v63  ;;  %v5538_v22 = vrot.slane %v5533_v48, %v7533_v54  ;;  %v5542_v16 = vrot.slane %v5533_v48, %v7611_v4  ;;  %v5546_v2 = vrot.slane %v5533_v48, %v7614_v5 }
0x2824   :  { %v5550_v44 = vrot.slane %v5533_v48, %v7623_v13  ;;  %v5554_v14 = vrot.slane %v5533_v48, %v7617_v7  ;;  %v5558_v54 = vrot.slane %v5533_v48, %v7631_v43  ;;  %v5562_v5 = vrot.slane %v5533_v48, %v8842_v33 }
0x2825   :  { %6830 = vrcp.f32 %v5566_v59 }
0x2826   :  { %6832 = vrcp.f32 %v5538_v22 }
0x2827   :  { %6834 = vrcp.f32 %v5542_v16 }
0x2828   :  { %6836 = vrcp.f32 %v5546_v2 }
0x2829   :  { %6838 = vrcp.f32 %v5550_v44 }
0x282a   :  { %6840 = vrcp.f32 %v5554_v14 }
0x282b   :  { %6842 = vrcp.f32 %v5558_v54 }
0x282c   :  { %6844 = vrcp.f32 %v5562_v5 }
0x282f   :  { %v6831_v38 = vpop.eup %6830 }
0x2830   :  { %v6833_v24 = vpop.eup %6832  ;;  %v5590_v57 = vmul.f32 %v6831_v38, %v6829_v61 }
0x2831   :  { %v5576_v32 = vmul.f32 %v6833_v24, %v6815_v21  ;;  %v6835_v63 = vpop.eup %6834 }
0x2832   :  { %5628 = vperm.xlu0 %6606, %v5590_v57   ;;  %v5578_v4 = vmul.f32 %v6835_v63, %v8631_v11  ;;  %v6837_v6 = vpop.eup %6836  ;;  %v6864_v11 = vld [vmem:[#allocation2] sm:$0xff] }
0x2833   :  { %5593 = vperm.xlu1 %6607, %v5576_v32   ;;  %v5580_v13 = vmul.f32 %v6837_v6, %v8636_v19  ;;  %v6839_v31 = vpop.eup %6838  ;;  %v6870_v32 = vld [vmem:[#allocation2 + $0x28] sm:$0xff] }
0x2834   :  { %v5582_v7 = vmul.f32 %v6839_v31, %v6825_v25  ;;  %v6841_v46 = vpop.eup %6840  ;;  %v6865_v25 = vld [vmem:[#allocation2 + $0x8] sm:$0xff] }
0x2835   :  { %v5584_v41 = vmul.f32 %v6841_v46, %v8634_v17  ;;  %v6843_v62 = vpop.eup %6842 }
0x2836   :  { %v5586_v43 = vmul.f32 %v6843_v62, %v8643_v26  ;;  %v6845_v56 = vpop.eup %6844 }
0x2837   :  { %5598 = vperm.xlu1 %6607, %v5578_v4   ;;  %v5588_v21 = vmul.f32 %v6845_v56, %v8640_v0  ;;  %v6867_v0 = vld [vmem:[#allocation2 + $0x38] sm:$0xff] }
0x283b   :  { %5603 = vperm.xlu1 %6607, %v5580_v13  }
0x283f   :  { %5608 = vperm.xlu1 %6607, %v5582_v7  }
0x2843   :  { %5613 = vperm.xlu1 %6607, %v5584_v41  }
0x2847   :  { %5618 = vperm.xlu1 %6607, %v5586_v43  }
0x284b   :  { %5623 = vperm.xlu1 %6607, %v5588_v21  }
0x284f   :  { %5116 = vrot.lane.b32.xlu1 %v8564_v12, %s7168_s8 }
0x28b1   :  { %v8677_v39 = vpop.permute.xlu0 %5628 }
0x28b2   :  { %v5594_v33 = vpop.permute.xlu1 %5593  ;;  %v5638_v27 = vmul.f32 %v6867_v0, %v8677_v39 }
0x28b3   :  { %v5631_v35 = vmul.f32 %v6864_v11, %v5594_v33  ;;  %v5788_v16 = vrot.slane %v5594_v33, %v7592_v18 }
0x28b4   :  { %v5688_v50 = vsel %vm328_vm0, %v5638_v27, 0.0 }
0x28b5   :  { %v5639_v17 = vsel %vm328_vm0, %v5631_v35, 0.0  ;;  %v5689_v1 = vrot.slane %v5688_v50, 4  ;;  %v6871_v35 = vld [vmem:[#allocation2 + $0x30] sm:$0xff] }
0x28b6   :  { %v5599_v19 = vpop.permute.xlu1 %5598  ;;  %v5640_v36 = vrot.slane %v5639_v17, 4 }
0x28b7   :  { %v5632_v61 = vmul.f32 %v6865_v25, %v5599_v19  ;;  %v5792_v42 = vrot.slane %v5599_v19, %v7592_v18  ;;  %v5690_v54 = vadd.f32 %v5689_v1, %v5688_v50 }
0x28b8   :  { %v5641_v60 = vadd.f32 %v5640_v36, %v5639_v17 }
0x28b9   :  { %v5646_v26 = vsel %vm328_vm0, %v5632_v61, 0.0  ;;  %v5817_v4 = vsel %vm962_vm9, %v5792_v42, %v5788_v16  ;;  %v5816_v61 = vrot.slane %v8677_v39, %v7592_v18 }
0x28ba   :  { %v5604_v8 = vpop.permute.xlu1 %5603  ;;  %v5647_v12 = vrot.slane %v5646_v26, 4  ;;  %v5642_v55 = vrot.slane %v5641_v60, 2 }
0x28bb   :  { %v5633_v37 = vmul.f32 %v6866_v30, %v5604_v8  ;;  %v5796_v59 = vrot.slane %v5604_v8, %v7592_v18  ;;  %v5691_v30 = vrot.slane %v5690_v54, 2 }
0x28bc   :  { %v5648_v28 = vadd.f32 %v5647_v12, %v5646_v26  ;;  %v5643_v13 = vadd.f32 %v5642_v55, %v5641_v60 }
0x28bd   :  { %v5653_v58 = vsel %vm328_vm0, %v5633_v37, 0.0  ;;  %v5818_v7 = vsel %vm964_vm10, %v5796_v59, %v5817_v4  ;;  %v5692_v60 = vadd.f32 %v5691_v30, %v5690_v54 }
0x28be   :  { %v5654_v3 = vrot.slane %v5653_v58, 4  ;;  %v5609_v10 = vpop.permute.xlu1 %5608  ;;  %v5649_v48 = vrot.slane %v5648_v28, 2 }
0x28bf   :  { %v5634_v9 = vmul.f32 %v6868_v40, %v5609_v10  ;;  %v5800_v44 = vrot.slane %v5609_v10, %v7592_v18  ;;  %v5644_v10 = vrot.slane %v5643_v13, 1  ;;  %v5693_v42 = vrot.slane %v5692_v60, 1 }
0x28c0   :  { %v5655_v52 = vadd.f32 %v5654_v3, %v5653_v58  ;;  %v5650_v31 = vadd.f32 %v5649_v48, %v5648_v28 }
0x28c1   :  { %v5660_v34 = vsel %vm328_vm0, %v5634_v9, 0.0  ;;  %v5819_v62 = vsel %vm966_vm11, %v5800_v44, %v5818_v7 }
0x28c2   :  { %v5661_v47 = vrot.slane %v5660_v34, 4  ;;  %v5614_v51 = vpop.permute.xlu1 %5613  ;;  %v5656_v2 = vrot.slane %v5655_v52, 2  ;;  %v5651_v37 = vrot.slane %v5650_v31, 1 }
0x28c3   :  { %v5635_v49 = vmul.f32 %v6869_v53, %v5614_v51  ;;  %v5804_v14 = vrot.slane %v5614_v51, %v7592_v18  ;;  %v5645_v51 = vadd.f32 %v5644_v10, %v5643_v13 }
0x28c4   :  { %v5662_v23 = vadd.f32 %v5661_v47, %v5660_v34  ;;  %v5657_v41 = vadd.f32 %v5656_v2, %v5655_v52  ;;  %v5652_v28 = vadd.f32 %v5651_v37, %v5650_v31 }
0x28c5   :  { %v5667_v22 = vsel %vm328_vm0, %v5635_v49, 0.0  ;;  %v5820_v11 = vsel %vm968_vm12, %v5804_v14, %v5819_v62 }
0x28c6   :  { %v5668_v38 = vrot.slane %v5667_v22, 4  ;;  %v5619_v24 = vpop.permute.xlu1 %5618  ;;  %v5663_v57 = vrot.slane %v5662_v23, 2  ;;  %v5658_v36 = vrot.slane %v5657_v41, 1 }
0x28c7   :  { %v5636_v63 = vmul.f32 %v6870_v32, %v5619_v24  ;;  %v5808_v5 = vrot.slane %v5619_v24, %v7592_v18 }
0x28c8   :  { %v5669_v6 = vadd.f32 %v5668_v38, %v5667_v22  ;;  %v5664_v33 = vadd.f32 %v5663_v57, %v5662_v23  ;;  %v5659_v34 = vadd.f32 %v5658_v36, %v5657_v41  ;;  %v5703_v23 = vsel %vm962_vm9, %v5652_v28, %v5645_v51 }
0x28c9   :  { %v5674_v46 = vsel %vm328_vm0, %v5636_v63, 0.0  ;;  %v5821_v8 = vsel %vm970_vm13, %v5808_v5, %v5820_v11  ;;  %v5694_v22 = vadd.f32 %v5693_v42, %v5692_v60 }
0x28ca   :  { %v5670_v43 = vrot.slane %v5669_v6, 2  ;;  %v5675_v56 = vrot.slane %v5674_v46, 4  ;;  %v5624_v21 = vpop.permute.xlu1 %5623  ;;  %v5665_v40 = vrot.slane %v5664_v33, 1  ;;  %v5704_v55 = vsel %vm964_vm10, %v5659_v34, %v5703_v23 }
0x28cb   :  { %v5637_v19 = vmul.f32 %v6871_v35, %v5624_v21  ;;  %v5812_v25 = vrot.slane %v5624_v21, %v7592_v18 }
0x28cc   :  { %v5671_v17 = vadd.f32 %v5670_v43, %v5669_v6  ;;  %v5676_v26 = vadd.f32 %v5675_v56, %v5674_v46  ;;  %v5666_v53 = vadd.f32 %v5665_v40, %v5664_v33 }
0x28cd   :  { %v5681_v0 = vsel %vm328_vm0, %v5637_v19, 0.0  ;;  %v5822_v27 = vsel %vm972_vm14, %v5812_v25, %v5821_v8 }
0x28ce   :  { %v5677_v12 = vrot.slane %v5676_v26, 2  ;;  %v5682_v58 = vrot.slane %v5681_v0, 4  ;;  %v5117_v3 = vpop.permute.xlu1 %5116  ;;  %v5823_v9 = vsel %vm974_vm15, %v5816_v61, %v5822_v27  ;;  %v5672_v18 = vrot.slane %v5671_v17, 1 }
0x28cf   :  { %5828 = vst.msk [vmem:[#allocation19] sm:$0xff] %vm328_vm0, %v5117_v3  ;;  %6387 = vmatmul.mubr.msk.f32.vlgmr.msra.gmra.mrb[16].mxu1 %vm328_vm0, %v5117_v3  ;;  %v5705_v48 = vsel %vm966_vm11, %v5666_v53, %v5704_v55 }
0x28d0   :  { %v5678_v39 = vadd.f32 %v5677_v12, %v5676_v26  ;;  %v5683_v50 = vadd.f32 %v5682_v58, %v5681_v0  ;;  %5826 = vst.msk [vmem:[#allocation17 + $0x28] sm:$0xff] %vm977_vm2, %v5823_v9  ;;  %6564 = vmatpush3.bf16.msra.mxu1 %v8826_v15  ;;  %6397 = vmatprep.mubr.msk.f32.mxu1 %vm7164_vm1, %v8817_v45 }
0x28d1   :  { %6565 = vmatprep.subr.bf16.mxu1 %v8820_v20  ;;  %v5673_v49 = vadd.f32 %v5672_v18, %v5671_v17 }
0x28d2   :  { %v5679_v52 = vrot.slane %v5678_v39, 1  ;;  %v5684_v47 = vrot.slane %v5683_v50, 2 }
0x28d3   :  { %v5706_v20 = vsel %vm968_vm12, %v5673_v49, %v5705_v48 }
0x28d4   :  { %v5685_v1 = vadd.f32 %v5684_v47, %v5683_v50  ;;  %6567 = vmatpush3.bf16.msra.mxu1 %v8827_v29  ;;  %v5680_v15 = vadd.f32 %v5679_v52, %v5678_v39 }
0x28d6   :  { %v5686_v45 = vrot.slane %v5685_v1, 1  ;;  %v5707_v16 = vsel %vm970_vm13, %v5680_v15, %v5706_v20 }
0x28d8   :  { %v5687_v59 = vadd.f32 %v5686_v45, %v5685_v1 }
0x28da   :  { %v5708_v2 = vsel %vm972_vm14, %v5687_v59, %v5707_v16 }
0x28db   :  { %v5709_v44 = vsel %vm974_vm15, %v5694_v22, %v5708_v2 }
0x28dc   :  { %6398 = vmatmul.mubr.msk.f32.vlgmr.msra.gmra.mrb[16].mxu1 %vm328_vm0, %v5709_v44 }
0x28dd   :  { %7059 = shalt.err (!%p7056_p12)
}
0x28de   :  { %s7060_s6 = scalar_lea.hbm %s8788_s12, 768 }
0x28df   :  { %p7061_p13 = scmp.ne.s32.totalorder %s8788_s12, %s7060_s6  ;;  %p7064_p0 = scmp.lt.u32.totalorder %s7060_s6, %s8788_s12 }
0x28e1   :  { %p7066_p1 = pnand %p7064_p0, %p7061_p13 }
0x28e3   :  { %7069 = shalt.err (!%p7066_p1)
}
0x28e4   :  { %5853 = dma.vmem_to_hbm [thread:$0]  %s5848_s29, 768, %s8788_s12, [#allocation18], %s7155_s30, %s7155_s30, %s7156_s21  }
0x28e5   :  { %s7171_s9 = smov [#allocation19]  }
0x28e6   :  { %s5860_s16 = sshll.u32 %s7171_s9, 4  ;;  %s5861_s16 = int_to_ptr.vmem [resolvable:$true] %s5860_s16 }
0x28e7   :  { %s7070_s24 = scalar_lea.vmem %s5861_s16, 128  ;;  %p7075_p3 = scmp.lt.s32.totalorder %s5861_s16, %s5861_s16 }
0x28e8   :  { %p7071_p2 = scmp.ne.s32.totalorder %s5861_s16, %s7070_s24  ;;  %p7076_p4 = scmp.lt.s32.totalorder %s7070_s24, %s7070_s24 }
0x28ea   :  { %p7077_p5 = por %p7076_p4, %p7075_p3 }
0x28ec   :  { %p7078_p6 = pnand %p7077_p5, %p7071_p2 }
0x28ee   :  { %7081 = shalt.err (!%p7078_p6)
}
0x28ef   :  { %s7082_s20 = scalar_lea.hbm %s8789_s13, 128 }
0x28f0   :  { %p7083_p7 = scmp.ne.s32.totalorder %s8789_s13, %s7082_s20  ;;  %p7086_p8 = scmp.lt.u32.totalorder %s7082_s20, %s8789_s13 }
0x28f2   :  { %p7088_p9 = pnand %p7086_p8, %p7083_p7 }
0x28f4   :  { %7091 = shalt.err (!%p7088_p9)
}
0x28f5   :  { %5863 = dma.vmem_to_hbm [thread:$0]  %s5861_s16, 128, %s8789_s13, [#allocation18]  }
0x28f6   :  { %s7172_s5 = smov [#allocation16]   ;;  %s7173_s7 = smov [#allocation20]  }
0x28f7   :  { %s5835_s8 = sshll.u32 %s7172_s5, 4  ;;  %s5870_s29 = sshll.u32 %s7173_s7, 4  ;;  %s5836_s8 = int_to_ptr.vmem [resolvable:$true] %s5835_s8  ;;  %s5871_s29 = int_to_ptr.vmem [resolvable:$true] %s5870_s29 }
0x28f8   :  { %s7092_s28 = scalar_lea.vmem %s5836_s8, 768  ;;  %p7097_p11 = scmp.lt.s32.totalorder %s5836_s8, %s5836_s8 }
0x28f9   :  { %p7093_p10 = scmp.ne.s32.totalorder %s5836_s8, %s7092_s28  ;;  %p7098_p12 = scmp.lt.s32.totalorder %s7092_s28, %s7092_s28 }
0x28fb   :  { %p7099_p13 = por %p7098_p12, %p7097_p11 }
0x28fd   :  { %p7100_p0 = pnand %p7099_p13, %p7093_p10 }
0x29af   :  { %v5778_v29 = vpop.f32.mrb[16].mxu1 }
0x29b0   :  { %6846 = vtanh.f32 %v5778_v29  ;;  %v6399_v38 = vpop.f32.mrb[17].mxu1 }
0x29ba   :  { %v6847_v24 = vpop.eup %6846 }
0x29bb   :  { %5784 = vst.msk [vmem:[#allocation16 + $0x28] sm:$0xff] %vm328_vm0, %v6847_v24  ;;  %5829 = vst.msk [vmem:[#allocation20] sm:$0xff] %vm328_vm0, %v6847_v24 }
0x29bc   :  { %7103 = shalt.err (!%p7100_p0)
}
0x29bd   :  { %s7104_s18 = scalar_lea.hbm %s8787_s11, 768 }
0x29be   :  { %p7105_p1 = scmp.ne.s32.totalorder %s8787_s11, %s7104_s18  ;;  %p7108_p2 = scmp.lt.u32.totalorder %s7104_s18, %s8787_s11 }
0x29c0   :  { %p7110_p3 = pnand %p7108_p2, %p7105_p1 }
0x29c2   :  { %7113 = shalt.err (!%p7110_p3)
}
0x29c3   :  { %5841 = dma.vmem_to_hbm [thread:$0]  %s5836_s8, 768, %s8787_s11, [#allocation4], %s7155_s30, %s7155_s30, %s7156_s21  }
0x29c4   :  { %s7114_s23 = scalar_lea.vmem %s5871_s29, 128  ;;  %p7119_p5 = scmp.lt.s32.totalorder %s5871_s29, %s5871_s29 }
0x29c5   :  { %p7115_p4 = scmp.ne.s32.totalorder %s5871_s29, %s7114_s23  ;;  %p7120_p6 = scmp.lt.s32.totalorder %s7114_s23, %s7114_s23 }
0x29c7   :  { %p7121_p7 = por %p7120_p6, %p7119_p5 }
0x29c9   :  { %p7122_p8 = pnand %p7121_p7, %p7115_p4 }
0x29cb   :  { %7125 = shalt.err (!%p7122_p8)
}
0x29cc   :  { %s7126_s24 = scalar_lea.hbm %s8790_s14, 128 }
0x29cd   :  { %p7127_p9 = scmp.ne.s32.totalorder %s8790_s14, %s7126_s24  ;;  %p7130_p10 = scmp.lt.u32.totalorder %s7126_s24, %s8790_s14 }
0x29cf   :  { %p7132_p11 = pnand %p7130_p10, %p7127_p9 }
0x29d1   :  { %7135 = shalt.err (!%p7132_p11)
}
0x29d2   :  { %5873 = dma.vmem_to_hbm [thread:$0]  %s5871_s29, 128, %s8790_s14, [#allocation21]  }
0x29d3   :  { %7146 = dma.done.wait [#allocation4], 768  }
0x29d4   :  { %7147 = vsyncadd [#allocation4], 4294966528 }
0x29d5   :  { %7148 = dma.done.wait [#allocation18], 896  }
0x29d6   :  { %7149 = vsyncadd [#allocation18], 4294966400 }
0x29d7   :  { %7150 = dma.done.wait [#allocation21], 128  }
0x29d8   :  { %7151 = vsyncadd [#allocation21], 4294967168 }
0x29d9   :  { %5886 = vsyncpa [#allocation3], 1 }
0x29da   :  { %5887 = vsyncpa [#allocation6], 1 }
0x29db   :  { %5888 = vsyncpa [#allocation9], 1 }
0x29dc   :  { %5889 = vsyncpa [#allocation12], 1 }
0x29dd   :  { %5890 = vsyncpa [#allocation15], 1 }
0x29de   :  { %5891 = vsyncpa [#allocation4], 1 }
0x29df   :  { %5892 = vsyncpa [#allocation18], 1 }
0x29e0   :  { %5893 = vsyncpa [#allocation21], 1 }

</bundles_post_ra>
